<compile_context>
chip_gen: v7x
topology: tpu7x:2x2x1
jax: 0.10.0
libtpu: 0.0.40
codegen_flags: <defaults>
</compile_context>

<pallas_src>
import functools

import jax
import jax.numpy as jnp
from jax import lax
from jax.experimental import pallas as pl
from jax.experimental.pallas import tpu as pltpu


def _resnet2_kernel(x_ref, w1_ref, b1_ref, w2_ref, b2_ref, o_ref, *, H, W):
    """One image per grid step; all refs are VMEM tiles.

    x_ref : (1, H*W, C) f32   input (NHWC, spatial flattened)
    w1_ref: (C, C)      bf16  folded 1x1 weight, (Cin, Cout)
    b1_ref: (1, C)      f32   folded 1x1 bias
    w2_ref: (3, 3C, C)  bf16  folded 3x3 weight; one group per kernel row ky,
                              rows inside a group are [kx=0 | kx=1 | kx=2]
                              blocks of (Cin, Cout)
    b2_ref: (1, C)      f32   folded 3x3 bias
    o_ref : (1, H*W, C) f32   output
    """
    HW = H * W
    C = x_ref.shape[-1]
    x = x_ref[0]                                     # (HW, C) f32

    # ---- Conv 1x1 (BN folded) + SiLU: bf16 MXU operands, f32 accumulate ------
    y1 = jnp.dot(x.astype(jnp.bfloat16), w1_ref[...],
                 preferred_element_type=jnp.float32) + b1_ref[...]
    y1 = y1 * jax.nn.sigmoid(y1)                     # (HW, C) f32

    # ---- Conv 3x3, stride 1, pad 1 (BN folded) + SiLU ------------------------
    # Column (dx) shifts, masked once at the left/right image borders.
    xx = lax.broadcasted_iota(jnp.int32, (HW, 1), 0) % W
    s_m1 = jnp.where(xx >= 1,     jnp.roll(y1,  1, axis=0), 0.0)   # y1[j-1]
    s_p1 = jnp.where(xx <= W - 2, jnp.roll(y1, -1, axis=0), 0.0)   # y1[j+1]

    taps = jnp.concatenate(
        [s_m1.astype(jnp.bfloat16),
         y1.astype(jnp.bfloat16),
         s_p1.astype(jnp.bfloat16)], axis=1)         # (HW, 3C) bf16

    # Three fused K=3C matmuls (one per kernel row ky).
    z_top = jnp.dot(taps, w2_ref[0], preferred_element_type=jnp.float32)  # dy=-1
    z_mid = jnp.dot(taps, w2_ref[1], preferred_element_type=jnp.float32)  # dy= 0
    z_bot = jnp.dot(taps, w2_ref[2], preferred_element_type=jnp.float32)  # dy=+1

    # Row (dy) shift applied to the matmul outputs: shift by one whole image row
    # with zero fill at the top/bottom image borders.
    zero_row = jnp.zeros((W, C), jnp.float32)
    acc = z_mid
    acc = acc + jnp.concatenate([zero_row, z_top[:HW - W]], axis=0)
    acc = acc + jnp.concatenate([z_bot[W:], zero_row], axis=0)

    y2 = acc + b2_ref[...]
    y2 = y2 * jax.nn.sigmoid(y2)

    # ---- residual -------------------------------------------------------------
    o_ref[0] = x + y2


def resnet2_pallas_nhwc(x_nhwc, w1_k, b1_k, w2_k, b2_k):
    """Layout-native entry point: x is (N, H, W, C) f32, returns (N, H, W, C)."""
    N, H, W, C = x_nhwc.shape
    HW = H * W
    x = x_nhwc.reshape(N, HW, C)

    kernel = functools.partial(_resnet2_kernel, H=H, W=W)
    out = pl.pallas_call(
        kernel,
        out_shape=jax.ShapeDtypeStruct((N, HW, C), jnp.float32),
        grid=(N,),
        in_specs=[
            pl.BlockSpec((1, HW, C), lambda n: (n, 0, 0)),
            pl.BlockSpec((C, C), lambda n: (0, 0)),
            pl.BlockSpec((1, C), lambda n: (0, 0)),
            pl.BlockSpec((3, 3 * C, C), lambda n: (0, 0, 0)),
            pl.BlockSpec((1, C), lambda n: (0, 0)),
        ],
        out_specs=pl.BlockSpec((1, HW, C), lambda n: (n, 0, 0)),
        compiler_params=pltpu.CompilerParams(
            dimension_semantics=("parallel",),
            vmem_limit_bytes=32 * 1024 * 1024,
        ),
    )(x, w1_k, b1_k, w2_k, b2_k)
    # TODO(synk): for large H*W (e.g. 160x160 @ C>=256) add a spatial grid axis
    # with a 1-row halo (manual DMA / overlapping tiles) so per-step VMEM stays
    # within v7x's 64 MiB; at the demo shapes the whole image fits comfortably.
    return out.reshape(N, H, W, C)


def resnet2_pallas(x_nchw, w1_k, b1_k, w2_k, b2_k):
    # NCHW adapter for parity with the PyTorch module.  In a layout-native
    # (NHWC end-to-end) pipeline these transposes disappear; they are demo
    # plumbing, not part of the kernel.
    x = jnp.transpose(x_nchw, (0, 2, 3, 1)).astype(jnp.float32)
    out = resnet2_pallas_nhwc(x, w1_k, b1_k, w2_k, b2_k)
    return jnp.transpose(out, (0, 3, 1, 2))


# --------------------------- parameter setup -------------------------------

_EPS = 1e-5


def make_params(key, C):
    ks = jax.random.split(key, 10)
    conv1_w = jax.random.normal(ks[0], (C, C, 1, 1), jnp.float32) * 0.1   # OIHW
    conv2_w = jax.random.normal(ks[1], (C, C, 3, 3), jnp.float32) * 0.1   # OIHW
    g1 = jax.random.uniform(ks[2], (C,), jnp.float32, 0.5, 1.5)
    be1 = jax.random.normal(ks[3], (C,), jnp.float32) * 0.1
    m1 = jax.random.normal(ks[4], (C,), jnp.float32) * 0.1
    v1 = jax.random.uniform(ks[5], (C,), jnp.float32, 0.5, 1.5)
    g2 = jax.random.uniform(ks[6], (C,), jnp.float32, 0.5, 1.5)
    be2 = jax.random.normal(ks[7], (C,), jnp.float32) * 0.1
    m2 = jax.random.normal(ks[8], (C,), jnp.float32) * 0.1
    v2 = jax.random.uniform(ks[9], (C,), jnp.float32, 0.5, 1.5)
    return conv1_w, conv2_w, (g1, be1, m1, v1), (g2, be2, m2, v2)


def fold_bn(conv1_w, conv2_w, bn1, bn2):
    """Fold eval-mode BN into the conv weights; weights pre-cast to bf16 for the MXU."""
    g1, be1, m1, v1 = bn1
    g2, be2, m2, v2 = bn2
    s1 = g1 / jnp.sqrt(v1 + _EPS)
    s2 = g2 / jnp.sqrt(v2 + _EPS)
    eff_w1 = conv1_w[:, :, 0, 0] * s1[:, None]          # (Cout, Cin)
    eff_b1 = be1 - m1 * s1
    eff_w2 = conv2_w * s2[:, None, None, None]          # (Cout, Cin, 3, 3)
    eff_b2 = be2 - m2 * s2

    w1_k = eff_w1.T.astype(jnp.bfloat16)                # (Cin, Cout) bf16
    b1_k = eff_b1[None, :]                              # (1, C) f32
    # Per-ky groups, kx-major rows inside each group: (3, 3C, C) bf16
    w2_k = jnp.stack([
        jnp.concatenate([eff_w2[:, :, ky, kx].T for kx in range(3)], axis=0)
        for ky in range(3)]).astype(jnp.bfloat16)
    b2_k = eff_b2[None, :]                              # (1, C) f32
    return w1_k, b1_k, w2_k, b2_k


# --------------------------- pure-JAX reference -----------------------------

def _silu(x):
    return x * jax.nn.sigmoid(x)


def _bn(x, g, b, m, v):
    sh = (1, -1, 1, 1)
    return (x - m.reshape(sh)) / jnp.sqrt(v.reshape(sh) + _EPS) * g.reshape(sh) + b.reshape(sh)


def resnet2_ref(x, conv1_w, conv2_w, bn1, bn2):
    dn = ("NCHW", "OIHW", "NCHW")
    y = lax.conv_general_dilated(x, conv1_w, (1, 1), [(0, 0), (0, 0)],
                                 dimension_numbers=dn)
    y = _silu(_bn(y, *bn1))
    o = lax.conv_general_dilated(y, conv2_w, (1, 1), [(1, 1), (1, 1)],
                                 dimension_numbers=dn)
    o = _silu(_bn(o, *bn2))
    return x + o


# --------------------------------- main -------------------------------------

if __name__ == "__main__":
    # C=128 keeps the channel (lane) axis dense; total size stays small.
    N, C, H, W = 2, 128, 16, 16
    key = jax.random.PRNGKey(0)
    kx_, kp = jax.random.split(key)
    x = jax.random.normal(kx_, (N, C, H, W), jnp.float32)

    conv1_w, conv2_w, bn1, bn2 = make_params(kp, C)
    w1_k, b1_k, w2_k, b2_k = fold_bn(conv1_w, conv2_w, bn1, bn2)

    out = resnet2_pallas(x, w1_k, b1_k, w2_k, b2_k)
    out = jax.block_until_ready(out)

    ref = resnet2_ref(x, conv1_w, conv2_w, bn1, bn2)
    assert out.shape == (N, C, H, W)
    err = float(jnp.max(jnp.abs(out - ref)))
    rel = float(jnp.linalg.norm(out - ref) / jnp.linalg.norm(ref))
    # bf16 MXU operands (with folded-BN scales) -> looser tolerance than pure f32.
    assert err < 2.5e-1 and rel < 3e-2, (err, rel)
    print("KERNEL_OK")
</pallas_src>

<mosaic_0001>
module attributes {stable_mosaic.version = 11 : i64} {
  func.func @_resnet2_kernel(%arg0: i32, %arg1: memref<1x256x128xf32, #tpu.memory_space<vmem>>, %arg2: memref<128x128xbf16, #tpu.memory_space<vmem>>, %arg3: memref<1x128xf32, #tpu.memory_space<vmem>>, %arg4: memref<3x384x128xbf16, #tpu.memory_space<vmem>>, %arg5: memref<1x128xf32, #tpu.memory_space<vmem>>, %arg6: memref<1x256x128xf32, #tpu.memory_space<vmem>>) attributes {dimension_semantics = [#tpu.dimension_semantics<parallel>], iteration_bounds = array<i64: 2>, scalar_prefetch = 0 : i64, scratch_operands = 0 : i64, tpu.core_type = #tpu.core_type<tc>, window_params = [{transform_indices = @transform_0, window_bounds = array<i64: 1, 256, 128>}, {pipeline_mode = #tpu.pipeline_mode<synchronous>, transform_indices = @transform_1, window_bounds = array<i64: 128, 128>}, {pipeline_mode = #tpu.pipeline_mode<synchronous>, transform_indices = @transform_2, window_bounds = array<i64: 1, 128>}, {pipeline_mode = #tpu.pipeline_mode<synchronous>, transform_indices = @transform_3, window_bounds = array<i64: 3, 384, 128>}, {pipeline_mode = #tpu.pipeline_mode<synchronous>, transform_indices = @transform_4, window_bounds = array<i64: 1, 128>}, {transform_indices = @transform_5, window_bounds = array<i64: 1, 256, 128>}]} {
    %c0 = arith.constant 0 : index
    %c0_0 = arith.constant 0 : index
    %c0_1 = arith.constant 0 : index
    %0 = vector.load %arg1[%c0, %c0_0, %c0_1] : memref<1x256x128xf32, #tpu.memory_space<vmem>>, vector<1x256x128xf32>
    %1 = vector.shape_cast %0 : vector<1x256x128xf32> to vector<256x128xf32>
    %2 = arith.truncf %1 : vector<256x128xf32> to vector<256x128xbf16>
    %c0_2 = arith.constant 0 : index
    %c0_3 = arith.constant 0 : index
    %3 = vector.load %arg2[%c0_2, %c0_3] : memref<128x128xbf16, #tpu.memory_space<vmem>>, vector<128x128xbf16>
    %cst = arith.constant dense<0.000000e+00> : vector<256x128xf32>
    %4 = tpu.matmul %2, %3, %cst {dimension_numbers = #tpu.dot_dimension_numbers<[1], [0], [0], [1], [0, 0, 1, 1], [], []>} : vector<256x128xbf16>, vector<128x128xbf16>, vector<256x128xf32> -> vector<256x128xf32>
    %c0_4 = arith.constant 0 : index
    %c0_5 = arith.constant 0 : index
    %5 = vector.load %arg3[%c0_4, %c0_5] : memref<1x128xf32, #tpu.memory_space<vmem>>, vector<1x128xf32>
    %6 = vector.broadcast %5 : vector<1x128xf32> to vector<256x128xf32>
    %7 = arith.addf %4, %6 : vector<256x128xf32>
    %8 = arith.negf %7 : vector<256x128xf32>
    %9 = math.exp %8 : vector<256x128xf32>
    %cst_6 = arith.constant 1.000000e+00 : f32
    %10 = vector.broadcast %cst_6 : f32 to vector<256x128xf32>
    %11 = arith.addf %10, %9 : vector<256x128xf32>
    %12 = arith.divf %10, %11 : vector<256x128xf32>
    %13 = arith.mulf %7, %12 : vector<256x128xf32>
    %14 = tpu.iota {dimensions = array<i32: 0>} : vector<256x1xi32>
    %c16_i32 = arith.constant 16 : i32
    %c0_i32 = arith.constant 0 : i32
    %15 = arith.cmpi eq, %c16_i32, %c0_i32 : i32
    %c1_i32 = arith.constant 1 : i32
    %16 = arith.select %15, %c1_i32, %c16_i32 : i32
    %17 = vector.broadcast %16 : i32 to vector<256x1xi32>
    %18 = arith.remsi %14, %17 : vector<256x1xi32>
    %c0_i32_7 = arith.constant 0 : i32
    %19 = vector.broadcast %c0_i32_7 : i32 to vector<256x1xi32>
    %20 = arith.cmpi ne, %18, %19 : vector<256x1xi32>
    %c0_i32_8 = arith.constant 0 : i32
    %21 = vector.broadcast %c0_i32_8 : i32 to vector<256x1xi32>
    %22 = arith.cmpi slt, %18, %21 : vector<256x1xi32>
    %c0_i32_9 = arith.constant 0 : i32
    %23 = arith.cmpi slt, %16, %c0_i32_9 : i32
    %24 = vector.broadcast %23 : i1 to vector<256x1xi1>
    %25 = vector.broadcast %24 : vector<256x1xi1> to vector<256x1xi1>
    %26 = arith.xori %22, %25 : vector<256x1xi1>
    %27 = arith.andi %26, %20 : vector<256x1xi1>
    %28 = vector.broadcast %16 : i32 to vector<256x1xi32>
    %29 = arith.addi %18, %28 : vector<256x1xi32>
    %30 = arith.select %27, %29, %18 : vector<256x1xi1>, vector<256x1xi32>
    %c1_i32_10 = arith.constant 1 : i32
    %31 = vector.broadcast %c1_i32_10 : i32 to vector<256x1xi32>
    %32 = arith.cmpi sge, %30, %31 : vector<256x1xi32>
    %33 = vector.extract_strided_slice %13 {offsets = [255, 0], sizes = [1, 128], strides = [1, 1]} : vector<256x128xf32> to vector<1x128xf32>
    %34 = vector.extract_strided_slice %13 {offsets = [0, 0], sizes = [255, 128], strides = [1, 1]} : vector<256x128xf32> to vector<255x128xf32>
    %35 = tpu.concatenate %33, %34 in 0 : vector<1x128xf32>, vector<255x128xf32> -> vector<256x128xf32>
    %cst_11 = arith.constant 0.000000e+00 : f32
    %36 = vector.shape_cast %32 : vector<256x1xi1> to vector<256x1xi1>
    %37 = vector.broadcast %36 : vector<256x1xi1> to vector<256x128xi1>
    %38 = vector.broadcast %cst_11 : f32 to vector<256x128xf32>
    %39 = arith.select %37, %35, %38 : vector<256x128xi1>, vector<256x128xf32>
    %c14_i32 = arith.constant 14 : i32
    %40 = vector.broadcast %c14_i32 : i32 to vector<256x1xi32>
    %41 = arith.cmpi sle, %30, %40 : vector<256x1xi32>
    %42 = vector.extract_strided_slice %13 {offsets = [1, 0], sizes = [255, 128], strides = [1, 1]} : vector<256x128xf32> to vector<255x128xf32>
    %43 = vector.extract_strided_slice %13 {offsets = [0, 0], sizes = [1, 128], strides = [1, 1]} : vector<256x128xf32> to vector<1x128xf32>
    %44 = tpu.concatenate %42, %43 in 0 : vector<255x128xf32>, vector<1x128xf32> -> vector<256x128xf32>
    %cst_12 = arith.constant 0.000000e+00 : f32
    %45 = vector.shape_cast %41 : vector<256x1xi1> to vector<256x1xi1>
    %46 = vector.broadcast %45 : vector<256x1xi1> to vector<256x128xi1>
    %47 = vector.broadcast %cst_12 : f32 to vector<256x128xf32>
    %48 = arith.select %46, %44, %47 : vector<256x128xi1>, vector<256x128xf32>
    %49 = arith.truncf %39 : vector<256x128xf32> to vector<256x128xbf16>
    %50 = arith.truncf %13 : vector<256x128xf32> to vector<256x128xbf16>
    %51 = arith.truncf %48 : vector<256x128xf32> to vector<256x128xbf16>
    %52 = tpu.concatenate %49, %50, %51 in 1 : vector<256x128xbf16>, vector<256x128xbf16>, vector<256x128xbf16> -> vector<256x384xbf16>
    %c0_13 = arith.constant 0 : index
    %c0_14 = arith.constant 0 : index
    %c0_15 = arith.constant 0 : index
    %53 = vector.load %arg4[%c0_13, %c0_14, %c0_15] : memref<3x384x128xbf16, #tpu.memory_space<vmem>>, vector<1x384x128xbf16>
    %54 = vector.shape_cast %53 : vector<1x384x128xbf16> to vector<384x128xbf16>
    %cst_16 = arith.constant dense<0.000000e+00> : vector<256x128xf32>
    %55 = tpu.matmul %52, %54, %cst_16 {dimension_numbers = #tpu.dot_dimension_numbers<[1], [0], [0], [1], [0, 0, 1, 1], [], []>} : vector<256x384xbf16>, vector<384x128xbf16>, vector<256x128xf32> -> vector<256x128xf32>
    %c1 = arith.constant 1 : index
    %c0_17 = arith.constant 0 : index
    %c0_18 = arith.constant 0 : index
    %56 = vector.load %arg4[%c1, %c0_17, %c0_18] : memref<3x384x128xbf16, #tpu.memory_space<vmem>>, vector<1x384x128xbf16>
    %57 = vector.shape_cast %56 : vector<1x384x128xbf16> to vector<384x128xbf16>
    %cst_19 = arith.constant dense<0.000000e+00> : vector<256x128xf32>
    %58 = tpu.matmul %52, %57, %cst_19 {dimension_numbers = #tpu.dot_dimension_numbers<[1], [0], [0], [1], [0, 0, 1, 1], [], []>} : vector<256x384xbf16>, vector<384x128xbf16>, vector<256x128xf32> -> vector<256x128xf32>
    %c2 = arith.constant 2 : index
    %c0_20 = arith.constant 0 : index
    %c0_21 = arith.constant 0 : index
    %59 = vector.load %arg4[%c2, %c0_20, %c0_21] : memref<3x384x128xbf16, #tpu.memory_space<vmem>>, vector<1x384x128xbf16>
    %60 = vector.shape_cast %59 : vector<1x384x128xbf16> to vector<384x128xbf16>
    %cst_22 = arith.constant dense<0.000000e+00> : vector<256x128xf32>
    %61 = tpu.matmul %52, %60, %cst_22 {dimension_numbers = #tpu.dot_dimension_numbers<[1], [0], [0], [1], [0, 0, 1, 1], [], []>} : vector<256x384xbf16>, vector<384x128xbf16>, vector<256x128xf32> -> vector<256x128xf32>
    %cst_23 = arith.constant 0.000000e+00 : f32
    %62 = vector.broadcast %cst_23 : f32 to vector<16x128xf32>
    %63 = vector.extract_strided_slice %55 {offsets = [0, 0], sizes = [240, 128], strides = [1, 1]} : vector<256x128xf32> to vector<240x128xf32>
    %64 = tpu.concatenate %62, %63 in 0 : vector<16x128xf32>, vector<240x128xf32> -> vector<256x128xf32>
    %65 = arith.addf %58, %64 : vector<256x128xf32>
    %66 = vector.extract_strided_slice %61 {offsets = [16, 0], sizes = [240, 128], strides = [1, 1]} : vector<256x128xf32> to vector<240x128xf32>
    %67 = tpu.concatenate %66, %62 in 0 : vector<240x128xf32>, vector<16x128xf32> -> vector<256x128xf32>
    %68 = arith.addf %65, %67 : vector<256x128xf32>
    %c0_24 = arith.constant 0 : index
    %c0_25 = arith.constant 0 : index
    %69 = vector.load %arg5[%c0_24, %c0_25] : memref<1x128xf32, #tpu.memory_space<vmem>>, vector<1x128xf32>
    %70 = vector.broadcast %69 : vector<1x128xf32> to vector<256x128xf32>
    %71 = arith.addf %68, %70 : vector<256x128xf32>
    %72 = arith.negf %71 : vector<256x128xf32>
    %73 = math.exp %72 : vector<256x128xf32>
    %cst_26 = arith.constant 1.000000e+00 : f32
    %74 = vector.broadcast %cst_26 : f32 to vector<256x128xf32>
    %75 = arith.addf %74, %73 : vector<256x128xf32>
    %76 = arith.divf %74, %75 : vector<256x128xf32>
    %77 = arith.mulf %71, %76 : vector<256x128xf32>
    %78 = arith.addf %1, %77 : vector<256x128xf32>
    %c0_27 = arith.constant 0 : index
    %c0_28 = arith.constant 0 : index
    %c0_29 = arith.constant 0 : index
    %79 = vector.load %arg6[%c0_27, %c0_28, %c0_29] : memref<1x256x128xf32, #tpu.memory_space<vmem>>, vector<1x256x128xf32>
    %80 = vector.shape_cast %79 : vector<1x256x128xf32> to vector<256x128xf32>
    %81 = vector.shape_cast %78 : vector<256x128xf32> to vector<1x256x128xf32>
    tpu.vector_store %arg6[%c0_27, %c0_28, %c0_29], %81 {strides = array<i32>} : memref<1x256x128xf32, #tpu.memory_space<vmem>>, vector<1x256x128xf32>,
    return
  }
  func.func @transform_0(%arg0: i32) -> (i32, i32, i32) {
    %c0_i32 = arith.constant 0 : i32
    %c0_i32_0 = arith.constant 0 : i32
    %c0_i32_1 = arith.constant 0 : i32
    return %arg0, %c0_i32, %c0_i32_0 : i32, i32, i32
  }
  func.func @transform_1(%arg0: i32) -> (i32, i32) {
    %c0_i32 = arith.constant 0 : i32
    %c0_i32_0 = arith.constant 0 : i32
    %c0_i32_1 = arith.constant 0 : i32
    return %c0_i32, %c0_i32_0 : i32, i32
  }
  func.func @transform_2(%arg0: i32) -> (i32, i32) {
    %c0_i32 = arith.constant 0 : i32
    %c0_i32_0 = arith.constant 0 : i32
    %c0_i32_1 = arith.constant 0 : i32
    return %c0_i32, %c0_i32_0 : i32, i32
  }
  func.func @transform_3(%arg0: i32) -> (i32, i32, i32) {
    %c0_i32 = arith.constant 0 : i32
    %c0_i32_0 = arith.constant 0 : i32
    %c0_i32_1 = arith.constant 0 : i32
    %c0_i32_2 = arith.constant 0 : i32
    return %c0_i32, %c0_i32_0, %c0_i32_1 : i32, i32, i32
  }
  func.func @transform_4(%arg0: i32) -> (i32, i32) {
    %c0_i32 = arith.constant 0 : i32
    %c0_i32_0 = arith.constant 0 : i32
    %c0_i32_1 = arith.constant 0 : i32
    return %c0_i32, %c0_i32_0 : i32, i32
  }
  func.func @transform_5(%arg0: i32) -> (i32, i32, i32) {
    %c0_i32 = arith.constant 0 : i32
    %c0_i32_0 = arith.constant 0 : i32
    %c0_i32_1 = arith.constant 0 : i32
    return %arg0, %c0_i32, %c0_i32_0 : i32, i32, i32
  }
}

</mosaic_0001>

<bundles_post_ra>
// kernel: tpu_custom_call.1
= control target key start
LH: loop header
LB: loop body
LE: loop exit
PB: predicated region body
PF: predicated region fallthrough
CT: control target
= control target key end

     0   :  { %10 = vsyncpa [#allocation3], 0  ;;  %s7701_s0 = inlined_call_operand.hbm [shape: f32[2,256,128], index: 0, kind: input, shape index: {}]   ;;  %s7702_s1 = inlined_call_operand.hbm [shape: bf16[128,128], index: 1, kind: input, shape index: {}]   ;;  %s7703_s2 = inlined_call_operand.vmem [shape: f32[1,128], index: 2, kind: input, shape index: {}]   ;;  %s7704_s3 = inlined_call_operand.hbm [shape: bf16[3,384,128], index: 3, kind: input, shape index: {}]   ;;  %s7705_s4 = inlined_call_operand.vmem [shape: f32[1,128], index: 4, kind: input, shape index: {}]   ;;  %s7706_s5 = inlined_call_operand.hbm [shape: f32[2,256,128], index: 5, kind: output, shape index: {}]  }
   0x1   :  { %12 = vsyncpa [#allocation3 + $0x1], 0 }
   0x2   :  { %13 = vsyncpa [#allocation6], 0 }
   0x3   :  { %14 = vsyncpa [#allocation4], 0 }
   0x4   :  { %16 = vsyncpa [#allocation4 + $0x1], 0  ;;  %s5447_s18 = smov 0   ;;  %s5449_s19 = smov 0  }
   0x5   :  { %s5451_s20 = smov 0   ;;  %s5453_s21 = smov 0  }
   0x6 LB: > { %s5468_s22 = sadd.s32 4294967295, %s5404_s21   ;;  %s3727_s23 = sadd.s32 4294967294, %s5404_s21   ;;  %s5404_s21 = sphi %s5453_s21, %s8195_s21   ;;  %s5400_s20 = sphi %s5451_s20, %s8194_s20   ;;  %s5396_s19 = sphi %s5449_s19, %s8193_s19   ;;  %s5392_s18 = sphi %s5447_s18, %s8192_s18  }
   0x7   : > { %p42_p0 = scmp.ne.s32.totalorder %s5396_s19, %s5392_s18  ;;  %p7707_p1 = scmp.eq.s32.totalorder %s5468_s22, 0 }
   0x8   : > { %p156_p3 = scmp.eq.s32.totalorder %s3727_s23, 1  ;;  %p3728_p5 = scmp.ge.s32.totalorder %s5404_s21, 1 }
   0x9   : > { %p5477_p4 = por %p7707_p1, %p42_p0  ;;  %p163_p7 = scmp.lt.s32.totalorder %s5404_s21, 3 }
   0xa   : > { %p5482_p6 = por %p156_p3, %p42_p0  ;;  %s5406_s27 = smov [#allocation5]  }
   0xb   : > { %s7807_s24 = scalar_select %p5477_p4, 1, 0 }
   0xc   : > { %s7808_s25 = scalar_select %p5482_p6, 1, 0 }
   0xd   : > { %p5487_p8 = pnand %p3728_p5, %p163_p7  ;;  %s175_s28 = sshll.u32 %s5406_s27, 4  ;;  %s5491_s28 = int_to_ptr.vmem [resolvable:$true] %s175_s28 }
   0xe   : > { %s5407_s30 = smov [#allocation7]   ;;  %s5248_s9 = scalar_lea.hbm %s7702_s1, 1024 }
   0xf   : > { %p4817_p9 = pneg %p5487_p8  ;;  %s191_s6 = sshll.u32 %s5407_s30, 4  ;;  %s5502_s6 = int_to_ptr.vmem [resolvable:$true] %s191_s6 }
  0x10   : > { %p5249_p12 = scmp.ne.s32.totalorder %s7702_s1, %s5248_s9  ;;  %p5255_p5 = scmp.lt.u32.totalorder %s5248_s9, %s7702_s1 }
  0x11   : > { %p5498_p11 = pnand %p4817_p9, %p7707_p1 }
  0x13   : > { %p5250_p13 = pneg %p5498_p11 }
  0x15   : > { %p5251_p0 = pnand %p5250_p13, %p5249_p12 }
  0x17   : > { %p5252_p3 = pneg %p5251_p0 }
  0x19   : > { %p5257_p7 = pnand %p5255_p5, %p5252_p3 }
  0x1b   : > { %5260 = shalt.err (!%p5257_p7)
}
  0x1c   : > { %s5261_s14 = scalar_lea.vmem %s5491_s28, 1024  ;;  %p5269_p2 = scmp.lt.s32.totalorder %s5491_s28, %s5491_s28 }
  0x1d   : > { %p5262_p9 = scmp.ne.s32.totalorder %s5491_s28, %s5261_s14  ;;  %p5270_p12 = scmp.lt.s32.totalorder %s5261_s14, %s5261_s14 }
  0x1f   : > { %p5264_p10 = pnand %p5262_p9, %p5250_p13  ;;  %p5271_p0 = por %p5270_p12, %p5269_p2 }
  0x21   : > { %p5265_p1 = pneg %p5264_p10 }
  0x23   : > { %p5272_p6 = pnand %p5271_p0, %p5265_p1 }
  0x25   : > { %5275 = shalt.err (!%p5272_p6)
}
  0x26   : > { %s5408_s15 = smov 64   ;;  %s5409_s16 = smov 4  }
  0x27   : > { %4820 = dma.hbm_to_vmem [thread:$0]  (!%p5498_p11), %s7702_s1, 1024, %s5491_s28, [#allocation6], %s5408_s15, %s5408_s15, %s5409_s16  }
  0x28   : > { %s5276_s7 = scalar_lea.hbm %s7704_s3, 9216 }
  0x29   : > { %p5277_p2 = scmp.ne.s32.totalorder %s7704_s3, %s5276_s7  ;;  %p5283_p10 = scmp.lt.u32.totalorder %s5276_s7, %s7704_s3 }
  0x2b   : > { %p5279_p1 = pnand %p5277_p2, %p5250_p13 }
  0x2d   : > { %p5280_p6 = pneg %p5279_p1 }
  0x2f   : > { %p5285_p3 = pnand %p5283_p10, %p5280_p6 }
  0x31   : > { %5288 = shalt.err (!%p5285_p3)
}
  0x32   : > { %s5289_s28 = scalar_lea.vmem %s5502_s6, 9216  ;;  %p5297_p12 = scmp.lt.s32.totalorder %s5502_s6, %s5502_s6 }
  0x33   : > { %p5290_p5 = scmp.ne.s32.totalorder %s5502_s6, %s5289_s28  ;;  %p5298_p0 = scmp.lt.s32.totalorder %s5289_s28, %s5289_s28 }
  0x35   : > { %p5292_p7 = pnand %p5290_p5, %p5250_p13  ;;  %p5299_p2 = por %p5298_p0, %p5297_p12 }
  0x37   : > { %p5293_p9 = pneg %p5292_p7 }
  0x39   : > { %p5300_p1 = pnand %p5299_p2, %p5293_p9 }
  0x3b   : > { %5303 = shalt.err (!%p5300_p1)
}
  0x3c   : > { %4823 = dma.hbm_to_vmem [thread:$0]  (!%p5498_p11), %s7704_s3, 9216, %s5502_s6, [#allocation6], %s5408_s15, %s5408_s15, %s5409_s16  }
  0x3d   : > { %s5557_s14 = sadd.s32 1, %s5404_s21   ;;  %s29_s29 = sadd.s32 1, %s5400_s20 }
  0x3e   : > { %s26_s17 = ssub.s32 %s5404_s21, %s5557_s14  ;;  %p36_p13 = scmp.ne.s32.totalorder %s5400_s20, %s5396_s19 }
  0x3f   : > { %p27_p6 = scmp.eq.s32.totalorder %s26_s17, 0  ;;  %p37_p10 = scmp.eq.s32.totalorder %s5404_s21, 0 }
  0x40   : > { %p7811_p3 = scmp.eq.s32.totalorder %s5468_s22, 1  ;;  %p4834_p7 = scmp.lt.s32.totalorder %s5404_s21, 2 }
  0x41   : > { %s5573_s27 = scalar_select %p27_p6, %s5400_s20, %s29_s29  }
  0x42   : > { %p5567_p5 = por %p7811_p3, %p36_p13  ;;  %p38_p9 = por %p37_p10, %p36_p13 }
  0x43   : > { %s208_s30 = sand.u32 1, %s5400_s20   ;;  %s4179_s6 = sshll.u32 %s5404_s21, 12 }
  0x44   : > { %s7812_s23 = scalar_select %p5567_p5, 1, 0 }
  0x45   : > { %s3732_s7 = sshll.u32 %s208_s30, 8  ;;  %s5580_s8 = scalar_lea.hbm %s7701_s0, %s4179_s6 }
  0x46   : > { %s212_s9 = scalar_lea.vmem [#allocation2], %s3732_s7  ;;  %p5584_p11 = pnand %p4834_p7, %p38_p9 }
  0x47   : > { %s219_s10 = sshll.u32 %s212_s9, 4  ;;  %s5588_s28 = scalar_lea.sflag [#allocation3], %s208_s30  ;;  %s5582_s10 = int_to_ptr.vmem [resolvable:$true] %s219_s10 }
  0x48   : > { %s5304_s12 = scalar_lea.hbm %s5580_s8, 4096  ;;  %p5306_p0 = pneg %p5584_p11 }
  0x49   : > { %p5305_p12 = scmp.ne.s32.totalorder %s5580_s8, %s5304_s12  ;;  %s5309_s17 = scalar_lea.hbm %s7701_s0, 8192 }
  0x4a   : > { %p5310_p13 = scmp.lt.u32.totalorder %s5580_s8, %s7701_s0  ;;  %p5311_p6 = scmp.lt.u32.totalorder %s5309_s17, %s5304_s12 }
  0x4b   : > { %p5307_p2 = pnand %p5306_p0, %p5305_p12  ;;  %p5313_p3 = scmp.lt.u32.totalorder %s5304_s12, %s5580_s8 }
  0x4c   : > { %p5312_p10 = por %p5311_p6, %p5310_p13 }
  0x4d   : > { %p5308_p1 = pneg %p5307_p2 }
  0x4e   : > { %p5314_p7 = por %p5313_p3, %p5312_p10 }
  0x50   : > { %p5315_p9 = pnand %p5314_p7, %p5308_p1 }
  0x52   : > { %5318 = shalt.err (!%p5315_p9)
}
  0x53   : > { %s5319_s30 = scalar_lea.vmem %s5582_s10, 4096  ;;  %s5410_s15 = smov [#allocation2]  }
  0x54   : > { %p5320_p12 = scmp.ne.s32.totalorder %s5582_s10, %s5319_s30  ;;  %s5324_s16 = sshll.u32 %s5410_s15, 4  ;;  %s5325_s16 = int_to_ptr.vmem [resolvable:$false] %s5324_s16 }
  0x55   : > { %s5326_s9 = scalar_lea.vmem %s5325_s16, 8192  ;;  %p5327_p4 = scmp.lt.s32.totalorder %s5582_s10, %s5325_s16 }
  0x56   : > { %p5322_p2 = pnand %p5320_p12, %p5306_p0  ;;  %p5328_p13 = scmp.lt.s32.totalorder %s5326_s9, %s5319_s30 }
  0x58   : > { %p5323_p5 = pneg %p5322_p2  ;;  %p5329_p6 = por %p5328_p13, %p5327_p4 }
  0x5a   : > { %p5330_p10 = pnand %p5329_p6, %p5323_p5 }
  0x5c   : > { %5333 = shalt.err (!%p5330_p10)
}
  0x5d   : > { %s5411_s12 = smov 128   ;;  %s5412_s13 = smov 8  }
  0x5e   : > { %4827 = dma.hbm_to_vmem [thread:$0]  (!%p5584_p11), %s5580_s8, 4096, %s5582_s10, %s5588_s28, %s5411_s12, %s5411_s12, %s5412_s13  }
  0x5f   : > { %231 = sbr.rel (%p5487_p8) target bundleno = 1055 (0x41f), region = 40 }
  0x66   : > { %s5619_s29 = sand.u32 1, %s5396_s19   ;;  %p7814_p4 = scmp.ne.s32.totalorder %s7807_s24, 0 }
  0x67   : > { %s3736_s17 = sshll.u32 %s5619_s29, 8  ;;  %s234_s7 = scalar_lea.sflag [#allocation3], %s5619_s29 }
  0x68   : > { %s5625_s6 = scalar_lea.vmem [#allocation2], %s3736_s17 }
  0x69   : > { %5379 = dma.done.wait (%p7814_p4), %s234_s7, 4096  }
  0x6a   : > { %5381 = vsyncadd (%p7814_p4), %s234_s7, 4294963200  ;;  %p7815_p5 = scmp.eq.s32.totalorder %s5468_s22, 0 }
  0x6c   : > { %5383 = dma.done.wait (%p7815_p5), [#allocation6], 10240   ;;  %p7816_p8 = pmov %p7815_p5 }
  0x6d   : > { %v4879_v0 = vld [vmem:[#allocation5] sm:$0xff]   ;;  %v4880_v1 = vld [vmem:[#allocation5 + $0x8] sm:$0xff]   ;;  %v4881_v2 = vld [vmem:[#allocation5 + $0x10] sm:$0xff]   ;;  %vm7752_vm0 = vcmask 1046528   ;;  %vm7753_vm4 = vmmov 1   ;;  %vm7749_vm14 = vcmask 1040384  }
  0x6e   : > { %5385 = vsyncadd (%p7816_p8), [#allocation6], 4294957056  ;;  %4613 = vmatprep.subr.bf16.mxu0 %v4879_v0  ;;  %v4882_v3 = vld [vmem:[#allocation5 + $0x18] sm:$0xff]   ;;  %v273_v4 = vld [vmem:[%s5625_s6] sm:$0xff]  ;;  %s7396_s11 = scalar_lea.vmem [#allocation8], %s3736_s17  ;;  %s4180_s28 = sshll.u32 %s5468_s22, 12 }
  0x6f   : > { %4614 = vmatpush3.bf16.msra.mxu0 %v4879_v0  ;;  %v274_v5 = vld [vmem:[%s5625_s6 + $0x8] sm:$0xff]  ;;  %v4883_v7 = vld [vmem:[#allocation5 + $0x20] sm:$0xff]   ;;  %v4885_v9 = vld [vmem:[#allocation5 + $0x30] sm:$0xff]   ;;  %s3635_s30 = sshll.u32 %s7396_s11, 4  ;;  %s7652_s9 = scalar_lea.hbm %s7706_s5, %s4180_s28  ;;  %s7654_s30 = int_to_ptr.vmem [resolvable:$true] %s3635_s30 }
  0x70   : > { %4615 = vmatprep.subr.bf16.mxu0 %v4880_v1  ;;  %v305_v6 = vpack.c.bf16 %v274_v5, %v273_v4  ;;  %v4884_v8 = vld [vmem:[#allocation5 + $0x28] sm:$0xff]   ;;  %v4886_v10 = vld [vmem:[#allocation5 + $0x38] sm:$0xff]   ;;  %v275_v11 = vld [vmem:[%s5625_s6 + $0x10] sm:$0xff]  ;;  %s3622_s22 = scalar_lea.sflag [#allocation4], %s5619_s29  ;;  %s5334_s12 = scalar_lea.vmem %s7654_s30, 4096 }
  0x71   : > { %v276_v12 = vld [vmem:[%s5625_s6 + $0x18] sm:$0xff]  ;;  %v277_v13 = vld [vmem:[%s5625_s6 + $0x20] sm:$0xff]  ;;  %v278_v14 = vld [vmem:[%s5625_s6 + $0x28] sm:$0xff]  ;;  %p5335_p11 = scmp.ne.s32.totalorder %s7654_s30, %s5334_s12  ;;  %p8189_p0 = scmp.ne.s32.totalorder %s7812_s23, 0 }
  0x72   : > { %4629 = vmatprep.mubr.bf16.mxu0 %v305_v6  ;;  %v306_v15 = vpack.c.bf16 %v276_v12, %v275_v11  ;;  %v307_v16 = vpack.c.bf16 %v278_v14, %v277_v13  ;;  %v279_v17 = vld [vmem:[%s5625_s6 + $0x30] sm:$0xff]  ;;  %v280_v18 = vld [vmem:[%s5625_s6 + $0x38] sm:$0xff]  ;;  %v281_v19 = vld [vmem:[%s5625_s6 + $0x40] sm:$0xff]  ;;  %s5414_s13 = smov [#allocation8]  }
  0x73   : > { %4616 = vmatpush3.bf16.msra.mxu0 %v4880_v1  ;;  %v282_v20 = vld [vmem:[%s5625_s6 + $0x48] sm:$0xff]  ;;  %v308_v21 = vpack.c.bf16 %v280_v18, %v279_v17  ;;  %v283_v23 = vld [vmem:[%s5625_s6 + $0x50] sm:$0xff]  ;;  %v284_v24 = vld [vmem:[%s5625_s6 + $0x58] sm:$0xff]  ;;  %p5336_p1 = pnand %p5335_p11, %p8189_p0  ;;  %s5338_s17 = sshll.u32 %s5414_s13, 4  ;;  %s5339_s17 = int_to_ptr.vmem [resolvable:$false] %s5338_s17 }
  0x74   : > { %4617 = vmatprep.subr.bf16.mxu0 %v4881_v2  ;;  %v309_v22 = vpack.c.bf16 %v282_v20, %v281_v19  ;;  %v285_v25 = vld [vmem:[%s5625_s6 + $0x60] sm:$0xff]  ;;  %v286_v26 = vld [vmem:[%s5625_s6 + $0x68] sm:$0xff]  ;;  %v310_v27 = vpack.c.bf16 %v284_v24, %v283_v23  ;;  %v287_v29 = vld [vmem:[%s5625_s6 + $0x70] sm:$0xff]  ;;  %s5340_s7 = scalar_lea.vmem %s5339_s17, 8192  ;;  %p5341_p7 = scmp.lt.s32.totalorder %s7654_s30, %s5339_s17 }
  0x75   : > { %v311_v28 = vpack.c.bf16 %v286_v26, %v285_v25  ;;  %v288_v30 = vld [vmem:[%s5625_s6 + $0x78] sm:$0xff]  ;;  %v289_v31 = vld [vmem:[%s5625_s6 + $0x80] sm:$0xff]  ;;  %v290_v32 = vld [vmem:[%s5625_s6 + $0x88] sm:$0xff]  ;;  %p5337_p3 = pneg %p5336_p1  ;;  %p5342_p9 = scmp.lt.s32.totalorder %s5340_s7, %s5334_s12 }
  0x76   : > { %v312_v33 = vpack.c.bf16 %v288_v30, %v287_v29  ;;  %v313_v34 = vpack.c.bf16 %v290_v32, %v289_v31  ;;  %v291_v35 = vld [vmem:[%s5625_s6 + $0x90] sm:$0xff]  ;;  %v292_v36 = vld [vmem:[%s5625_s6 + $0x98] sm:$0xff]  ;;  %v293_v37 = vld [vmem:[%s5625_s6 + $0xa0] sm:$0xff]  ;;  %v777_v31 = vlaneseq }
  0x77   : > { %4618 = vmatpush3.bf16.msra.mxu0 %v4881_v2  ;;  %v294_v38 = vld [vmem:[%s5625_s6 + $0xa8] sm:$0xff]  ;;  %v314_v39 = vpack.c.bf16 %v292_v36, %v291_v35  ;;  %v295_v41 = vld [vmem:[%s5625_s6 + $0xb0] sm:$0xff]  ;;  %v296_v42 = vld [vmem:[%s5625_s6 + $0xb8] sm:$0xff]  ;;  %p5343_p12 = por %p5342_p9, %p5341_p7 }
  0x78   : > { %4619 = vmatprep.subr.bf16.mxu0 %v4882_v3  ;;  %v315_v40 = vpack.c.bf16 %v294_v38, %v293_v37  ;;  %v297_v43 = vld [vmem:[%s5625_s6 + $0xc0] sm:$0xff]  ;;  %v298_v44 = vld [vmem:[%s5625_s6 + $0xc8] sm:$0xff]  ;;  %v316_v45 = vpack.c.bf16 %v296_v42, %v295_v41  ;;  %v299_v47 = vld [vmem:[%s5625_s6 + $0xd0] sm:$0xff] }
  0x79   : > { %v317_v46 = vpack.c.bf16 %v298_v44, %v297_v43  ;;  %v300_v48 = vld [vmem:[%s5625_s6 + $0xd8] sm:$0xff]  ;;  %v301_v49 = vld [vmem:[%s5625_s6 + $0xe0] sm:$0xff]  ;;  %v302_v50 = vld [vmem:[%s5625_s6 + $0xe8] sm:$0xff]  ;;  %p5344_p2 = pnand %p5343_p12, %p5337_p3 }
  0x7a   : > { %v318_v51 = vpack.c.bf16 %v300_v48, %v299_v47  ;;  %v319_v52 = vpack.c.bf16 %v302_v50, %v301_v49  ;;  %v303_v53 = vld [vmem:[%s5625_s6 + $0xf0] sm:$0xff]  ;;  %v304_v54 = vld [vmem:[%s5625_s6 + $0xf8] sm:$0xff]  ;;  %v4887_v56 = vld [vmem:[#allocation7 + $0x80] sm:$0xff]  }
  0x7b   : > { %4620 = vmatpush3.bf16.msra.mxu0 %v4882_v3  ;;  %v320_v55 = vpack.c.bf16 %v304_v54, %v303_v53  ;;  %v4888_v57 = vld [vmem:[#allocation7 + $0x88] sm:$0xff]   ;;  %v4889_v58 = vld [vmem:[#allocation7 + $0x90] sm:$0xff]   ;;  %v4890_v59 = vld [vmem:[#allocation7 + $0x98] sm:$0xff]  }
  0x7c   : > { %4621 = vmatprep.subr.bf16.mxu0 %v4883_v7  ;;  %v4891_v60 = vld [vmem:[#allocation7 + $0xa0] sm:$0xff]   ;;  %v4892_v61 = vld [vmem:[#allocation7 + $0xa8] sm:$0xff]   ;;  %v4893_v62 = vld [vmem:[#allocation7 + $0xb0] sm:$0xff]  }
  0x7d   : > { %v4894_v63 = vld [vmem:[#allocation7 + $0xb8] sm:$0xff]   ;;  %v4895_v0 = vld [vmem:[#allocation7 + $0x40] sm:$0xff]   ;;  %v4897_v2 = vld [vmem:[#allocation7 + $0x48] sm:$0xff]  }
  0x7e   : > { %v4896_v1 = vld [vmem:[#allocation7] sm:$0xff]   ;;  %4205 = vmatprep.subr.bf16.mxu1 %v4895_v0  ;;  %v4898_v3 = vld [vmem:[#allocation7 + $0x8] sm:$0xff]   ;;  %v4899_v4 = vld [vmem:[#allocation7 + $0x50] sm:$0xff]  }
  0x7f   : > { %4622 = vmatpush3.bf16.msra.mxu0 %v4883_v7  ;;  %4206 = vmatpush3.bf16.msra.mxu1 %v4896_v1  ;;  %v4900_v5 = vld [vmem:[#allocation7 + $0x10] sm:$0xff]   ;;  %v4901_v6 = vld [vmem:[#allocation7 + $0x58] sm:$0xff]   ;;  %v4907_v11 = vld [vmem:[#allocation7 + $0x68] sm:$0xff]  }
  0x80   : > { %4623 = vmatprep.subr.bf16.mxu0 %v4884_v8  ;;  %4207 = vmatprep.subr.bf16.mxu1 %v4897_v2  ;;  %v4902_v7 = vld [vmem:[#allocation7 + $0x18] sm:$0xff]   ;;  %v4909_v12 = vld [vmem:[#allocation7 + $0x28] sm:$0xff]   ;;  %v4911_v13 = vld [vmem:[#allocation7 + $0x70] sm:$0xff]  }
  0x81   : > { %v4913_v14 = vld [vmem:[#allocation7 + $0x30] sm:$0xff]   ;;  %v4920_v17 = vld [vmem:[#allocation7 + $0x200] sm:$0xff]  }
  0x82   : > { %v5670_v18 = vld [vmem:[%s7703_s2] ss:$0 sm:$0xff] }
  0x83   : > { %4624 = vmatpush3.bf16.msra.mxu0 %v4884_v8  ;;  %4208 = vmatpush3.bf16.msra.mxu1 %v4898_v3  ;;  %v4904_v8 = vld [vmem:[#allocation7 + $0x1c0] sm:$0xff]  }
  0x84   : > { %4625 = vmatprep.subr.bf16.mxu0 %v4885_v9  ;;  %4209 = vmatprep.subr.bf16.mxu1 %v4899_v4 }
  0x87   : > { %4626 = vmatpush3.bf16.msra.mxu0 %v4885_v9  ;;  %4210 = vmatpush3.bf16.msra.mxu1 %v4900_v5  ;;  %v4903_v9 = vld [vmem:[#allocation7 + $0x60] sm:$0xff]  }
  0x88   : > { %4627 = vmatprep.subr.bf16.mxu0 %v4886_v10  ;;  %4211 = vmatprep.subr.bf16.mxu1 %v4901_v6 }
  0x8b   : > { %4628 = vmatpush3.bf16.msra.mxu0 %v4886_v10  ;;  %4212 = vmatpush3.bf16.msra.mxu1 %v4902_v7  ;;  %v4905_v10 = vld [vmem:[#allocation7 + $0x20] sm:$0xff]  }
  0x8c   : > { %4661 = vmatprep.subr.bf16.mxu0 %v4887_v56  ;;  %4213 = vmatprep.subr.bf16.mxu1 %v4903_v9 }
  0x8e   : > { %4630 = vmatmul.mubr.bf16.vlgmr.msra.gmra.mrb[0].mxu0 %v306_v15  ;;  %v4915_v15 = vld [vmem:[#allocation7 + $0x78] sm:$0xff]  }
  0x8f   : > { %4633 = vmatprep.mubr.bf16.mxu0 %v307_v16  ;;  %4662 = vmatpush3.bf16.msra.mxu0 %v4887_v56  ;;  %v4917_v16 = vld [vmem:[#allocation7 + $0x38] sm:$0xff]  }
  0x90   : > { %4663 = vmatprep.subr.bf16.mxu0 %v4888_v57  ;;  %4214 = vmatpush3.bf16.msra.mxu1 %v4905_v10 }
  0x91   : > { %4215 = vmatprep.subr.bf16.mxu1 %v4907_v11 }
  0x93   : > { %4664 = vmatpush3.bf16.msra.mxu0 %v4888_v57 }
  0x94   : > { %4665 = vmatprep.subr.bf16.mxu0 %v4889_v58  ;;  %4216 = vmatpush3.bf16.msra.mxu1 %v4909_v12 }
  0x95   : > { %4217 = vmatprep.subr.bf16.mxu1 %v4911_v13 }
  0x96   : > { %4634 = vmatmul.mubr.bf16.gmra.mrb[4].mxu0 %v308_v21 }
  0x97   : > { %4637 = vmatprep.mubr.bf16.mxu0 %v309_v22  ;;  %4666 = vmatpush3.bf16.msra.mxu0 %v4889_v58 }
  0x98   : > { %4667 = vmatprep.subr.bf16.mxu0 %v4890_v59  ;;  %4218 = vmatpush3.bf16.msra.mxu1 %v4913_v14 }
  0x99   : > { %4219 = vmatprep.subr.bf16.mxu1 %v4915_v15 }
  0x9b   : > { %4668 = vmatpush3.bf16.msra.mxu0 %v4890_v59 }
  0x9c   : > { %4669 = vmatprep.subr.bf16.mxu0 %v4891_v60  ;;  %4220 = vmatpush3.bf16.msra.mxu1 %v4917_v16 }
  0x9d   : > { %4709 = vmatprep.subr.bf16.mxu1 %v4920_v17 }
  0x9e   : > { %4638 = vmatmul.mubr.bf16.gmra.mrb[8].mxu0 %v310_v27 }
  0x9f   : > { %4641 = vmatprep.mubr.bf16.mxu0 %v311_v28  ;;  %4670 = vmatpush3.bf16.msra.mxu0 %v4891_v60 }
  0xa0   : > { %4671 = vmatprep.subr.bf16.mxu0 %v4892_v61 }
  0xa3   : > { %4672 = vmatpush3.bf16.msra.mxu0 %v4892_v61 }
  0xa4   : > { %4673 = vmatprep.subr.bf16.mxu0 %v4893_v62 }
  0xa6   : > { %4642 = vmatmul.mubr.bf16.gmra.mrb[12].mxu0 %v312_v33 }
  0xa7   : > { %4645 = vmatprep.mubr.bf16.mxu0 %v313_v34  ;;  %4674 = vmatpush3.bf16.msra.mxu0 %v4893_v62 }
  0xa8   : > { %4675 = vmatprep.subr.bf16.mxu0 %v4894_v63 }
  0xab   : > { %4676 = vmatpush3.bf16.msra.mxu0 %v4894_v63 }
  0xac   : > { %4341 = vmatprep.subr.bf16.mxu0 %v4904_v8 }
  0xae   : > { %4646 = vmatmul.mubr.bf16.gmra.mrb[16].mxu0 %v314_v39 }
  0xaf   : > { %4649 = vmatprep.mubr.bf16.mxu0 %v315_v40  ;;  %v5698_v40 = vshrl.u32 %v777_v31, 7 }
  0xb1   : > { %v5710_v47 = vadd.s32 24, %v5698_v40  ;;  %v5722_v57 = vadd.s32 72, %v5698_v40  ;;  %v5725_v58 = vadd.s32 88, %v5698_v40  ;;  %v5731_v63 = vadd.s32 104, %v5698_v40 }
  0xb2   : > { %v5751_v16 = vadd.s32 120, %v5698_v40  ;;  %v5763_v31 = vadd.s32 168, %v5698_v40 }
  0xb3   : > { %v835_v8 = vand.u32 15, %v5710_v47 }
  0xb5   : > { %vm5823_vm2 = vcmp.le.s32.totalorder %v835_v8, 14 }
  0xb6   : > { %4650 = vmatmul.mubr.bf16.gmra.mrb[20].mxu0 %v316_v45  ;;  %vm5905_vm6 = vmpackc.low %vm5823_vm2, %vm7753_vm4 }
  0xb7   : > { %4653 = vmatprep.mubr.bf16.mxu0 %v317_v46  ;;  %v5707_v46 = vadd.s32 8, %v5698_v40 }
  0xb9   : > { %v821_v6 = vand.u32 15, %v5707_v46 }
  0xbb   : > { %vm5808_vm1 = vcmp.le.s32.totalorder %v821_v6, 14 }
  0xbc   : > { %vm5890_vm5 = vmpackc.low %vm5808_vm1, %vm7753_vm4 }
  0xbe   : > { %4654 = vmatmul.mubr.bf16.gmra.mrb[24].mxu0 %v318_v51  ;;  %v5713_v51 = vadd.s32 40, %v5698_v40 }
  0xbf   : > { %4657 = vmatprep.mubr.bf16.mxu0 %v319_v52  ;;  %v5716_v52 = vadd.s32 56, %v5698_v40 }
  0xc0   : > { %v849_v9 = vand.u32 15, %v5713_v51 }
  0xc2   : > { %vm5874_vm3 = vcmp.le.s32.totalorder %v849_v9, 14  ;;  %v7828_v9 = vmov 0 }
  0xc3   : > { %v7829_v9 = vsel %vm5890_vm5, 4294967295, %v7828_v9  ;;  %vm5969_vm9 = vmpackc.low %vm5874_vm3, %vm7753_vm4 }
  0xc4   : > { %7830 = vst [vmem:[#allocation17_spill] sm:$0xff] %v7829_v9  ;;  %v7835_v9 = vand.u32 15, %v5716_v52 }
  0xc6   : > { %4658 = vmatmul.mubr.bf16.gmra.mrb[28].mxu0 %v320_v55  ;;  %vm5937_vm7 = vcmp.le.s32.totalorder %v7835_v9, 14 }
  0xc7   : > { %vm6026_vm11 = vmpackc.low %vm5937_vm7, %vm7753_vm4 }
 0x161   : > { %v4631_v19 = vpop.f32.mrb[0].mxu0 }
 0x162   : > { %v5673_v20 = vadd.f32 %v4631_v19, %v5670_v18  ;;  %v426_v21 = vpop.f32.mrb[1].mxu0 }
 0x163   : > { %v5676_v22 = vadd.f32 %v5670_v18, %v426_v21  ;;  %v4632_v23 = vpop.f32.mrb[2].mxu0 }
 0x164   : > { %v3751_v24 = vmul.f32 -1.442695, %v5673_v20  ;;  %v5680_v25 = vadd.f32 %v4632_v23, %v5670_v18  ;;  %v429_v26 = vpop.f32.mrb[3].mxu0  ;;  %v5754_v23 = vadd.s32 136, %v5698_v40 }
 0x165   : > { %v3749_v27 = vmul.f32 -1.442695, %v5676_v22  ;;  %v5684_v28 = vadd.f32 %v5670_v18, %v429_v26 }
 0x166   : > { %4959 = vpow2.f32 %v3751_v24  ;;  %v3752_v29 = vmul.f32 -1.442695, %v5680_v25  ;;  %v5757_v24 = vadd.s32 152, %v5698_v40 }
 0x167   : > { %4961 = vpow2.f32 %v3749_v27  ;;  %v3750_v30 = vmul.f32 -1.442695, %v5684_v28 }
 0x168   : > { %4963 = vpow2.f32 %v3752_v29 }
 0x169   : > { %4965 = vpow2.f32 %v3750_v30  ;;  %v4635_v32 = vpop.f32.mrb[4].mxu0 }
 0x16a   : > { %v5689_v33 = vadd.f32 %v4635_v32, %v5670_v18  ;;  %v442_v34 = vpop.f32.mrb[5].mxu0 }
 0x16b   : > { %v5692_v35 = vadd.f32 %v5670_v18, %v442_v34  ;;  %v4636_v36 = vpop.f32.mrb[6].mxu0 }
 0x16c   : > { %v3755_v37 = vmul.f32 -1.442695, %v5689_v33  ;;  %v5696_v38 = vadd.f32 %v4636_v36, %v5670_v18  ;;  %v445_v39 = vpop.f32.mrb[7].mxu0 }
 0x16d   : > { %v3753_v41 = vmul.f32 -1.442695, %v5692_v35  ;;  %v5702_v42 = vadd.f32 %v5670_v18, %v445_v39  ;;  %v5769_v39 = vadd.s32 184, %v5698_v40 }
 0x16e   : > { %4967 = vpow2.f32 %v3755_v37  ;;  %v3756_v43 = vmul.f32 -1.442695, %v5696_v38 }
 0x16f   : > { %4969 = vpow2.f32 %v3753_v41  ;;  %v3754_v44 = vmul.f32 -1.442695, %v5702_v42 }
 0x170   : > { %v4960_v45 = vpop.eup %4959  ;;  %4971 = vpow2.f32 %v3756_v43 }
 0x171   : > { %v4962_v48 = vpop.eup %4961  ;;  %v651_v49 = vadd.f32 1.0, %v4960_v45  ;;  %4973 = vpow2.f32 %v3754_v44  ;;  %v4639_v50 = vpop.f32.mrb[8].mxu0 }
 0x172   : > { %v4964_v53 = vpop.eup %4963  ;;  %v649_v54 = vadd.f32 1.0, %v4962_v48  ;;  %v5719_v55 = vadd.f32 %v4639_v50, %v5670_v18  ;;  %v458_v56 = vpop.f32.mrb[9].mxu0 }
 0x173   : > { %v4966_v59 = vpop.eup %4965  ;;  %4975 = vrcp.f32 %v651_v49  ;;  %v652_v60 = vadd.f32 1.0, %v4964_v53  ;;  %v5728_v61 = vadd.f32 %v5670_v18, %v458_v56  ;;  %v4640_v62 = vpop.f32.mrb[10].mxu0 }
 0x174   : > { %4977 = vrcp.f32 %v649_v54  ;;  %v650_v0 = vadd.f32 1.0, %v4966_v59  ;;  %v3759_v1 = vmul.f32 -1.442695, %v5719_v55  ;;  %v5735_v2 = vadd.f32 %v4640_v62, %v5670_v18  ;;  %v461_v3 = vpop.f32.mrb[11].mxu0 }
 0x175   : > { %4979 = vrcp.f32 %v652_v60  ;;  %v3757_v4 = vmul.f32 -1.442695, %v5728_v61  ;;  %v5739_v5 = vadd.f32 %v5670_v18, %v461_v3 }
 0x176   : > { %4981 = vrcp.f32 %v650_v0  ;;  %v3760_v7 = vmul.f32 -1.442695, %v5735_v2 }
 0x177   : > { %4983 = vpow2.f32 %v3759_v1  ;;  %v3758_v10 = vmul.f32 -1.442695, %v5739_v5 }
 0x178   : > { %v4968_v13 = vpop.eup %4967  ;;  %4985 = vpow2.f32 %v3757_v4 }
 0x179   : > { %v4970_v17 = vpop.eup %4969  ;;  %v655_v19 = vadd.f32 1.0, %v4968_v13  ;;  %4987 = vpow2.f32 %v3760_v7  ;;  %v4643_v21 = vpop.f32.mrb[12].mxu0 }
 0x17a   : > { %v4972_v26 = vpop.eup %4971  ;;  %v653_v27 = vadd.f32 1.0, %v4970_v17  ;;  %4989 = vpow2.f32 %v3758_v10  ;;  %v5760_v29 = vadd.f32 %v4643_v21, %v5670_v18  ;;  %v474_v30 = vpop.f32.mrb[13].mxu0  ;;  %v5793_v10 = vadd.s32 200, %v5698_v40 }
 0x17b   : > { %v4974_v32 = vpop.eup %4973  ;;  %4991 = vrcp.f32 %v655_v19  ;;  %v656_v34 = vadd.f32 1.0, %v4972_v26  ;;  %v5766_v36 = vadd.f32 %v5670_v18, %v474_v30  ;;  %v4644_v37 = vpop.f32.mrb[14].mxu0  ;;  %v5796_v19 = vadd.s32 216, %v5698_v40 }
 0x17c   : > { %4993 = vrcp.f32 %v653_v27  ;;  %v654_v41 = vadd.f32 1.0, %v4974_v32  ;;  %v3763_v43 = vmul.f32 -1.442695, %v5760_v29  ;;  %v5773_v44 = vadd.f32 %v4644_v37, %v5670_v18  ;;  %v477_v45 = vpop.f32.mrb[15].mxu0  ;;  %v4906_v37 = vld [vmem:[#allocation7 + $0x180] sm:$0xff]  }
 0x17d   : > { %v4976_v48 = vpop.eup %4975  ;;  %4995 = vrcp.f32 %v656_v34  ;;  %v3761_v49 = vmul.f32 -1.442695, %v5766_v36  ;;  %v5777_v50 = vadd.f32 %v5670_v18, %v477_v45  ;;  %v5799_v21 = vadd.s32 232, %v5698_v40 }
 0x17e   : > { %v4978_v54 = vpop.eup %4977  ;;  %v5781_v56 = vmul.f32 %v4976_v48, %v5673_v20  ;;  %4997 = vrcp.f32 %v654_v41  ;;  %v3764_v59 = vmul.f32 -1.442695, %v5773_v44  ;;  %v5802_v26 = vadd.s32 248, %v5698_v40 }
 0x17f   : > { %v4980_v62 = vpop.eup %4979  ;;  %4999 = vpow2.f32 %v3763_v43  ;;  %v3762_v0 = vmul.f32 -1.442695, %v5777_v50  ;;  %7817 = vst [vmem:[#allocation12_spill] sm:$0xff] %v5799_v21  ;;  %v5813_v43 = vmul.f32 %v4978_v54, %v5676_v22 }
 0x180   : > { %v4982_v4 = vpop.eup %4981  ;;  %v5789_v7 = vmul.f32 %v4980_v62, %v5680_v25  ;;  %5001 = vpow2.f32 %v3761_v49  ;;  %7818 = vst [vmem:[#allocation13_spill] sm:$0xff] %v5802_v26  ;;  %v1488_v27 = vrot.slane %v5781_v56, 1  ;;  %v7847_v26 = vand.u32 15, %v5725_v58 }
 0x181   : > { %v4984_v13 = vpop.eup %4983  ;;  %5003 = vpow2.f32 %v3764_v59  ;;  %v4647_v17 = vpop.f32.mrb[16].mxu0  ;;  %v5816_v45 = vmul.f32 %v4982_v4, %v5684_v28 }
 0x182   : > { %v4986_v25 = vpop.eup %4985  ;;  %v1490_v30 = vrot.slane %v5789_v7, 1  ;;  %v659_v32 = vadd.f32 1.0, %v4984_v13  ;;  %5005 = vpow2.f32 %v3762_v0  ;;  %v490_v34 = vpop.f32.mrb[17].mxu0  ;;  %v5819_v49 = vadd.f32 %v4647_v17, %v5670_v18 }
 0x183   : > { %v4988_v41 = vpop.eup %4987  ;;  %v657_v48 = vadd.f32 1.0, %v4986_v25  ;;  %v4648_v59 = vpop.f32.mrb[18].mxu0  ;;  %v5831_v28 = vadd.f32 %v5670_v18, %v490_v34  ;;  %v5861_v25 = vadd.s32 16, %v5698_v40  ;;  %vm6006_vm10 = vcmp.le.s32.totalorder %v7847_v26, 14 }
 0x184   : > { %v4990_v6 = vpop.eup %4989  ;;  %v1491_v22 = vsel %vm7752_vm0, %v1488_v27, %v1490_v30  ;;  %5007 = vrcp.f32 %v659_v32  ;;  %v660_v54 = vadd.f32 1.0, %v4988_v41  ;;  %v493_v62 = vpop.f32.mrb[19].mxu0  ;;  %v3767_v47 = vmul.f32 -1.442695, %v5819_v49  ;;  %vm6111_vm2 = vmpackc.low %vm6006_vm10, %vm7753_vm4 }
 0x185   : > { %v4992_v0 = vpop.eup %4991  ;;  %5009 = vrcp.f32 %v657_v48  ;;  %v658_v4 = vadd.f32 1.0, %v4990_v6  ;;  %v5835_v8 = vadd.f32 %v4648_v59, %v5670_v18  ;;  %v3765_v17 = vmul.f32 -1.442695, %v5831_v28  ;;  %7824 = vst [vmem:[#allocation15_spill] sm:$0xff] %v5861_v25 }
 0x186   : > { %v4994_v13 = vpop.eup %4993  ;;  %5011 = vrcp.f32 %v660_v54  ;;  %v5848_v59 = vpack.c.bf16 %v5816_v45, %v5813_v43  ;;  %v5851_v54 = vadd.f32 %v5670_v18, %v493_v62  ;;  %v5864_v53 = vmul.f32 %v4992_v0, %v5689_v33 }
 0x187   : > { %v5840_v41 = vpop.eup %4995  ;;  %v5843_v34 = vmul.f32 %v4994_v13, %v5692_v35  ;;  %5013 = vrcp.f32 %v658_v4  ;;  %v3768_v48 = vmul.f32 -1.442695, %v5835_v8  ;;  %v1486_v35 = vrot.slane %v5816_v45, 1 }
 0x188   : > { %7823 = vst [vmem:[#allocation14_spill] sm:$0xff] %v5848_v59  ;;  %v4998_v6 = vpop.eup %4997  ;;  %5015 = vpow2.f32 %v3767_v47  ;;  %1950 = vmatprep.mubr.bf16.mxu1 %v5848_v59  ;;  %v7710_v47 = vrot.slane %v5813_v43, 1  ;;  %v3766_v0 = vmul.f32 -1.442695, %v5851_v54  ;;  %v7850_v26 = vrot.slane %v5864_v53, 1 }
 0x189   : > { %v5000_v20 = vpop.eup %4999  ;;  %v7711_v4 = vrot.slane %v5843_v34, 1  ;;  %5017 = vpow2.f32 %v3765_v17  ;;  %v4651_v13 = vpop.f32.mrb[20].mxu0  ;;  %v5870_v15 = vmul.f32 %v4998_v6, %v5702_v42  ;;  %v1489_v51 = vsel %vm7752_vm0, %v1486_v35, %v1488_v27 }
 0x18a   : > { %v5002_v1 = vpop.eup %5001  ;;  %v663_v62 = vadd.f32 1.0, %v5000_v20  ;;  %5019 = vpow2.f32 %v3768_v48  ;;  %v506_v60 = vpop.f32.mrb[21].mxu0  ;;  %v1487_v42 = vsel %vm7752_vm0, %v7710_v47, %v1486_v35  ;;  %v7832_v27 = vmov 0 }
 0x18b   : > { %v5004_v32 = vpop.eup %5003  ;;  %v1493_v17 = vsel %vm7752_vm0, %v1490_v30, %v7711_v4  ;;  %v661_v3 = vadd.f32 1.0, %v5002_v1  ;;  %v4652_v14 = vpop.f32.mrb[22].mxu0  ;;  %v7833_v27 = vsel %vm5905_vm6, 4294967295, %v7832_v27 }
 0x18c   : > { %v5006_v48 = vpop.eup %5005  ;;  %v5878_v12 = vpack.c.bf16 %v1493_v17, %v1491_v22  ;;  %5021 = vrcp.f32 %v663_v62  ;;  %v664_v33 = vadd.f32 1.0, %v5004_v32  ;;  %v509_v11 = vpop.f32.mrb[23].mxu0  ;;  %v5897_v22 = vadd.f32 %v4651_v13, %v5670_v18  ;;  %7834 = vst [vmem:[#allocation19_spill] sm:$0xff] %v7833_v27  ;;  %v4908_v13 = vld [vmem:[#allocation7 + $0x1c8] sm:$0xff]  }
 0x18d   : > { %5023 = vrcp.f32 %v661_v3  ;;  %v662_v30 = vadd.f32 1.0, %v5006_v48  ;;  %v5894_v3 = vpack.c.bf16 %v1489_v51, %v1487_v42  ;;  %v5900_v32 = vadd.f32 %v5670_v18, %v506_v60  ;;  %v4910_v27 = vld [vmem:[#allocation7 + $0x188] sm:$0xff]  }
 0x18e   : > { %7827 = vst [vmem:[#allocation16_spill] sm:$0xff] %v5878_v12  ;;  %v5008_v1 = vpop.eup %5007  ;;  %5025 = vrcp.f32 %v664_v33  ;;  %v5911_v62 = vadd.f32 %v4652_v14, %v5670_v18  ;;  %v3771_v46 = vmul.f32 -1.442695, %v5897_v22  ;;  %v1494_v14 = vrot.slane %v5870_v15, 1 }
 0x18f   : > { %7831 = vst [vmem:[#allocation18_spill] sm:$0xff] %v5894_v3  ;;  %v5010_v6 = vpop.eup %5009  ;;  %5027 = vrcp.f32 %v662_v30  ;;  %4677 = vmatprep.mubr.msk.bf16.mxu0 %vm5890_vm5, %v5894_v3  ;;  %v3769_v33 = vmul.f32 -1.442695, %v5900_v32  ;;  %v5924_v47 = vadd.f32 %v5670_v18, %v509_v11  ;;  %v5933_v30 = vmul.f32 %v5840_v41, %v5696_v38  ;;  %v4912_v41 = vld [vmem:[#allocation7 + $0x1d0] sm:$0xff]   ;;  %v4921_v11 = vld [vmem:[#allocation7 + $0x1a0] sm:$0xff]  }
 0x190   : > { %v5012_v60 = vpop.eup %5011  ;;  %5029 = vpow2.f32 %v3766_v0  ;;  %v3772_v51 = vmul.f32 -1.442695, %v5911_v62  ;;  %4678 = vmatmul.mubr.msk.bf16.vlgmr.msra.gmra.mrb[32].mxu0 %vm5905_vm6, %v5878_v12  ;;  %v5942_v3 = vmul.f32 %v5008_v1, %v5719_v55  ;;  %v5945_v35 = vmul.f32 %v5010_v6, %v5728_v61 }
 0x191   : > { %v5014_v42 = vpop.eup %5013  ;;  %v4655_v0 = vpop.f32.mrb[24].mxu0  ;;  %5031 = vpow2.f32 %v3771_v46  ;;  %4342 = vmatpush3.bf16.msra.mxu0 %v4906_v37  ;;  %v5948_v52 = vmul.f32 %v5012_v60, %v5735_v2  ;;  %v7838_v55 = vand.u32 15, %v5722_v57  ;;  %v3770_v6 = vmul.f32 -1.442695, %v5924_v47 }
 0x192   : > { %v5016_v17 = vpop.eup %5015  ;;  %v522_v4 = vpop.f32.mrb[25].mxu0  ;;  %5033 = vpow2.f32 %v3769_v33  ;;  %4343 = vmatprep.subr.bf16.mxu0 %v4908_v13  ;;  %v5951_v9 = vmul.f32 %v5014_v42, %v5739_v5  ;;  %v7841_v13 = vrot.slane %v5843_v34, 1  ;;  %v7842_v5 = vrot.slane %v5864_v53, 1  ;;  %v4914_v33 = vld [vmem:[#allocation7 + $0x190] sm:$0xff]  }
 0x193   : > { %v5018_v12 = vpop.eup %5017  ;;  %v667_v48 = vadd.f32 1.0, %v5016_v17  ;;  %v4656_v38 = vpop.f32.mrb[26].mxu0  ;;  %5035 = vpow2.f32 %v3772_v51  ;;  %vm5955_vm8 = vcmp.le.s32.totalorder %v7838_v55, 14  ;;  %v7843_v57 = vmov 0 }
 0x194   : > { %v5020_v46 = vpop.eup %5019  ;;  %v665_v37 = vadd.f32 1.0, %v5018_v12  ;;  %v525_v59 = vpop.f32.mrb[27].mxu0  ;;  %v1495_v2 = vsel %vm7752_vm0, %v7841_v13, %v1494_v14  ;;  %v1497_v12 = vsel %vm7752_vm0, %v1494_v14, %v7842_v5  ;;  %v7844_v57 = vsel %vm5969_vm9, 4294967295, %v7843_v57  ;;  %vm6046_vm13 = vmpackc.low %vm5955_vm8, %vm7753_vm4 }
 0x195   : > { %5037 = vrcp.f32 %v667_v48  ;;  %v668_v1 = vadd.f32 1.0, %v5020_v46  ;;  %7845 = vst [vmem:[#allocation20_spill] sm:$0xff] %v7844_v57  ;;  %v5974_v60 = vadd.f32 %v4655_v0, %v5670_v18  ;;  %v5977_v48 = vadd.f32 %v5670_v18, %v522_v4  ;;  %4344 = vmatpush3.bf16.msra.mxu0 %v4910_v27  ;;  %v4916_v46 = vld [vmem:[#allocation7 + $0x1d8] sm:$0xff]  }
 0x196   : > { %v5022_v17 = vpop.eup %5021  ;;  %5039 = vrcp.f32 %v665_v37  ;;  %v5982_v14 = vpack.c.bf16 %v1497_v12, %v1495_v2  ;;  %v5985_v20 = vadd.f32 %v4656_v38, %v5670_v18  ;;  %4345 = vmatprep.subr.bf16.mxu0 %v4912_v41  ;;  %v1500_v13 = vrot.slane %v5945_v35, 1  ;;  %v4918_v0 = vld [vmem:[#allocation7 + $0x198] sm:$0xff]  }
 0x197   : > { %v5024_v42 = vpop.eup %5023  ;;  %v5980_v51 = vmul.f32 %v5022_v17, %v5760_v29  ;;  %5041 = vrcp.f32 %v668_v1  ;;  %v3775_v4 = vmul.f32 -1.442695, %v5974_v60  ;;  %v3773_v27 = vmul.f32 -1.442695, %v5977_v48  ;;  %v4919_v17 = vld [vmem:[#allocation7 + $0x1e0] sm:$0xff]  }
 0x198   : > { %7846 = vst [vmem:[#allocation21_spill] sm:$0xff] %v5982_v14  ;;  %v5026_v37 = vpop.eup %5025  ;;  %5043 = vpow2.f32 %v3770_v6  ;;  %v1498_v1 = vrot.slane %v5933_v30, 1  ;;  %4681 = vmatprep.mubr.msk.bf16.mxu0 %vm5969_vm9, %v5982_v14  ;;  %v3776_v38 = vmul.f32 -1.442695, %v5985_v20  ;;  %v1502_v5 = vrot.slane %v5951_v9, 1 }
 0x199   : > { %v5028_v55 = vpop.eup %5027  ;;  %v4659_v41 = vpop.f32.mrb[28].mxu0  ;;  %5045 = vpow2.f32 %v3775_v4  ;;  %4346 = vmatpush3.bf16.msra.mxu0 %v4914_v33  ;;  %v6002_v25 = vmul.f32 %v5024_v42, %v5766_v36  ;;  %v6011_v33 = vmul.f32 %v5026_v37, %v5773_v44  ;;  %v6017_v36 = vadd.f32 %v5670_v18, %v525_v59 }
 0x19a   : > { %v5030_v2 = vpop.eup %5029  ;;  %v538_v12 = vpop.f32.mrb[29].mxu0  ;;  %5047 = vpow2.f32 %v3773_v27  ;;  %4347 = vmatprep.subr.bf16.mxu0 %v4916_v46  ;;  %v6014_v29 = vmul.f32 %v5028_v55, %v5777_v50  ;;  %v1499_v46 = vsel %vm7752_vm0, %v7850_v26, %v1498_v1  ;;  %v7851_v44 = vmov 0 }
 0x19b   : > { %v666_v57 = vadd.f32 1.0, %v5030_v2  ;;  %v4660_v14 = vpop.f32.mrb[30].mxu0  ;;  %v5032_v4 = vpop.eup %5031  ;;  %5049 = vpow2.f32 %v3776_v38  ;;  %v1501_v2 = vsel %vm7752_vm0, %v1498_v1, %v1500_v13  ;;  %v7852_v44 = vsel %vm6026_vm11, 4294967295, %v7851_v44 }
 0x19c   : > { %v541_v42 = vpop.f32.mrb[31].mxu0  ;;  %v5034_v27 = vpop.eup %5033  ;;  %v671_v58 = vadd.f32 1.0, %v5032_v4  ;;  %7853 = vst [vmem:[#allocation22_spill] sm:$0xff] %v7852_v44  ;;  %v7854_v50 = vand.u32 15, %v5731_v63  ;;  %v3774_v55 = vmul.f32 -1.442695, %v6017_v36  ;;  %v6037_v38 = vpack.c.bf16 %v1501_v2, %v1499_v46 }
 0x19d   : > { %5051 = vrcp.f32 %v666_v57  ;;  %v5036_v57 = vpop.eup %5035  ;;  %v669_v37 = vadd.f32 1.0, %v5034_v27  ;;  %v1503_v1 = vsel %vm7752_vm0, %v1500_v13, %v1502_v5  ;;  %4348 = vmatpush3.bf16.msra.mxu0 %v4918_v0  ;;  %v7858_v21 = vrot.slane %v5942_v3, 1  ;;  %v4922_v0 = vld [vmem:[#allocation7 + $0x1e8] sm:$0xff]  }
 0x19e   : > { %vm6032_vm12 = vcmp.le.s32.totalorder %v7854_v50, 14  ;;  %7857 = vst [vmem:[#allocation23_spill] sm:$0xff] %v6037_v38  ;;  %5053 = vrcp.f32 %v671_v58  ;;  %v672_v26 = vadd.f32 1.0, %v5036_v57  ;;  %v7859_v27 = vmov 0  ;;  %4349 = vmatprep.subr.bf16.mxu0 %v4919_v17  ;;  %4682 = vmatmul.mubr.msk.bf16.gmra.mrb[36].mxu0 %vm6026_vm11, %v6037_v38 }
 0x19f   : > { %v5038_v4 = vpop.eup %5037  ;;  %v1505_v63 = vsel %vm7752_vm0, %v1502_v5, %v7858_v21  ;;  %v7860_v27 = vsel %vm6046_vm13, 4294967295, %v7859_v27  ;;  %v6051_v46 = vadd.f32 %v4659_v41, %v5670_v18  ;;  %5055 = vrcp.f32 %v669_v37  ;;  %vm6128_vm3 = vmpackc.low %vm6032_vm12, %vm7753_vm4 }
 0x1a0   : > { %7861 = vst [vmem:[#allocation24_spill] sm:$0xff] %v7860_v27  ;;  %v5040_v13 = vpop.eup %5039  ;;  %v6054_v58 = vmul.f32 %v5038_v4, %v5819_v49  ;;  %v6059_v21 = vpack.c.bf16 %v1505_v63, %v1503_v1  ;;  %v6062_v61 = vadd.f32 %v5670_v18, %v538_v12  ;;  %5057 = vrcp.f32 %v672_v26 }
 0x1a1   : > { %v5042_v5 = vpop.eup %5041  ;;  %v6065_v41 = vmul.f32 %v5040_v13, %v5831_v28  ;;  %v3779_v17 = vmul.f32 -1.442695, %v6051_v46  ;;  %v6069_v49 = vadd.f32 %v4660_v14, %v5670_v18  ;;  %v1508_v50 = vrot.slane %v6002_v25, 1  ;;  %4350 = vmatpush3.bf16.msra.mxu0 %v4921_v11  ;;  %v4923_v28 = vld [vmem:[#allocation7 + $0x1a8] sm:$0xff]  }
 0x1a2   : > { %7862 = vst [vmem:[#allocation25_spill] sm:$0xff] %v6059_v21  ;;  %v5044_v2 = vpop.eup %5043  ;;  %v1510_v57 = vrot.slane %v6014_v29, 1  ;;  %v6074_v37 = vmul.f32 %v5042_v5, %v5835_v8  ;;  %5059 = vpow2.f32 %v3774_v55  ;;  %4685 = vmatprep.mubr.msk.bf16.mxu0 %vm6046_vm13, %v6059_v21  ;;  %v1514_v12 = vrot.slane %v6011_v33, 1  ;;  %4351 = vmatprep.subr.bf16.mxu0 %v4922_v0  ;;  %v4924_v8 = vld [vmem:[#allocation7 + $0x1f0] sm:$0xff]  }
 0x1a3   : > { %v670_v1 = vadd.f32 1.0, %v5044_v2  ;;  %5061 = vpow2.f32 %v3779_v17  ;;  %v7863_v4 = vand.u32 15, %v5751_v16  ;;  %v5046_v55 = vpop.eup %5045  ;;  %v1516_v63 = vrot.slane %v6065_v41, 1 }
 0x1a4   : > { %v3777_v13 = vmul.f32 -1.442695, %v6062_v61  ;;  %v3780_v5 = vmul.f32 -1.442695, %v6069_v49  ;;  %v7866_v2 = vand.u32 15, %v5754_v23  ;;  %v5048_v16 = vpop.eup %5047  ;;  %v6098_v0 = vadd.f32 %v5670_v18, %v541_v42  ;;  %v4925_v42 = vld [vmem:[#allocation7 + $0x1b0] sm:$0xff]  }
 0x1a5   : > { %vm6083_vm15 = vcmp.le.s32.totalorder %v7863_v4, 14  ;;  %5063 = vrcp.f32 %v670_v1  ;;  %v675_v4 = vadd.f32 1.0, %v5046_v55  ;;  %v7869_v14 = vrot.slane %v5948_v52, 1  ;;  %v5050_v21 = vpop.eup %5049  ;;  %4352 = vmatpush3.bf16.msra.mxu0 %v4923_v28 }
 0x1a6   : > { %vm6093_vm1 = vcmp.le.s32.totalorder %v7866_v2, 14  ;;  %v7870_v11 = vrot.slane %v5942_v3, 1  ;;  %v673_v44 = vadd.f32 1.0, %v5048_v16  ;;  %5065 = vpow2.f32 %v3777_v13  ;;  %4353 = vmatprep.subr.bf16.mxu0 %v4924_v8  ;;  %v4926_v16 = vld [vmem:[#allocation7 + $0x1f8] sm:$0xff]   ;;  %vm6194_vm10 = vmpackc.low %vm6083_vm15, %vm7753_vm4 }
 0x1a7   : > { %v7871_v23 = vmov %v7869_v14  ;;  %v7872_v1 = vmov 0  ;;  %v1511_v18 = vsel %vm7752_vm0, %v1508_v50, %v1510_v57  ;;  %v5052_v55 = vpop.eup %5051  ;;  %5067 = vrcp.f32 %v675_v4  ;;  %vm6203_vm12 = vmpackc.low %vm6093_vm1, %vm7753_vm4 }
 0x1a8   : > { %v1507_v27 = vsel %vm7752_vm0, %v7870_v11, %v7869_v14  ;;  %v1509_v2 = vsel %vm7752_vm0, %v7871_v23, %v1508_v50  ;;  %v7873_v1 = vsel %vm6111_vm2, 4294967295, %v7872_v1  ;;  %v676_v14 = vadd.f32 1.0, %v5050_v21  ;;  %v5054_v28 = vpop.eup %5053 }
 0x1a9   : > { %v3778_v11 = vmul.f32 -1.442695, %v6098_v0  ;;  %v6117_v13 = vpack.c.bf16 %v1509_v2, %v1507_v27  ;;  %v6120_v23 = vmul.f32 %v5052_v55, %v5851_v54  ;;  %5069 = vrcp.f32 %v673_v44  ;;  %v5056_v4 = vpop.eup %5055  ;;  %4354 = vmatpush3.bf16.msra.mxu0 %v4925_v42 }
 0x1aa   : > { %v7874_v6 = vrot.slane %v5980_v51, 1  ;;  %v7875_v50 = vmov 0  ;;  %5071 = vrcp.f32 %v676_v14  ;;  %v1517_v44 = vsel %vm7752_vm0, %v1514_v12, %v1516_v63  ;;  %4355 = vmatprep.subr.bf16.mxu0 %v4926_v16 }
 0x1ab   : > { %v7876_v50 = vsel %vm6128_vm3, 4294967295, %v7875_v50  ;;  %4686 = vmatmul.mubr.msk.bf16.gmra.mrb[40].mxu0 %vm6111_vm2, %v6117_v13  ;;  %v7880_v59 = vrot.slane %v6074_v37, 1  ;;  %v1518_v55 = vrot.slane %v6120_v23, 1  ;;  %v6149_v14 = vmul.f32 %v5054_v28, %v5897_v22 }
 0x1ac   : > { %v1513_v38 = vsel %vm7752_vm0, %v1510_v57, %v7874_v6  ;;  %7877 = vst [vmem:[#allocation26_spill] sm:$0xff] %v7876_v50  ;;  %v7878_v27 = vmov %v7874_v6  ;;  %v7881_v57 = vrot.slane %v6054_v58, 1  ;;  %5073 = vpow2.f32 %v3780_v5 }
 0x1ad   : > { %v1515_v21 = vsel %vm7752_vm0, %v7878_v27, %v1514_v12  ;;  %v6138_v54 = vpack.c.bf16 %v1513_v38, %v1511_v18  ;;  %v4927_v38 = vld [vmem:[#allocation7 + $0x1b8] sm:$0xff]   ;;  %v5058_v18 = vpop.eup %5057  ;;  %v6152_v12 = vmul.f32 %v5056_v4, %v5900_v32  ;;  %5075 = vpow2.f32 %v3778_v11 }
 0x1ae   : > { %v1523_v8 = vsel %vm7752_vm0, %v7881_v57, %v7880_v59  ;;  %v6157_v6 = vpack.c.bf16 %v1517_v44, %v1515_v21  ;;  %v7883_v27 = vand.u32 15, %v5757_v24  ;;  %v7886_v22 = vrot.slane %v5816_v45, 7  ;;  %v5060_v42 = vpop.eup %5059  ;;  %4356 = vmatpush3.bf16.msra.mxu0 %v4927_v38 }
 0x1af   : > { %7879 = vst [vmem:[#allocation27_spill] sm:$0xff] %v6138_v54  ;;  %4689 = vmatprep.mubr.msk.bf16.mxu0 %vm6128_vm3, %v6138_v54  ;;  %v7887_v5 = vrot.slane %v5813_v43, 7  ;;  %v6175_v28 = vmul.f32 %v5058_v18, %v5911_v62  ;;  %v1519_v24 = vsel %vm7752_vm0, %v1516_v63, %v1518_v55  ;;  %v7888_v44 = vand.u32 15, %v5763_v31  ;;  %v5062_v4 = vpop.eup %5061 }
 0x1b0   : > { %7882 = vst [vmem:[#allocation28_spill] sm:$0xff] %v6157_v6  ;;  %vm6161_vm7 = vcmp.le.s32.totalorder %v7883_v27, 14  ;;  %v1524_v16 = vrot.slane %v6152_v12, 1  ;;  %v1528_v62 = vrot.slane %v6149_v14, 1  ;;  %v679_v18 = vadd.f32 1.0, %v5062_v4 }
 0x1b1   : > { %v6170_v32 = vsel %vm7749_vm14, %v7887_v5, %v7886_v22  ;;  %vm6180_vm8 = vcmp.le.s32.totalorder %v7888_v44, 14  ;;  %v674_v22 = vadd.f32 1.0, %v5060_v42  ;;  %v7891_v5 = vrot.slane %v6054_v58, 1  ;;  %v5064_v42 = vpop.eup %5063 }
 0x1b2   : > { %v1530_v63 = vrot.slane %v6175_v28, 1  ;;  %v7892_v31 = vmov 0  ;;  %v7899_v4 = vrot.slane %v6074_v37, 1  ;;  %v7901_v38 = vrot.slane %v5816_v45, 7 }
 0x1b3   : > { %v1521_v21 = vsel %vm7752_vm0, %v1518_v55, %v7891_v5  ;;  %v7893_v31 = vsel %vm6194_vm10, 4294967295, %v7892_v31  ;;  %5077 = vrcp.f32 %v674_v22  ;;  %v7896_v55 = vmov 0  ;;  %v5066_v22 = vpop.eup %5065  ;;  %4690 = vmatmul.mubr.msk.bf16.gmra.mrb[44].mxu0 %vm6194_vm10, %v6157_v6 }
 0x1b4   : > { %7894 = vst [vmem:[#allocation29_spill] sm:$0xff] %v7893_v31  ;;  %v6198_v44 = vpack.c.bf16 %v1521_v21, %v1519_v24  ;;  %v7897_v55 = vsel %vm6203_vm12, 4294967295, %v7896_v55  ;;  %v1525_v26 = vsel %vm7752_vm0, %v7899_v4, %v1524_v16  ;;  %v6212_v5 = vpack.c.bf16 %v5789_v7, %v5781_v56  ;;  %v5068_v4 = vpop.eup %5067 }
 0x1b5   : > { %7898 = vst [vmem:[#allocation31_spill] sm:$0xff] %v7897_v55  ;;  %v7900_v21 = vrot.slane %v5781_v56, 7  ;;  %v6220_v17 = vmul.f32 %v5064_v42, %v5924_v47  ;;  %5079 = vrcp.f32 %v679_v18  ;;  %v6222_v27 = vpack.c.bf16 %v1525_v26, %v1523_v8  ;;  %v5070_v26 = vpop.eup %5069 }
 0x1b6   : > { %7895 = vst [vmem:[#allocation30_spill] sm:$0xff] %v6198_v44  ;;  %v1531_v2 = vsel %vm7752_vm0, %v1528_v62, %v1530_v63  ;;  %v677_v11 = vadd.f32 1.0, %v5066_v22  ;;  %v7903_v50 = vrot.slane %v5789_v7, 7  ;;  %v6235_v47 = vpack.c.bf16 %v5870_v15, %v5843_v34  ;;  %4693 = vmatprep.mubr.msk.bf16.mxu0 %vm6203_vm12, %v6198_v44  ;;  %vm6299_vm12 = vmpackc.low %vm6180_vm8, %vm7753_vm4 }
 0x1b7   : > { %v1265_v24 = vsel %vm7749_vm14, %v7901_v38, %v7900_v21  ;;  %7902 = vst [vmem:[#allocation32_spill] sm:$0xff] %v6222_v27  ;;  %v7904_v45 = vmov %v7900_v21  ;;  %v7905_v8 = vrot.slane %v5843_v34, 7  ;;  %v1282_v38 = vrot.slane %v5948_v52, 7 }
 0x1b8   : > { %v1267_v21 = vsel %vm7749_vm14, %v7904_v45, %v7903_v50  ;;  %v7906_v18 = vmov %v7903_v50  ;;  %v1526_v22 = vrot.slane %v6220_v17, 1  ;;  %v6245_v31 = vmul.f32 %v5068_v4, %v5974_v60  ;;  %v5072_v50 = vpop.eup %5071 }
 0x1b9   : > { %v1269_v42 = vsel %vm7749_vm14, %v7906_v18, %v7905_v8  ;;  %v6250_v56 = vpack.c.bf16 %v1267_v21, %v1265_v24  ;;  %v6253_v45 = vmul.f32 %v5070_v26, %v5977_v48  ;;  %5081 = vrcp.f32 %v677_v11  ;;  %v5074_v21 = vpop.eup %5073 }
 0x1ba   : > { %v7907_v7 = vand.u32 15, %v5769_v39  ;;  %v7910_v60 = vrot.slane %v5870_v15, 7  ;;  %v7911_v4 = vrot.slane %v5843_v34, 7  ;;  %v6268_v24 = vpack.c.bf16 %v5933_v30, %v5864_v53 }
 0x1bb   : > { %v1278_v48 = vrot.slane %v5951_v9, 7  ;;  %v1284_v11 = vrot.slane %v6002_v25, 7  ;;  %v6273_v39 = vmul.f32 %v5072_v50, %v5985_v20  ;;  %v1527_v26 = vsel %vm7752_vm0, %v1524_v16, %v1526_v22 }
 0x1bc   : > { %vm6257_vm15 = vcmp.le.s32.totalorder %v7907_v7, 14  ;;  %v1271_v18 = vsel %vm7749_vm14, %v7911_v4, %v7910_v60  ;;  %v7912_v7 = vand.u32 15, %v5793_v10  ;;  %v5076_v60 = vpop.eup %5075  ;;  %v1286_v4 = vrot.slane %v6014_v29, 7  ;;  %vm6290_vm14 = vmpackc.low %vm6161_vm7, %vm7753_vm4 }
 0x1bd   : > { %v1532_v55 = vrot.slane %v6253_v45, 1  ;;  %v680_v44 = vadd.f32 1.0, %v5074_v21  ;;  %v1529_v6 = vsel %vm7752_vm0, %v1526_v22, %v1528_v62  ;;  %v1536_v54 = vrot.slane %v6245_v31, 1  ;;  %4694 = vmatmul.mubr.msk.bf16.gmra.mrb[48].mxu0 %vm6290_vm14, %v6222_v27 }
 0x1be   : > { %vm6278_vm1 = vcmp.le.s32.totalorder %v7912_v7, 14  ;;  %v1538_v20 = vrot.slane %v6273_v39, 1  ;;  %v678_v50 = vadd.f32 1.0, %v5076_v60  ;;  %v7915_v10 = vmov 0 }
 0x1bf   : > { %v7916_v10 = vsel %vm6290_vm14, 4294967295, %v7915_v10  ;;  %v6294_v16 = vpack.c.bf16 %v1529_v6, %v1527_v26  ;;  %5083 = vrcp.f32 %v680_v44  ;;  %v7919_v62 = vmov 0 }
 0x1c0   : > { %7917 = vst [vmem:[#allocation33_spill] sm:$0xff] %v7916_v10  ;;  %v7920_v62 = vsel %vm6299_vm12, 4294967295, %v7919_v62  ;;  %v1533_v22 = vsel %vm7752_vm0, %v1530_v63, %v1532_v55  ;;  %v6304_v21 = vpack.c.bf16 %v1271_v18, %v1269_v42  ;;  %v7922_v59 = vrot.slane %v5864_v53, 7  ;;  %v5078_v42 = vpop.eup %5077 }
 0x1c1   : > { %7918 = vst [vmem:[#allocation34_spill] sm:$0xff] %v6294_v16  ;;  %7921 = vst [vmem:[#allocation35_spill] sm:$0xff] %v7920_v62  ;;  %v7923_v7 = vrot.slane %v5870_v15, 7  ;;  %vm7924_vm7 = vcmask 1040384   ;;  %5085 = vrcp.f32 %v678_v50  ;;  %v6311_v6 = vpack.c.bf16 %v1533_v22, %v1531_v2  ;;  %4697 = vmatprep.mubr.msk.bf16.mxu0 %vm6299_vm12, %v6294_v16  ;;  %v4928_v16 = vld [vmem:[#allocation7 + $0x208] sm:$0xff]  }
 0x1c2   : > { %v1539_v57 = vsel %vm7752_vm0, %v1536_v54, %v1538_v20  ;;  %v7926_v44 = vrot.slane %v5933_v30, 7  ;;  %v7927_v26 = vmov %v7922_v59  ;;  %vm7928_vm8 = vmmov %vm7924_vm7  ;;  %v6328_v2 = vpack.c.bf16 %v5951_v9, %v5945_v35 }
 0x1c3   : > { %v1273_v60 = vsel %vm7924_vm7, %v7923_v7, %v7922_v59  ;;  %7925 = vst [vmem:[#allocation36_spill] sm:$0xff] %v6311_v6  ;;  %v7929_v18 = vrot.slane %v5945_v35, 7  ;;  %v6338_v7 = vld [vmem:[#allocation7 + $0x140] sm:$0xff]   ;;  %v7933_v9 = vand.u32 15, %v5796_v19  ;;  %v6356_v35 = vpack.c.bf16 %v5948_v52, %v5942_v3  ;;  %vm7939_vm4 = vmmov %vm7924_vm7 }
 0x1c4   : > { %v1275_v63 = vsel %vm7928_vm8, %v7927_v26, %v7926_v44  ;;  %v7930_v50 = vmov %v7926_v44  ;;  %vm7932_vm8 = vmmov %vm7924_vm7  ;;  %v5080_v44 = vpop.eup %5079  ;;  %4757 = vmatprep.subr.bf16.mxu0 %v6338_v7  ;;  %v1288_v52 = vrot.slane %v5980_v51, 7  ;;  %vm7951_vm10 = vcmask 1040384  }
 0x1c5   : > { %v6324_v15 = vpack.c.bf16 %v1275_v63, %v1273_v60  ;;  %v1277_v22 = vsel %vm7924_vm7, %v7930_v50, %v7929_v18  ;;  %v7931_v53 = vmov %v7929_v18  ;;  %v6341_v60 = vmul.f32 %v5078_v42, %v6017_v36  ;;  %vm7952_vm3 = vmmov %vm7951_vm10 }
 0x1c6   : > { %v1279_v59 = vsel %vm7932_vm8, %v7931_v53, %v1278_v48  ;;  %vm6348_vm0 = vcmp.le.s32.totalorder %v7933_v9, 14  ;;  %v7936_v63 = vrot.slane %v5942_v3, 7  ;;  %v1290_v42 = vrot.slane %v6011_v33, 7  ;;  %vm7938_vm8 = vmmov %vm7924_vm7  ;;  %v5082_v9 = vpop.eup %5081 }
 0x1c7   : > { %v6352_v26 = vpack.c.bf16 %v1279_v59, %v1277_v22  ;;  %v6367_v50 = vpack.c.bf16 %v6014_v29, %v6002_v25  ;;  %v1285_v22 = vsel %vm7939_vm4, %v1282_v38, %v1284_v11  ;;  %v1534_v53 = vrot.slane %v6341_v60, 1 }
 0x1c8   : > { %v1281_v36 = vsel %vm7924_vm7, %v1278_v48, %v7936_v63  ;;  %v7937_v18 = vmov %v7936_v63  ;;  %vm7940_vm7 = vmmov %vm7939_vm4  ;;  %v1292_v3 = vrot.slane %v6065_v41, 7  ;;  %v1294_v63 = vrot.slane %v6120_v23, 7 }
 0x1c9   : > { %v1283_v19 = vsel %vm7938_vm8, %v7937_v18, %v1282_v38  ;;  %v1287_v48 = vsel %vm7940_vm7, %v1284_v11, %v1286_v4  ;;  %v6382_v25 = vpack.c.bf16 %v6011_v33, %v5980_v51  ;;  %v6385_v29 = vmul.f32 %v5080_v44, %v6051_v46 }
 0x1ca   : > { %v6373_v59 = vpack.c.bf16 %v1283_v19, %v1281_v36  ;;  %v6378_v18 = vpack.c.bf16 %v1287_v48, %v1285_v22  ;;  %v6388_v38 = vmul.f32 %v5082_v9, %v6062_v61  ;;  %vm7941_vm4 = vmmov 1  }
 0x1cb   : > { %vm6393_vm8 = vmpackc.low %vm6257_vm15, %vm7941_vm4  ;;  %v7942_v11 = vmov 0  ;;  %vm7945_vm7 = vcmask 1046528   ;;  %v7947_v51 = vmov 0  ;;  %v1289_v46 = vsel %vm7951_vm10, %v1286_v4, %v1288_v52  ;;  %v7956_v4 = vld [vmem:[#allocation12_spill] sm:$0xff] }
 0x1cc   : > { %v7943_v11 = vsel %vm6393_vm8, 4294967295, %v7942_v11  ;;  %v1535_v36 = vsel %vm7945_vm7, %v1532_v55, %v1534_v53  ;;  %vm7946_vm12 = vmmov %vm7945_vm7  ;;  %v1291_v61 = vsel %vm7952_vm3, %v1288_v52, %v1290_v42  ;;  %v6412_v8 = vpack.c.bf16 %v6120_v23, %v6065_v41  ;;  %4698 = vmatmul.mubr.msk.bf16.gmra.mrb[52].mxu0 %vm6393_vm8, %v6311_v6 }
 0x1cd   : > { %7944 = vst [vmem:[#allocation37_spill] sm:$0xff] %v7943_v11  ;;  %v1537_v19 = vsel %vm7946_vm12, %v1534_v53, %v1536_v54  ;;  %vm6402_vm14 = vmpackc.low %vm6278_vm1, %vm7941_vm4  ;;  %v1298_v55 = vrot.slane %v6074_v37, 7  ;;  %v1540_v54 = vrot.slane %v6388_v38, 1  ;;  %v7953_v34 = vand.u32 15, %v5698_v40  ;;  %v5084_v53 = vpop.eup %5083 }
 0x1ce   : > { %v7948_v51 = vsel %vm6402_vm14, 4294967295, %v7947_v51  ;;  %v6406_v33 = vpack.c.bf16 %v1537_v19, %v1535_v36  ;;  %v6422_v22 = vpack.c.bf16 %v1291_v61, %v1289_v46  ;;  %v7957_v41 = vand.u32 15, %v7956_v4  ;;  %vm7960_vm15 = vmmov %vm7951_vm10  ;;  %v5086_v36 = vpop.eup %5085  ;;  %v7962_v61 = vld [vmem:[#allocation13_spill] sm:$0xff] }
 0x1cf   : > { %7949 = vst [vmem:[#allocation38_spill] sm:$0xff] %v7948_v51  ;;  %vm6418_vm12 = vcmp.ge.s32.totalorder %v7953_v34, 1  ;;  %v1293_v52 = vsel %vm7951_vm10, %v1290_v42, %v1292_v3  ;;  %v1295_v48 = vsel %vm7960_vm15, %v1292_v3, %v1294_v63  ;;  %v6437_v9 = vpack.c.bf16 %v6074_v37, %v6054_v58  ;;  %vm7961_vm1 = vmmov %vm7945_vm7 }
 0x1d0   : > { %7950 = vst [vmem:[#allocation39_spill] sm:$0xff] %v6406_v33  ;;  %vm6429_vm3 = vcmp.le.s32.totalorder %v7957_v41, 14  ;;  %v1296_v19 = vrot.slane %v6054_v58, 7  ;;  %v6441_v46 = vmul.f32 %v5084_v53, %v6069_v49  ;;  %4701 = vmatprep.mubr.msk.bf16.mxu0 %vm6402_vm14, %v6406_v33  ;;  %v1541_v42 = vsel %vm7961_vm1, %v1538_v20, %v1540_v54  ;;  %v7966_v41 = vld [vmem:[#allocation15_spill] sm:$0xff]  ;;  %vm7970_vm1 = vmmov %vm7960_vm15 }
 0x1d1   : > { %v7963_v3 = vand.u32 15, %v7962_v61  ;;  %v6455_v37 = vpack.c.bf16 %v1295_v48, %v1293_v52  ;;  %v1304_v58 = vrot.slane %v6149_v14, 7  ;;  %v1544_v49 = vrot.slane %v6385_v29, 1  ;;  %vm6481_vm14 = vmpackc.low %vm6348_vm0, %vm7941_vm4 }
 0x1d2   : > { %v6460_v53 = vmul.f32 %v5086_v36, %v6098_v0  ;;  %v6462_v4 = vpack.c.bf16 %v1541_v42, %v1539_v57  ;;  %v7967_v51 = vand.u32 15, %v7966_v41  ;;  %v7779_v61 = vrot.slane %v6441_v46, 7 }
 0x1d3   : > { %vm6451_vm7 = vcmp.le.s32.totalorder %v7963_v3, 14  ;;  %v1546_v52 = vrot.slane %v6441_v46, 1  ;;  %v1297_v48 = vsel %vm7960_vm15, %v1294_v63, %v1296_v19  ;;  %v1299_v3 = vsel %vm7970_vm1, %v1296_v19, %v1298_v55  ;;  %vm7974_vm15 = vmmov %vm7970_vm1 }
 0x1d4   : > { %vm6466_vm10 = vcmp.ge.s32.totalorder %v7967_v51, 1  ;;  %v1300_v33 = vrot.slane %v6152_v12, 7  ;;  %v1306_v0 = vrot.slane %v6175_v28, 7  ;;  %v1302_v57 = vrot.slane %v6220_v17, 7  ;;  %vm6493_vm1 = vmpackc.low %vm7941_vm4, %vm6418_vm12  ;;  %4702 = vmatmul.mubr.msk.bf16.gmra.mrb[56].mxu0 %vm6481_vm14, %v6462_v4 }
 0x1d5   : > { %v1542_v36 = vrot.slane %v6460_v53, 1  ;;  %v7973_v42 = vrot.slane %v5813_v43, 7  ;;  %vm7977_vm8 = vcmask 1046528   ;;  %v7978_v30 = vrot.slane %v5813_v43, 1 }
 0x1d6   : > { %v1547_v41 = vsel %vm7977_vm8, %v1544_v49, %v1546_v52  ;;  %vm7979_vm0 = vmmov %vm7977_vm8  ;;  %v6501_v6 = vpack.c.bf16 %v1299_v3, %v1297_v48  ;;  %v1308_v10 = vrot.slane %v6253_v45, 7  ;;  %v1310_v27 = vrot.slane %v6341_v60, 7 }
 0x1d7   : > { %v1355_v63 = vsel %vm7974_vm15, %v7779_v61, %v7973_v42  ;;  %v1581_v11 = vsel %vm7979_vm0, %v1546_v52, %v7978_v30  ;;  %vm7980_vm2 = vmmov %vm7979_vm0  ;;  %v6536_v52 = vpack.c.bf16 %v6175_v28, %v6149_v14  ;;  %v4929_v14 = vld [vmem:[#allocation7 + $0x210] sm:$0xff]   ;;  %v6560_v30 = vpack.c.bf16 %v6273_v39, %v6245_v31 }
 0x1d8   : > { %v6504_v62 = vpack.c.bf16 %v6170_v32, %v1355_v63  ;;  %v1543_v42 = vsel %vm7980_vm2, %v1540_v54, %v1542_v36  ;;  %vm7981_vm15 = vmmov %vm7979_vm0  ;;  %v6508_v61 = vpack.c.bf16 %v1581_v11, %v1547_v41  ;;  %v6523_v54 = vpack.c.bf16 %v6220_v17, %v6152_v12  ;;  %v5215_v17 = vld [vmem:[#allocation7 + $0x200] sm:$0xff]  }
 0x1d9   : > { %v1545_v44 = vsel %vm7981_vm15, %v1542_v36, %v1544_v49  ;;  %vm6515_vm8 = vmpackc.low %vm6429_vm3, %vm7941_vm4  ;;  %v782_v11 = vadd.s32 32, %v5698_v40  ;;  %vm7984_vm2 = vcmask 1040384   ;;  %v1314_v12 = vrot.slane %v6273_v39, 7  ;;  %7990 = vst [vmem:[#allocation12_spill] sm:$0xff] %v6560_v30 }
 0x1da   : > { %v6519_v32 = vpack.c.bf16 %v1545_v44, %v1543_v42  ;;  %3807 = vmatmul.mubr.msk.bf16.vlgmr.msra.gmra.mrb[0].mxu1 %vm6493_vm1, %v6504_v62  ;;  %v1301_v23 = vsel %vm7984_vm2, %v1298_v55, %v1300_v33  ;;  %vm7985_vm12 = vmmov %vm7984_vm2  ;;  %v1312_v55 = vrot.slane %v6245_v31, 7  ;;  %v6553_v63 = vpack.c.bf16 %v6341_v60, %v6253_v45 }
 0x1db   : > { %v1303_v49 = vsel %vm7985_vm12, %v1300_v33, %v1302_v57  ;;  %4710 = vmatpush3.bf16.msra.mxu1 %v5215_v17  ;;  %1958 = vmatprep.mubr.bf16.mxu1 %v6212_v5  ;;  %vm7986_vm3 = vmmov %vm7984_vm2  ;;  %v1316_v33 = vrot.slane %v6388_v38, 7  ;;  %v7993_v45 = vmov 0  ;;  %v1320_v60 = vrot.slane %v6385_v29, 7 }
 0x1dc   : > { %v6540_v48 = vpack.c.bf16 %v1303_v49, %v1301_v23  ;;  %v1305_v3 = vsel %vm7986_vm3, %v1302_v57, %v1304_v58  ;;  %vm7987_vm0 = vmmov %vm7984_vm2  ;;  %4705 = vmatprep.mubr.msk.bf16.mxu0 %vm6515_vm8, %v6519_v32  ;;  %4711 = vmatprep.subr.bf16.mxu1 %v4928_v16  ;;  %v1318_v57 = vrot.slane %v6460_v53, 7  ;;  %v842_v34 = vand.u32 15, %v782_v11  ;;  %v4930_v23 = vld [vmem:[#allocation7 + $0x218] sm:$0xff]  }
 0x1dd   : > { %v1307_v36 = vsel %vm7987_vm0, %v1304_v58, %v1306_v0  ;;  %vm7988_vm15 = vmmov %vm7987_vm0  ;;  %v1313_v31 = vsel %vm7987_vm0, %v1310_v27, %v1312_v55  ;;  %v784_v17 = vadd.s32 48, %v5698_v40 }
 0x1de   : > { %v6549_v28 = vpack.c.bf16 %v1307_v36, %v1305_v3  ;;  %v1309_v58 = vsel %vm7988_vm15, %v1306_v0, %v1308_v10  ;;  %vm7989_vm2 = vmmov %vm7987_vm0  ;;  %v4931_v3 = vld [vmem:[#allocation7 + $0x220] sm:$0xff]   ;;  %v8006_v36 = vmov 0 }
 0x1df   : > { %v1311_v41 = vsel %vm7989_vm2, %v1308_v10, %v1310_v27  ;;  %vm6565_vm12 = vmpackc.low %vm6451_vm7, %vm7941_vm4  ;;  %4712 = vmatpush3.bf16.msra.mxu1 %v4928_v16  ;;  %v6582_v10 = vpack.c.bf16 %v6460_v53, %v6388_v38  ;;  %v6591_v27 = vpack.c.bf16 %v6441_v46, %v6385_v29  ;;  %v8003_v53 = vrot.slane %v6441_v46, 7 }
 0x1e0   : > { %v6569_v44 = vpack.c.bf16 %v1311_v41, %v1309_v58  ;;  %vm6574_vm3 = vmpackc.low %vm7941_vm4, %vm6466_vm10  ;;  %4713 = vmatprep.subr.bf16.mxu1 %v4929_v14  ;;  %4706 = vmatmul.mubr.msk.bf16.gmra.mrb[60].mxu0 %vm6565_vm12, %v6508_v61  ;;  %v856_v46 = vand.u32 15, %v784_v17  ;;  %v4937_v58 = vld [vmem:[#allocation7 + $0x150] sm:$0xff]   ;;  %v8008_v41 = vmov 0  ;;  %v8012_v17 = vmov 0 }
 0x1e1   : > { %v7994_v45 = vsel %vm6574_vm3, 4294967295, %v7993_v45  ;;  %vm7995_vm15 = vmmov %vm7987_vm0  ;;  %7996 = vst [vmem:[#allocation13_spill] sm:$0xff] %v6582_v10  ;;  %v1322_v11 = vsel %vm7987_vm0, %v1320_v60, %v8003_v53  ;;  %v790_v53 = vadd.s32 96, %v5698_v40 }
 0x1e2   : > { %v1315_v39 = vsel %vm7995_vm15, %v1312_v55, %v1314_v12  ;;  %vm7998_vm7 = vmmov %vm7987_vm0  ;;  %8000 = vst [vmem:[#allocation40_spill] sm:$0xff] %v6591_v27  ;;  %3810 = vmatmul.mubr.msk.bf16.gmra.mrb[4].mxu1 %vm6574_vm3, %v6250_v56  ;;  %vm1198_vm15 = vcmp.ge.s32.totalorder %v842_v34, 1  ;;  %v4932_v55 = vld [vmem:[#allocation7 + $0x228] sm:$0xff]   ;;  %v4939_v34 = vld [vmem:[#allocation7 + $0x100] sm:$0xff]  }
 0x1e3   : > { %v6585_v0 = vpack.c.bf16 %v1315_v39, %v1313_v31  ;;  %v1317_v20 = vsel %vm7998_vm7, %v1314_v12, %v1316_v33  ;;  %vm7999_vm10 = vmmov %vm7987_vm0  ;;  %v8004_v12 = vld [vmem:[#allocation14_spill] sm:$0xff]  ;;  %1966 = vmatprep.mubr.bf16.mxu1 %v6235_v47  ;;  %4714 = vmatpush3.bf16.msra.mxu1 %v4929_v14  ;;  %v786_v14 = vadd.s32 64, %v5698_v40  ;;  %v4934_v39 = vld [vmem:[#allocation7 + $0x238] sm:$0xff]  }
 0x1e4   : > { %v1319_v49 = vsel %vm7999_vm10, %v1316_v33, %v1318_v57  ;;  %vm8002_vm2 = vmmov %vm7987_vm0  ;;  %2510 = vmatprep.mubr.bf16.mxu0 %v8004_v12  ;;  %4715 = vmatprep.subr.bf16.mxu1 %v4930_v23  ;;  %v4936_v33 = vld [vmem:[#allocation7 + $0x148] sm:$0xff]   ;;  %vm1200_vm10 = vcmp.ge.s32.totalorder %v856_v46, 1  ;;  %v4946_v46 = vld [vmem:[#allocation7 + $0x178] sm:$0xff]  }
 0x1e5   : > { %7997 = vst [vmem:[#allocation15_spill] sm:$0xff] %v6585_v0  ;;  %v6599_v16 = vpack.c.bf16 %v1319_v49, %v1317_v20  ;;  %v1321_v38 = vsel %vm8002_vm2, %v1318_v57, %v1320_v60  ;;  %vm6611_vm7 = vmpackc.low %vm7941_vm4, %vm1198_vm15  ;;  %v4933_v57 = vld [vmem:[#allocation7 + $0x230] sm:$0xff]   ;;  %v870_v31 = vand.u32 15, %v786_v14  ;;  %v4938_v60 = vld [vmem:[#allocation7 + $0x158] sm:$0xff]  }
 0x1e6   : > { %v6607_v29 = vpack.c.bf16 %v1322_v11, %v1321_v38  ;;  %v8007_v36 = vsel %vm6611_vm7, 4294967295, %v8006_v36  ;;  %vm6626_vm2 = vmpackc.low %vm7941_vm4, %vm1200_vm10  ;;  %v4940_v20 = vld [vmem:[#allocation7 + $0x160] sm:$0xff]   ;;  %v4942_v38 = vld [vmem:[#allocation7 + $0x168] sm:$0xff]  }
 0x1e7   : > { %8001 = vst [vmem:[#allocation41_spill] sm:$0xff] %v6599_v16  ;;  %4716 = vmatpush3.bf16.msra.mxu1 %v4930_v23  ;;  %v8009_v41 = vsel %vm6626_vm2, 4294967295, %v8008_v41  ;;  %vm1202_vm0 = vcmp.ge.s32.totalorder %v870_v31, 1  ;;  %v8010_v23 = vmov 0  ;;  %v4944_v11 = vld [vmem:[#allocation7 + $0x170] sm:$0xff]  }
 0x1e8   : > { %8005 = vst [vmem:[#allocation14_spill] sm:$0xff] %v6607_v29  ;;  %4717 = vmatprep.subr.bf16.mxu1 %v4931_v3  ;;  %3927 = vmatmul.mubr.msk.bf16.vlgmr.msra.gmra.mrb[64].mxu0 %vm6493_vm1, %v6504_v62  ;;  %vm6640_vm15 = vmpackc.low %vm7941_vm4, %vm1202_vm0 }
 0x1e9   : > { %2516 = vmatprep.mubr.bf16.mxu0 %v6212_v5  ;;  %4758 = vmatpush3.bf16.msra.mxu0 %v6338_v7  ;;  %v788_v7 = vadd.s32 80, %v5698_v40  ;;  %v8011_v23 = vsel %vm6640_vm15, 4294967295, %v8010_v23 }
 0x1ea   : > { %3813 = vmatmul.mubr.msk.bf16.gmra.mrb[8].mxu1 %vm6611_vm7, %v6304_v21  ;;  %4759 = vmatprep.subr.bf16.mxu0 %v4936_v33 }
 0x1eb   : > { %1974 = vmatprep.mubr.bf16.mxu1 %v6268_v24  ;;  %4718 = vmatpush3.bf16.msra.mxu1 %v4931_v3  ;;  %v884_v49 = vand.u32 15, %v788_v7  ;;  %v898_v3 = vand.u32 15, %v790_v53  ;;  %v8022_v53 = vmov 0 }
 0x1ec   : > { %4719 = vmatprep.subr.bf16.mxu1 %v4932_v55 }
 0x1ed   : > { %4760 = vmatpush3.bf16.msra.mxu0 %v4936_v33  ;;  %vm1204_vm10 = vcmp.ge.s32.totalorder %v884_v49, 1  ;;  %v8014_v33 = vmov 0 }
 0x1ee   : > { %4761 = vmatprep.subr.bf16.mxu0 %v4937_v58  ;;  %vm6654_vm0 = vmpackc.low %vm7941_vm4, %vm1204_vm10  ;;  %vm1206_vm10 = vcmp.ge.s32.totalorder %v898_v3, 1  ;;  %v802_v3 = vadd.s32 192, %v5698_v40 }
 0x1ef   : > { %4720 = vmatpush3.bf16.msra.mxu1 %v4932_v55  ;;  %v8013_v17 = vsel %vm6654_vm0, 4294967295, %v8012_v17  ;;  %v792_v55 = vadd.s32 112, %v5698_v40 }
 0x1f0   : > { %4721 = vmatprep.subr.bf16.mxu1 %v4933_v57  ;;  %3930 = vmatmul.mubr.msk.bf16.gmra.mrb[68].mxu0 %vm6574_vm3, %v6250_v56 }
 0x1f1   : > { %2524 = vmatprep.mubr.bf16.mxu0 %v6235_v47  ;;  %4762 = vmatpush3.bf16.msra.mxu0 %v4937_v58  ;;  %v912_v14 = vand.u32 15, %v792_v55  ;;  %v8016_v58 = vmov 0  ;;  %v982_v55 = vand.u32 15, %v802_v3  ;;  %v8038_v3 = vld [vmem:[#allocation18_spill] sm:$0xff] }
 0x1f2   : > { %3816 = vmatmul.mubr.msk.bf16.gmra.mrb[12].mxu1 %vm6626_vm2, %v6324_v15  ;;  %4763 = vmatprep.subr.bf16.mxu0 %v4938_v60 }
 0x1f3   : > { %1982 = vmatprep.mubr.bf16.mxu1 %v6328_v2  ;;  %4722 = vmatpush3.bf16.msra.mxu1 %v4933_v57  ;;  %v794_v57 = vadd.s32 128, %v5698_v40 }
 0x1f4   : > { %4723 = vmatprep.subr.bf16.mxu1 %v4934_v39 }
 0x1f5   : > { %4764 = vmatpush3.bf16.msra.mxu0 %v4938_v60  ;;  %v926_v31 = vand.u32 15, %v794_v57  ;;  %v8018_v60 = vmov 0  ;;  %v8026_v57 = vmov 0 }
 0x1f6   : > { %4765 = vmatprep.subr.bf16.mxu0 %v4940_v20 }
 0x1f7   : > { %4724 = vmatpush3.bf16.msra.mxu1 %v4934_v39  ;;  %v796_v39 = vadd.s32 144, %v5698_v40 }
 0x1f8   : > { %4477 = vmatprep.subr.bf16.mxu1 %v4939_v34  ;;  %3933 = vmatmul.mubr.msk.bf16.gmra.mrb[72].mxu0 %vm6611_vm7, %v6304_v21  ;;  %vm6668_vm7 = vmpackc.low %vm7941_vm4, %vm1206_vm10  ;;  %v798_v34 = vadd.s32 160, %v5698_v40 }
 0x1f9   : > { %2532 = vmatprep.mubr.bf16.mxu0 %v6268_v24  ;;  %4766 = vmatpush3.bf16.msra.mxu0 %v4940_v20  ;;  %v8015_v33 = vsel %vm6668_vm7, 4294967295, %v8014_v33  ;;  %v940_v7 = vand.u32 15, %v796_v39  ;;  %v8020_v20 = vmov 0  ;;  %v806_v39 = vadd.s32 224, %v5698_v40 }
 0x1fa   : > { %3819 = vmatmul.mubr.msk.bf16.gmra.mrb[16].mxu1 %vm6640_vm15, %v6352_v26  ;;  %4767 = vmatprep.subr.bf16.mxu0 %v4942_v38  ;;  %v954_v49 = vand.u32 15, %v798_v34 }
 0x1fb   : > { %1990 = vmatprep.mubr.bf16.mxu1 %v6356_v35  ;;  %v1010_v34 = vand.u32 15, %v806_v39  ;;  %v8040_v39 = vld [vmem:[#allocation16_spill] sm:$0xff] }
 0x1fd   : > { %4768 = vmatpush3.bf16.msra.mxu0 %v4942_v38  ;;  %v800_v38 = vadd.s32 176, %v5698_v40 }
 0x1fe   : > { %4769 = vmatprep.subr.bf16.mxu0 %v4944_v11 }
 0x200   : > { %3936 = vmatmul.mubr.msk.bf16.gmra.mrb[76].mxu0 %vm6626_vm2, %v6324_v15  ;;  %vm1208_vm2 = vcmp.ge.s32.totalorder %v912_v14, 1  ;;  %v804_v14 = vadd.s32 208, %v5698_v40 }
 0x201   : > { %2540 = vmatprep.mubr.bf16.mxu0 %v6328_v2  ;;  %4770 = vmatpush3.bf16.msra.mxu0 %v4944_v11  ;;  %vm6682_vm10 = vmpackc.low %vm7941_vm4, %vm1208_vm2  ;;  %v968_v11 = vand.u32 15, %v800_v38  ;;  %v8032_v38 = vmov 0 }
 0x202   : > { %3822 = vmatmul.mubr.msk.bf16.gmra.mrb[20].mxu1 %vm6654_vm0, %v6373_v59  ;;  %4771 = vmatprep.subr.bf16.mxu0 %v4946_v46  ;;  %v8017_v58 = vsel %vm6682_vm10, 4294967295, %v8016_v58 }
 0x203   : > { %1998 = vmatprep.mubr.bf16.mxu1 %v6367_v50 }
 0x205   : > { %4772 = vmatpush3.bf16.msra.mxu0 %v4946_v46  ;;  %v8024_v46 = vmov 0 }
 0x208   : > { %3939 = vmatmul.mubr.msk.bf16.gmra.mrb[80].mxu0 %vm6640_vm15, %v6352_v26  ;;  %vm1210_vm15 = vcmp.ge.s32.totalorder %v926_v31, 1  ;;  %v996_v31 = vand.u32 15, %v804_v14  ;;  %v4941_v14 = vld [vmem:[#allocation7 + $0xc0] sm:$0xff]  }
 0x209   : > { %2548 = vmatprep.mubr.bf16.mxu0 %v6356_v35  ;;  %vm6696_vm2 = vmpackc.low %vm7941_vm4, %vm1210_vm15 }
 0x20a   : > { %3825 = vmatmul.mubr.msk.bf16.gmra.mrb[24].mxu1 %vm6668_vm7, %v6378_v18  ;;  %v8019_v60 = vsel %vm6696_vm2, 4294967295, %v8018_v60 }
 0x20b   : > { %2006 = vmatprep.mubr.bf16.mxu1 %v6382_v25 }
 0x210   : > { %3942 = vmatmul.mubr.msk.bf16.gmra.mrb[84].mxu0 %vm6654_vm0, %v6373_v59  ;;  %vm1212_vm0 = vcmp.ge.s32.totalorder %v940_v7, 1  ;;  %v8029_v7 = vmov 0 }
 0x211   : > { %2556 = vmatprep.mubr.bf16.mxu0 %v6367_v50  ;;  %vm6710_vm15 = vmpackc.low %vm7941_vm4, %vm1212_vm0 }
 0x212   : > { %3828 = vmatmul.mubr.msk.bf16.gmra.mrb[28].mxu1 %vm6682_vm10, %v6422_v22  ;;  %v8021_v20 = vsel %vm6710_vm15, 4294967295, %v8020_v20 }
 0x213   : > { %2014 = vmatprep.mubr.bf16.mxu1 %v6412_v8 }
 0x218   : > { %3945 = vmatmul.mubr.msk.bf16.gmra.mrb[88].mxu0 %vm6668_vm7, %v6378_v18  ;;  %vm1214_vm7 = vcmp.ge.s32.totalorder %v954_v49, 1  ;;  %v808_v49 = vadd.s32 240, %v5698_v40  ;;  %v8035_v40 = vmov 0 }
 0x219   : > { %2564 = vmatprep.mubr.bf16.mxu0 %v6382_v25  ;;  %vm6724_vm0 = vmpackc.low %vm7941_vm4, %vm1214_vm7 }
 0x21a   : > { %3831 = vmatmul.mubr.msk.bf16.gmra.mrb[32].mxu1 %vm6696_vm2, %v6455_v37  ;;  %v8023_v53 = vsel %vm6724_vm0, 4294967295, %v8022_v53 }
 0x21b   : > { %2022 = vmatprep.mubr.bf16.mxu1 %v6437_v9 }
 0x220   : > { %3948 = vmatmul.mubr.msk.bf16.gmra.mrb[92].mxu0 %vm6682_vm10, %v6422_v22  ;;  %vm1216_vm10 = vcmp.ge.s32.totalorder %v968_v11, 1  ;;  %v1024_v11 = vand.u32 15, %v808_v49  ;;  %v4945_v49 = vld [vmem:[#allocation7 + $0xc8] sm:$0xff]  }
 0x221   : > { %2572 = vmatprep.mubr.bf16.mxu0 %v6412_v8  ;;  %vm6738_vm7 = vmpackc.low %vm7941_vm4, %vm1216_vm10 }
 0x222   : > { %3834 = vmatmul.mubr.msk.bf16.gmra.mrb[36].mxu1 %vm6710_vm15, %v6501_v6  ;;  %v8025_v46 = vsel %vm6738_vm7, 4294967295, %v8024_v46 }
 0x223   : > { %2030 = vmatprep.mubr.bf16.mxu1 %v6523_v54 }
 0x228   : > { %3951 = vmatmul.mubr.msk.bf16.gmra.mrb[96].mxu0 %vm6696_vm2, %v6455_v37  ;;  %vm1218_vm2 = vcmp.ge.s32.totalorder %v982_v55, 1  ;;  %v4955_v55 = vld [vmem:[#allocation7 + $0x130] sm:$0xff]  }
 0x229   : > { %2580 = vmatprep.mubr.bf16.mxu0 %v6437_v9  ;;  %vm6752_vm10 = vmpackc.low %vm7941_vm4, %vm1218_vm2 }
 0x22a   : > { %3837 = vmatmul.mubr.msk.bf16.gmra.mrb[40].mxu1 %vm6724_vm0, %v6540_v48  ;;  %v8027_v57 = vsel %vm6752_vm10, 4294967295, %v8026_v57 }
 0x22b   : > { %2038 = vmatprep.mubr.bf16.mxu1 %v6536_v52  ;;  %8028 = vst [vmem:[#allocation42_spill] sm:$0xff] %v8027_v57 }
 0x230   : > { %3954 = vmatmul.mubr.msk.bf16.gmra.mrb[100].mxu0 %vm6710_vm15, %v6501_v6  ;;  %vm1220_vm15 = vcmp.ge.s32.totalorder %v996_v31, 1  ;;  %v4943_v31 = vld [vmem:[#allocation7 + $0x108] sm:$0xff]  }
 0x231   : > { %2588 = vmatprep.mubr.bf16.mxu0 %v6523_v54  ;;  %vm6766_vm2 = vmpackc.low %vm7941_vm4, %vm1220_vm15 }
 0x232   : > { %3840 = vmatmul.mubr.msk.bf16.gmra.mrb[44].mxu1 %vm6738_vm7, %v6549_v28  ;;  %v8030_v7 = vsel %vm6766_vm2, 4294967295, %v8029_v7 }
 0x233   : > { %2046 = vmatprep.mubr.bf16.mxu1 %v6553_v63  ;;  %8031 = vst [vmem:[#allocation43_spill] sm:$0xff] %v8030_v7  ;;  %v4947_v7 = vld [vmem:[#allocation7 + $0x110] sm:$0xff]  }
 0x238   : > { %3957 = vmatmul.mubr.msk.bf16.gmra.mrb[104].mxu0 %vm6724_vm0, %v6540_v48  ;;  %vm1222_vm0 = vcmp.ge.s32.totalorder %v1010_v34, 1  ;;  %v8052_v34 = vld [vmem:[#allocation28_spill] sm:$0xff] }
 0x239   : > { %2596 = vmatprep.mubr.bf16.mxu0 %v6536_v52  ;;  %vm6780_vm15 = vmpackc.low %vm7941_vm4, %vm1222_vm0 }
 0x23a   : > { %3843 = vmatmul.mubr.msk.bf16.gmra.mrb[48].mxu1 %vm6752_vm10, %v6569_v44  ;;  %v8033_v38 = vsel %vm6780_vm15, 4294967295, %v8032_v38 }
 0x23b   : > { %2054 = vmatprep.mubr.bf16.mxu1 %v6560_v30  ;;  %8034 = vst [vmem:[#allocation44_spill] sm:$0xff] %v8033_v38  ;;  %v8044_v38 = vld [vmem:[#allocation23_spill] sm:$0xff] }
 0x240   : > { %3960 = vmatmul.mubr.msk.bf16.gmra.mrb[108].mxu0 %vm6738_vm7, %v6549_v28  ;;  %vm1224_vm7 = vcmp.ge.s32.totalorder %v1024_v11, 1  ;;  %v8042_v11 = vld [vmem:[#allocation21_spill] sm:$0xff] }
 0x241   : > { %2604 = vmatprep.mubr.bf16.mxu0 %v6553_v63  ;;  %vm6793_vm3 = vmpackc.low %vm7941_vm4, %vm1224_vm7  ;;  %vm8048_vm4 = vnez %v7873_v1  ;;  %v8067_v1 = vld [vmem:[#allocation39_spill] sm:$0xff] }
 0x242   : > { %3846 = vmatmul.mubr.msk.bf16.gmra.mrb[52].mxu1 %vm6766_vm2, %v6585_v0  ;;  %v8036_v40 = vsel %vm6793_vm3, 4294967295, %v8035_v40 }
 0x243   : > { %2062 = vmatprep.mubr.bf16.mxu1 %v6582_v10  ;;  %8037 = vst [vmem:[#allocation45_spill] sm:$0xff] %v8036_v40  ;;  %v4953_v40 = vld [vmem:[#allocation7 + $0x128] sm:$0xff]  }
 0x248   : > { %3963 = vmatmul.mubr.msk.bf16.gmra.mrb[112].mxu0 %vm6752_vm10, %v6569_v44 }
 0x249   : > { %2612 = vmatprep.mubr.bf16.mxu0 %v6560_v30  ;;  %v4949_v30 = vld [vmem:[#allocation7 + $0x118] sm:$0xff]  }
 0x24a   : > { %3849 = vmatmul.mubr.msk.bf16.gmra.mrb[56].mxu1 %vm6780_vm15, %v6599_v16 }
 0x24b   : > { %2070 = vmatprep.mubr.bf16.mxu1 %v6591_v27 }
 0x250   : > { %3966 = vmatmul.mubr.msk.bf16.gmra.mrb[116].mxu0 %vm6766_vm2, %v6585_v0  ;;  %v4948_v0 = vld [vmem:[#allocation7 + $0xd0] sm:$0xff]  }
 0x251   : > { %2620 = vmatprep.mubr.bf16.mxu0 %v6582_v10  ;;  %v8055_v10 = vld [vmem:[#allocation30_spill] sm:$0xff] }
 0x252   : > { %3852 = vmatmul.mubr.msk.bf16.gmra.mrb[60].mxu1 %vm6793_vm3, %v6607_v29 }
 0x253   : > { %4725 = vmatprep.mubr.msk.bf16.mxu1 %vm5890_vm5, %v8038_v3 }
 0x258   : > { %3969 = vmatmul.mubr.msk.bf16.gmra.mrb[120].mxu0 %vm6780_vm15, %v6599_v16 }
 0x259   : > { %2628 = vmatprep.mubr.bf16.mxu0 %v6591_v27  ;;  %v8058_v27 = vld [vmem:[#allocation32_spill] sm:$0xff] }
 0x25a   : > { %4726 = vmatmul.mubr.msk.bf16.vlgmr.msra.gmra.mrb[64].mxu1 %vm5905_vm6, %v8040_v39 }
 0x25b   : > { %4478 = vmatpush3.bf16.msra.mxu1 %v4941_v14  ;;  %4729 = vmatprep.mubr.msk.bf16.mxu1 %vm5969_vm9, %v8042_v11  ;;  %v8046_v14 = vld [vmem:[#allocation25_spill] sm:$0xff] }
 0x25c   : > { %4479 = vmatprep.subr.bf16.mxu1 %v4943_v31  ;;  %v4951_v31 = vld [vmem:[#allocation7 + $0x120] sm:$0xff]  }
 0x25f   : > { %4480 = vmatpush3.bf16.msra.mxu1 %v4945_v49  ;;  %v4952_v49 = vld [vmem:[#allocation7 + $0xe0] sm:$0xff]  }
 0x260   : > { %4481 = vmatprep.subr.bf16.mxu1 %v4947_v7  ;;  %3972 = vmatmul.mubr.msk.bf16.gmra.mrb[124].mxu0 %vm6793_vm3, %v6607_v29  ;;  %v4950_v7 = vld [vmem:[#allocation7 + $0xd8] sm:$0xff]  }
 0x261   : > { %4773 = vmatprep.mubr.msk.bf16.mxu0 %vm5890_vm5, %v8038_v3  ;;  %v8050_v3 = vld [vmem:[#allocation26_spill] sm:$0xff] }
 0x262   : > { %4730 = vmatmul.mubr.msk.bf16.gmra.mrb[68].mxu1 %vm6026_vm11, %v8044_v38  ;;  %vm8051_vm5 = vnez %v8050_v3 }
 0x263   : > { %4733 = vmatprep.mubr.msk.bf16.mxu1 %vm6046_vm13, %v8046_v14  ;;  %4482 = vmatpush3.bf16.msra.mxu1 %v4948_v0  ;;  %v8049_v0 = vld [vmem:[#allocation27_spill] sm:$0xff] }
 0x264   : > { %4483 = vmatprep.subr.bf16.mxu1 %v4949_v30  ;;  %v4954_v30 = vld [vmem:[#allocation7 + $0xe8] sm:$0xff]  }
 0x267   : > { %4484 = vmatpush3.bf16.msra.mxu1 %v4950_v7  ;;  %v4956_v7 = vld [vmem:[#allocation7 + $0xf0] sm:$0xff]  }
 0x268   : > { %4485 = vmatprep.subr.bf16.mxu1 %v4951_v31  ;;  %4774 = vmatmul.mubr.msk.bf16.vlgmr.msra.gmra.mrb[128].mxu0 %vm5905_vm6, %v8040_v39  ;;  %v4957_v39 = vld [vmem:[#allocation7 + $0x138] sm:$0xff]   ;;  %v8053_v31 = vld [vmem:[#allocation29_spill] sm:$0xff] }
 0x269   : > { %4777 = vmatprep.mubr.msk.bf16.mxu0 %vm5969_vm9, %v8042_v11  ;;  %vm8054_vm6 = vnez %v8053_v31  ;;  %v8056_v11 = vld [vmem:[#allocation31_spill] sm:$0xff] }
 0x26a   : > { %4734 = vmatmul.mubr.msk.bf16.gmra.mrb[72].mxu1 %vm8048_vm4, %v6117_v13  ;;  %vm8057_vm9 = vnez %v8056_v11 }
 0x26b   : > { %4737 = vmatprep.mubr.msk.bf16.mxu1 %vm8051_vm5, %v8049_v0  ;;  %4486 = vmatpush3.bf16.msra.mxu1 %v4952_v49  ;;  %v6853_v49 = vpop.f32.mrb[32].mxu0 }
 0x26c   : > { %4487 = vmatprep.subr.bf16.mxu1 %v4953_v40  ;;  %v4958_v40 = vld [vmem:[#allocation7 + $0xf8] sm:$0xff]  }
 0x26f   : > { %4488 = vmatpush3.bf16.msra.mxu1 %v4954_v30  ;;  %v2111_v30 = vpop.f32.mrb[33].mxu0 }
 0x270   : > { %4489 = vmatprep.subr.bf16.mxu1 %v4955_v55  ;;  %4778 = vmatmul.mubr.msk.bf16.gmra.mrb[132].mxu0 %vm6026_vm11, %v8044_v38  ;;  %v6855_v16 = vpop.f32.mrb[34].mxu0  ;;  %v8061_v55 = vld [vmem:[#allocation34_spill] sm:$0xff] }
 0x271   : > { %4781 = vmatprep.mubr.msk.bf16.mxu0 %vm6046_vm13, %v8046_v14  ;;  %v2114_v38 = vpop.f32.mrb[35].mxu0  ;;  %v8059_v14 = vld [vmem:[#allocation33_spill] sm:$0xff] }
 0x272   : > { %4738 = vmatmul.mubr.msk.bf16.gmra.mrb[76].mxu1 %vm8054_vm6, %v8052_v34  ;;  %vm8060_vm11 = vnez %v8059_v14 }
 0x273   : > { %4741 = vmatprep.mubr.msk.bf16.mxu1 %vm8057_vm9, %v8055_v10  ;;  %4490 = vmatpush3.bf16.msra.mxu1 %v4956_v7  ;;  %v8062_v7 = vld [vmem:[#allocation35_spill] sm:$0xff] }
 0x274   : > { %4491 = vmatprep.subr.bf16.mxu1 %v4957_v39  ;;  %vm8063_vm13 = vnez %v8062_v7  ;;  %v8064_v39 = vld [vmem:[#allocation36_spill] sm:$0xff] }
 0x277   : > { %4492 = vmatpush3.bf16.msra.mxu1 %v4958_v40  ;;  %v8065_v40 = vld [vmem:[#allocation37_spill] sm:$0xff] }
 0x278   : > { %4782 = vmatmul.mubr.msk.bf16.gmra.mrb[136].mxu0 %vm8048_vm4, %v6117_v13  ;;  %vm8066_vm0 = vnez %v8065_v40  ;;  %v8068_v13 = vld [vmem:[#allocation38_spill] sm:$0xff]  ;;  %vm8080_vm4 = vnez %v8013_v17 }
 0x279   : > { %4785 = vmatprep.mubr.msk.bf16.mxu0 %vm8051_vm5, %v8049_v0  ;;  %vm8069_vm7 = vnez %v8068_v13  ;;  %v6881_v0 = vpop.f32.mrb[36].mxu0  ;;  %vm8081_vm5 = vnez %v8015_v33 }
 0x27a   : > { %4742 = vmatmul.mubr.msk.bf16.gmra.mrb[80].mxu1 %vm8060_vm11, %v8058_v27  ;;  %v6883_v3 = vpop.f32.mrb[37].mxu0 }
 0x27b   : > { %4745 = vmatprep.mubr.msk.bf16.mxu1 %vm8063_vm13, %v8061_v55  ;;  %v6885_v29 = vpop.f32.mrb[38].mxu0 }
 0x27c   : > { %v6887_v31 = vpop.f32.mrb[39].mxu0 }
 0x280   : > { %4786 = vmatmul.mubr.msk.bf16.gmra.mrb[140].mxu0 %vm8054_vm6, %v8052_v34  ;;  %v6901_v34 = vpop.f32.mrb[40].mxu0  ;;  %vm8082_vm6 = vnez %v8017_v58 }
 0x281   : > { %4789 = vmatprep.mubr.msk.bf16.mxu0 %vm8057_vm9, %v8055_v10  ;;  %v6903_v10 = vpop.f32.mrb[41].mxu0  ;;  %vm8083_vm9 = vnez %v8019_v60 }
 0x282   : > { %4746 = vmatmul.mubr.msk.bf16.gmra.mrb[84].mxu1 %vm8066_vm0, %v8064_v39  ;;  %v6905_v11 = vpop.f32.mrb[42].mxu0 }
 0x283   : > { %4749 = vmatprep.mubr.msk.bf16.mxu1 %vm8069_vm7, %v8067_v1  ;;  %v6907_v14 = vpop.f32.mrb[43].mxu0 }
 0x288   : > { %4790 = vmatmul.mubr.msk.bf16.gmra.mrb[144].mxu0 %vm8060_vm11, %v8058_v27  ;;  %v6919_v27 = vpop.f32.mrb[44].mxu0  ;;  %vm8084_vm11 = vnez %v8021_v20 }
 0x289   : > { %4793 = vmatprep.mubr.msk.bf16.mxu0 %vm8063_vm13, %v8061_v55  ;;  %v6921_v55 = vpop.f32.mrb[45].mxu0  ;;  %vm8086_vm13 = vnez %v8023_v53 }
 0x28a   : > { %4750 = vmatmul.mubr.msk.bf16.gmra.mrb[88].mxu1 %vm6481_vm14, %v6462_v4  ;;  %v6923_v7 = vpop.f32.mrb[46].mxu0 }
 0x28b   : > { %4753 = vmatprep.mubr.msk.bf16.mxu1 %vm6515_vm8, %v6519_v32  ;;  %v6925_v57 = vpop.f32.mrb[47].mxu0 }
 0x290   : > { %4794 = vmatmul.mubr.msk.bf16.gmra.mrb[148].mxu0 %vm8066_vm0, %v8064_v39  ;;  %vm8089_vm0 = vnez %v8025_v46 }
 0x291   : > { %4797 = vmatprep.mubr.msk.bf16.mxu0 %vm8069_vm7, %v8067_v1 }
 0x292   : > { %4754 = vmatmul.mubr.msk.bf16.gmra.mrb[92].mxu1 %vm6565_vm12, %v6508_v61 }
 0x293   : > { %2972 = vmatprep.mubr.bf16.mxu1 %v8004_v12  ;;  %v6937_v12 = vpop.f32.mrb[48].mxu0 }
 0x294   : > { %v6939_v39 = vpop.f32.mrb[49].mxu0 }
 0x295   : > { %v6941_v40 = vpop.f32.mrb[50].mxu0 }
 0x296   : > { %v6943_v1 = vpop.f32.mrb[51].mxu0 }
 0x298   : > { %4798 = vmatmul.mubr.msk.bf16.gmra.mrb[152].mxu0 %vm6481_vm14, %v6462_v4  ;;  %vm8070_vm14 = vnez %v7994_v45 }
 0x299   : > { %4801 = vmatprep.mubr.msk.bf16.mxu0 %vm6515_vm8, %v6519_v32  ;;  %vm8078_vm8 = vnez %v8009_v41 }
 0x29a   : > { %4047 = vmatmul.mubr.msk.bf16.vlgmr.msra.gmra.mrb[96].mxu1 %vm6493_vm1, %v6504_v62  ;;  %vm8073_vm1 = vnez %v8007_v36 }
 0x29b   : > { %2980 = vmatprep.mubr.bf16.mxu1 %v6212_v5 }
 0x29f   : > { %v6952_v62 = vpop.f32.mrb[52].mxu0 }
 0x2a0   : > { %4802 = vmatmul.mubr.msk.bf16.gmra.mrb[156].mxu0 %vm6565_vm12, %v6508_v61  ;;  %8071 = vst [vmem:[#allocation18_spill] sm:$0xff] %v6952_v62  ;;  %v6954_v5 = vpop.f32.mrb[53].mxu0  ;;  %vm8079_vm12 = vnez %v8011_v23 }
 0x2a1   : > { %v6956_v4 = vpop.f32.mrb[54].mxu0 }
 0x2a2   : > { %4050 = vmatmul.mubr.msk.bf16.gmra.mrb[100].mxu1 %vm8070_vm14, %v6250_v56  ;;  %8072 = vst [vmem:[#allocation17_spill] sm:$0xff] %v6956_v4  ;;  %v6958_v51 = vpop.f32.mrb[55].mxu0 }
 0x2a3   : > { %2988 = vmatprep.mubr.bf16.mxu1 %v6235_v47 }
 0x2a7   : > { %v6964_v61 = vpop.f32.mrb[56].mxu0 }
 0x2a8   : > { %8074 = vst [vmem:[#allocation16_spill] sm:$0xff] %v6964_v61  ;;  %v6966_v56 = vpop.f32.mrb[57].mxu0 }
 0x2a9   : > { %8075 = vst [vmem:[#allocation19_spill] sm:$0xff] %v6966_v56  ;;  %v6968_v32 = vpop.f32.mrb[58].mxu0 }
 0x2aa   : > { %4053 = vmatmul.mubr.msk.bf16.gmra.mrb[104].mxu1 %vm8073_vm1, %v6304_v21  ;;  %8076 = vst [vmem:[#allocation21_spill] sm:$0xff] %v6968_v32  ;;  %v6970_v45 = vpop.f32.mrb[59].mxu0 }
 0x2ab   : > { %2996 = vmatprep.mubr.bf16.mxu1 %v6268_v24  ;;  %8077 = vst [vmem:[#allocation20_spill] sm:$0xff] %v6970_v45 }
 0x2ad   : > { %v4221_v19 = vpop.f32.mrb[0].mxu1 }
 0x2ae   : > { %v4222_v47 = vpop.f32.mrb[1].mxu1 }
 0x2af   : > { %v4223_v43 = vadd.f32 %v4222_v47, %v4221_v19  ;;  %v4224_v42 = vpop.f32.mrb[2].mxu1 }
 0x2b0   : > { %v4225_v13 = vpop.f32.mrb[3].mxu1 }
 0x2b1   : > { %v6972_v4 = vadd.f32 %v4223_v43, %v2111_v30  ;;  %v4226_v62 = vadd.f32 %v4225_v13, %v4224_v42 }
 0x2b2   : > { %4056 = vmatmul.mubr.msk.bf16.gmra.mrb[108].mxu1 %vm8078_vm8, %v6324_v15 }
 0x2b3   : > { %v6977_v24 = vadd.f32 %v4226_v62, %v2114_v38  ;;  %3004 = vmatprep.mubr.bf16.mxu1 %v6328_v2  ;;  %v4707_v21 = vpop.f32.mrb[60].mxu0 }
 0x2b4   : > { %v6980_v19 = vpop.f32.mrb[61].mxu0 }
 0x2b5   : > { %v4227_v36 = vpop.f32.mrb[4].mxu1  ;;  %v4708_v61 = vpop.f32.mrb[62].mxu0 }
 0x2b6   : > { %v4228_v47 = vpop.f32.mrb[5].mxu1  ;;  %v6982_v56 = vpop.f32.mrb[63].mxu0 }
 0x2b7   : > { %v4229_v32 = vadd.f32 %v4228_v47, %v4227_v36  ;;  %v4230_v45 = vpop.f32.mrb[6].mxu1 }
 0x2b8   : > { %v4231_v30 = vpop.f32.mrb[7].mxu1 }
 0x2b9   : > { %v6985_v43 = vadd.f32 %v6853_v49, %v4229_v32  ;;  %v4232_v41 = vadd.f32 %v4231_v30, %v4230_v45 }
 0x2ba   : > { %4059 = vmatmul.mubr.msk.bf16.gmra.mrb[112].mxu1 %vm8079_vm12, %v6352_v26 }
 0x2bb   : > { %v6991_v15 = vadd.f32 %v6855_v16, %v4232_v41  ;;  %3012 = vmatprep.mubr.bf16.mxu1 %v6356_v35  ;;  %v4357_v2 = vpop.f32.mrb[64].mxu0 }
 0x2bc   : > { %v4358_v62 = vpop.f32.mrb[65].mxu0 }
 0x2bd   : > { %v4233_v38 = vpop.f32.mrb[8].mxu1  ;;  %v4360_v13 = vpop.f32.mrb[66].mxu0 }
 0x2be   : > { %v4234_v61 = vpop.f32.mrb[9].mxu1  ;;  %v4361_v36 = vpop.f32.mrb[67].mxu0 }
 0x2bf   : > { %v4235_v42 = vadd.f32 %v4234_v61, %v4233_v38  ;;  %v4236_v21 = vpop.f32.mrb[10].mxu1 }
 0x2c0   : > { %v4237_v49 = vpop.f32.mrb[11].mxu1 }
 0x2c1   : > { %v6995_v32 = vadd.f32 %v4235_v42, %v6883_v3  ;;  %v4238_v45 = vadd.f32 %v4237_v49, %v4236_v21 }
 0x2c2   : > { %4062 = vmatmul.mubr.msk.bf16.gmra.mrb[116].mxu1 %vm8080_vm4, %v6373_v59 }
 0x2c3   : > { %v7001_v26 = vadd.f32 %v4238_v45, %v6887_v31  ;;  %3020 = vmatprep.mubr.bf16.mxu1 %v6367_v50  ;;  %v4363_v35 = vpop.f32.mrb[68].mxu0 }
 0x2c4   : > { %v4364_v16 = vpop.f32.mrb[69].mxu0 }
 0x2c5   : > { %v4239_v23 = vpop.f32.mrb[12].mxu1  ;;  %v7004_v30 = vadd.f32 %v4364_v16, %v4363_v35  ;;  %v4366_v2 = vpop.f32.mrb[70].mxu0 }
 0x2c6   : > { %v4240_v47 = vpop.f32.mrb[13].mxu1  ;;  %v4367_v38 = vpop.f32.mrb[71].mxu0 }
 0x2c7   : > { %v4241_v41 = vadd.f32 %v4240_v47, %v4239_v23  ;;  %v4242_v3 = vpop.f32.mrb[14].mxu1  ;;  %v7009_v59 = vadd.f32 %v4367_v38, %v4366_v2 }
 0x2c8   : > { %v4243_v62 = vpop.f32.mrb[15].mxu1 }
 0x2c9   : > { %v7007_v61 = vadd.f32 %v6881_v0, %v4241_v41  ;;  %v4244_v17 = vadd.f32 %v4243_v62, %v4242_v3 }
 0x2ca   : > { %4065 = vmatmul.mubr.msk.bf16.gmra.mrb[120].mxu1 %vm8081_vm5, %v6378_v18 }
 0x2cb   : > { %v7015_v50 = vadd.f32 %v6885_v29, %v4244_v17  ;;  %3028 = vmatprep.mubr.bf16.mxu1 %v6382_v25  ;;  %v4369_v31 = vpop.f32.mrb[72].mxu0 }
 0x2cc   : > { %v4370_v13 = vpop.f32.mrb[73].mxu0 }
 0x2cd   : > { %v4245_v42 = vpop.f32.mrb[16].mxu1  ;;  %v7018_v36 = vadd.f32 %v4370_v13, %v4369_v31  ;;  %v4372_v49 = vpop.f32.mrb[74].mxu0 }
 0x2ce   : > { %v4246_v21 = vpop.f32.mrb[17].mxu1  ;;  %v4373_v35 = vpop.f32.mrb[75].mxu0 }
 0x2cf   : > { %v4247_v0 = vadd.f32 %v4246_v21, %v4245_v42  ;;  %v4248_v45 = vpop.f32.mrb[18].mxu1  ;;  %v7023_v18 = vadd.f32 %v4373_v35, %v4372_v49 }
 0x2d0   : > { %v4249_v23 = vpop.f32.mrb[19].mxu1 }
 0x2d1   : > { %v7021_v16 = vadd.f32 %v4247_v0, %v6903_v10  ;;  %v4250_v29 = vadd.f32 %v4249_v23, %v4248_v45 }
 0x2d2   : > { %4068 = vmatmul.mubr.msk.bf16.gmra.mrb[124].mxu1 %vm8082_vm6, %v6422_v22 }
 0x2d3   : > { %v7029_v25 = vadd.f32 %v4250_v29, %v6907_v14  ;;  %3036 = vmatprep.mubr.bf16.mxu1 %v6412_v8  ;;  %v4375_v33 = vpop.f32.mrb[76].mxu0 }
 0x2d4   : > { %v4376_v41 = vpop.f32.mrb[77].mxu0 }
 0x2d5   : > { %v4251_v47 = vpop.f32.mrb[20].mxu1  ;;  %v7032_v3 = vadd.f32 %v4376_v41, %v4375_v33  ;;  %v4378_v38 = vpop.f32.mrb[78].mxu0 }
 0x2d6   : > { %v4252_v2 = vpop.f32.mrb[21].mxu1  ;;  %v4379_v17 = vpop.f32.mrb[79].mxu0 }
 0x2d7   : > { %v4253_v10 = vadd.f32 %v4252_v2, %v4251_v47  ;;  %v4254_v62 = vpop.f32.mrb[22].mxu1  ;;  %v7037_v22 = vadd.f32 %v4379_v17, %v4378_v38 }
 0x2d8   : > { %v4255_v31 = vpop.f32.mrb[23].mxu1 }
 0x2d9   : > { %v7035_v42 = vadd.f32 %v6901_v34, %v4253_v10  ;;  %v4256_v58 = vadd.f32 %v4255_v31, %v4254_v62 }
 0x2da   : > { %4071 = vmatmul.mubr.msk.bf16.gmra.mrb[128].mxu1 %vm8083_vm9, %v6455_v37 }
 0x2db   : > { %v7043_v8 = vadd.f32 %v6905_v11, %v4256_v58  ;;  %3044 = vmatprep.mubr.bf16.mxu1 %v6437_v9  ;;  %v4381_v14 = vpop.f32.mrb[80].mxu0 }
 0x2dc   : > { %v4382_v21 = vpop.f32.mrb[81].mxu0 }
 0x2dd   : > { %v4257_v13 = vpop.f32.mrb[24].mxu1  ;;  %v7046_v49 = vadd.f32 %v4382_v21, %v4381_v14  ;;  %v4384_v45 = vpop.f32.mrb[82].mxu0 }
 0x2de   : > { %v4258_v0 = vpop.f32.mrb[25].mxu1  ;;  %v4385_v23 = vpop.f32.mrb[83].mxu0 }
 0x2df   : > { %v4259_v34 = vadd.f32 %v4258_v0, %v4257_v13  ;;  %v4260_v35 = vpop.f32.mrb[26].mxu1  ;;  %v7051_v37 = vadd.f32 %v4385_v23, %v4384_v45 }
 0x2e0   : > { %v4261_v29 = vpop.f32.mrb[27].mxu1 }
 0x2e1   : > { %v7049_v33 = vadd.f32 %v4259_v34, %v6921_v55  ;;  %v4262_v60 = vadd.f32 %v4261_v29, %v4260_v35 }
 0x2e2   : > { %4074 = vmatmul.mubr.msk.bf16.gmra.mrb[132].mxu1 %vm8084_vm11, %v6501_v6 }
 0x2e3   : > { %v7057_v9 = vadd.f32 %v4262_v60, %v6925_v57  ;;  %3052 = vmatprep.mubr.bf16.mxu1 %v6523_v54  ;;  %v4387_v11 = vpop.f32.mrb[84].mxu0 }
 0x2e4   : > { %v4388_v41 = vpop.f32.mrb[85].mxu0 }
 0x2e5   : > { %v4263_v47 = vpop.f32.mrb[28].mxu1  ;;  %v7060_v10 = vadd.f32 %v4388_v41, %v4387_v11  ;;  %v4390_v38 = vpop.f32.mrb[86].mxu0 }
 0x2e6   : > { %v4264_v2 = vpop.f32.mrb[29].mxu1  ;;  %v4391_v17 = vpop.f32.mrb[87].mxu0 }
 0x2e7   : > { %v4265_v55 = vadd.f32 %v4264_v2, %v4263_v47  ;;  %v4266_v62 = vpop.f32.mrb[30].mxu1  ;;  %v7065_v6 = vadd.f32 %v4391_v17, %v4390_v38 }
 0x2e8   : > { %v4267_v31 = vpop.f32.mrb[31].mxu1 }
 0x2e9   : > { %v7063_v58 = vadd.f32 %v6919_v27, %v4265_v55  ;;  %v4268_v20 = vadd.f32 %v4267_v31, %v4266_v62  ;;  %v8094_v31 = vld [vmem:[#allocation12_spill] sm:$0xff] }
 0x2ea   : > { %4077 = vmatmul.mubr.msk.bf16.gmra.mrb[136].mxu1 %vm8086_vm13, %v6540_v48 }
 0x2eb   : > { %8085 = vst [vmem:[#allocation23_spill] sm:$0xff] %v7063_v58  ;;  %v7071_v54 = vadd.f32 %v6923_v7, %v4268_v20  ;;  %3060 = vmatprep.mubr.bf16.mxu1 %v6536_v52  ;;  %v4393_v57 = vpop.f32.mrb[88].mxu0 }
 0x2ec   : > { %v4394_v13 = vpop.f32.mrb[89].mxu0 }
 0x2ed   : > { %8087 = vst [vmem:[#allocation22_spill] sm:$0xff] %v7071_v54  ;;  %v4269_v14 = vpop.f32.mrb[32].mxu1  ;;  %v7074_v0 = vadd.f32 %v4394_v13, %v4393_v57  ;;  %v4396_v34 = vpop.f32.mrb[90].mxu0 }
 0x2ee   : > { %v4270_v21 = vpop.f32.mrb[33].mxu1  ;;  %v4397_v35 = vpop.f32.mrb[91].mxu0 }
 0x2ef   : > { %v4271_v27 = vadd.f32 %v4270_v21, %v4269_v14  ;;  %v4272_v45 = vpop.f32.mrb[34].mxu1  ;;  %v7079_v48 = vadd.f32 %v4397_v35, %v4396_v34 }
 0x2f0   : > { %v4273_v23 = vpop.f32.mrb[35].mxu1 }
 0x2f1   : > { %v7077_v29 = vadd.f32 %v4271_v27, %v6939_v39  ;;  %v4274_v53 = vadd.f32 %v4273_v23, %v4272_v45 }
 0x2f2   : > { %4080 = vmatmul.mubr.msk.bf16.gmra.mrb[140].mxu1 %vm8089_vm0, %v6549_v28 }
 0x2f3   : > { %8088 = vst [vmem:[#allocation25_spill] sm:$0xff] %v7077_v29  ;;  %v7085_v52 = vadd.f32 %v4274_v53, %v6943_v1  ;;  %3068 = vmatprep.mubr.bf16.mxu1 %v6553_v63  ;;  %v4399_v7 = vpop.f32.mrb[92].mxu0  ;;  %v8096_v53 = vld [vmem:[#allocation15_spill] sm:$0xff] }
 0x2f4   : > { %v4400_v11 = vpop.f32.mrb[93].mxu0 }
 0x2f5   : > { %8090 = vst [vmem:[#allocation24_spill] sm:$0xff] %v7085_v52  ;;  %v4275_v60 = vpop.f32.mrb[36].mxu1  ;;  %v7088_v41 = vadd.f32 %v4400_v11, %v4399_v7  ;;  %v4402_v2 = vpop.f32.mrb[94].mxu0  ;;  %v8099_v11 = vld [vmem:[#allocation13_spill] sm:$0xff] }
 0x2f6   : > { %v4276_v47 = vpop.f32.mrb[37].mxu1  ;;  %v4403_v38 = vpop.f32.mrb[95].mxu0 }
 0x2f7   : > { %v4277_v39 = vadd.f32 %v4276_v47, %v4275_v60  ;;  %v4278_v55 = vpop.f32.mrb[38].mxu1  ;;  %v7093_v28 = vadd.f32 %v4403_v38, %v4402_v2 }
 0x2f8   : > { %v4279_v62 = vpop.f32.mrb[39].mxu1 }
 0x2f9   : > { %v7091_v17 = vadd.f32 %v6937_v12, %v4277_v39  ;;  %v4280_v46 = vadd.f32 %v4279_v62, %v4278_v55 }
 0x2fa   : > { %4083 = vmatmul.mubr.msk.bf16.gmra.mrb[144].mxu1 %vm6752_vm10, %v6569_v44 }
 0x2fb   : > { %8091 = vst [vmem:[#allocation27_spill] sm:$0xff] %v7091_v17  ;;  %v7099_v63 = vadd.f32 %v6941_v40, %v4280_v46  ;;  %3076 = vmatprep.mubr.bf16.mxu1 %v8094_v31  ;;  %v4405_v20 = vpop.f32.mrb[96].mxu0 }
 0x2fc   : > { %v4406_v14 = vpop.f32.mrb[97].mxu0 }
 0x2fd   : > { %8093 = vst [vmem:[#allocation26_spill] sm:$0xff] %v7099_v63  ;;  %v4281_v57 = vpop.f32.mrb[40].mxu1  ;;  %v7102_v21 = vadd.f32 %v4406_v14, %v4405_v20  ;;  %v4408_v27 = vpop.f32.mrb[98].mxu0  ;;  %v8100_v20 = vld [vmem:[#allocation18_spill] sm:$0xff] }
 0x2fe   : > { %v4282_v13 = vpop.f32.mrb[41].mxu1  ;;  %v4409_v45 = vpop.f32.mrb[99].mxu0 }
 0x2ff   : > { %v4283_v12 = vadd.f32 %v4282_v13, %v4281_v57  ;;  %v4284_v34 = vpop.f32.mrb[42].mxu1  ;;  %v7107_v44 = vadd.f32 %v4409_v45, %v4408_v27  ;;  %v8102_v13 = vld [vmem:[#allocation41_spill] sm:$0xff]  ;;  %v8106_v45 = vld [vmem:[#allocation40_spill] sm:$0xff] }
 0x300   : > { %v4285_v35 = vpop.f32.mrb[43].mxu1  ;;  %v8104_v27 = vld [vmem:[#allocation17_spill] sm:$0xff] }
 0x301   : > { %v7105_v23 = vadd.f32 %v4283_v12, %v6954_v5  ;;  %v4286_v40 = vadd.f32 %v4285_v35, %v4284_v34 }
 0x302   : > { %4086 = vmatmul.mubr.msk.bf16.gmra.mrb[148].mxu1 %vm6766_vm2, %v8096_v53 }
 0x303   : > { %8095 = vst [vmem:[#allocation28_spill] sm:$0xff] %v7105_v23  ;;  %v7113_v60 = vadd.f32 %v4286_v40, %v6958_v51  ;;  %3084 = vmatprep.mubr.bf16.mxu1 %v8099_v11  ;;  %v4411_v47 = vpop.f32.mrb[100].mxu0 }
 0x304   : > { %v4412_v2 = vpop.f32.mrb[101].mxu0 }
 0x305   : > { %8098 = vst [vmem:[#allocation29_spill] sm:$0xff] %v7113_v60  ;;  %v4287_v39 = vpop.f32.mrb[44].mxu1  ;;  %v7116_v38 = vadd.f32 %v4412_v2, %v4411_v47  ;;  %v4414_v62 = vpop.f32.mrb[102].mxu0 }
 0x306   : > { %v4288_v55 = vpop.f32.mrb[45].mxu1  ;;  %v4415_v1 = vpop.f32.mrb[103].mxu0 }
 0x307   : > { %v4289_v5 = vadd.f32 %v4288_v55, %v4287_v39  ;;  %v4290_v46 = vpop.f32.mrb[46].mxu1  ;;  %v7121_v14 = vadd.f32 %v4415_v1, %v4414_v62  ;;  %v8107_v62 = vld [vmem:[#allocation19_spill] sm:$0xff] }
 0x308   : > { %v4291_v31 = vpop.f32.mrb[47].mxu1 }
 0x309   : > { %v7119_v57 = vadd.f32 %v8100_v20, %v4289_v5  ;;  %v4292_v51 = vadd.f32 %v4291_v31, %v4290_v46  ;;  %v8109_v20 = vld [vmem:[#allocation14_spill] sm:$0xff] }
 0x30a   : > { %4089 = vmatmul.mubr.msk.bf16.gmra.mrb[152].mxu1 %vm6780_vm15, %v8102_v13  ;;  %v8111_v13 = vld [vmem:[#allocation20_spill] sm:$0xff] }
 0x30b   : > { %8101 = vst [vmem:[#allocation30_spill] sm:$0xff] %v7119_v57  ;;  %v7127_v34 = vadd.f32 %v8104_v27, %v4292_v51  ;;  %3092 = vmatprep.mubr.bf16.mxu1 %v8106_v45  ;;  %v4417_v35 = vpop.f32.mrb[104].mxu0  ;;  %v8115_v51 = vld [vmem:[#allocation21_spill] sm:$0xff] }
 0x30c   : > { %v4418_v53 = vpop.f32.mrb[105].mxu0 }
 0x30d   : > { %8105 = vst [vmem:[#allocation31_spill] sm:$0xff] %v7127_v34  ;;  %v4293_v40 = vpop.f32.mrb[48].mxu1  ;;  %v7130_v11 = vadd.f32 %v4418_v53, %v4417_v35  ;;  %v4420_v39 = vpop.f32.mrb[106].mxu0 }
 0x30e   : > { %v4294_v7 = vpop.f32.mrb[49].mxu1  ;;  %v4421_v55 = vpop.f32.mrb[107].mxu0 }
 0x30f   : > { %v4295_v47 = vadd.f32 %v4294_v7, %v4293_v40  ;;  %v4296_v2 = vpop.f32.mrb[50].mxu1  ;;  %v7135_v1 = vadd.f32 %v4421_v55, %v4420_v39  ;;  %v8113_v55 = vld [vmem:[#allocation16_spill] sm:$0xff] }
 0x310   : > { %v4297_v5 = vpop.f32.mrb[51].mxu1 }
 0x311   : > { %v7133_v46 = vadd.f32 %v4295_v47, %v8107_v62  ;;  %v4298_v31 = vadd.f32 %v4297_v5, %v4296_v2 }
 0x312   : > { %4092 = vmatmul.mubr.msk.bf16.gmra.mrb[156].mxu1 %vm6793_vm3, %v8109_v20 }
 0x313   : > { %8108 = vst [vmem:[#allocation32_spill] sm:$0xff] %v7133_v46  ;;  %v7141_v12 = vadd.f32 %v4298_v31, %v8111_v13  ;;  %v4423_v27 = vpop.f32.mrb[108].mxu0 }
 0x314   : > { %v4424_v35 = vpop.f32.mrb[109].mxu0 }
 0x315   : > { %8112 = vst [vmem:[#allocation33_spill] sm:$0xff] %v7141_v12  ;;  %v4299_v45 = vpop.f32.mrb[52].mxu1  ;;  %v7143_v53 = vadd.f32 %v4424_v35, %v4423_v27  ;;  %v4426_v34 = vpop.f32.mrb[110].mxu0 }
 0x316   : > { %v4300_v40 = vpop.f32.mrb[53].mxu1  ;;  %v4427_v62 = vpop.f32.mrb[111].mxu0 }
 0x317   : > { %v4301_v7 = vadd.f32 %v4300_v40, %v4299_v45  ;;  %v4302_v47 = vpop.f32.mrb[54].mxu1  ;;  %v7148_v5 = vadd.f32 %v4427_v62, %v4426_v34 }
 0x318   : > { %v4303_v39 = vpop.f32.mrb[55].mxu1 }
 0x319   : > { %v7146_v2 = vadd.f32 %v8113_v55, %v4301_v7  ;;  %v4304_v20 = vadd.f32 %v4303_v39, %v4302_v47 }
 0x31b   : > { %8114 = vst [vmem:[#allocation34_spill] sm:$0xff] %v7146_v2  ;;  %v7151_v31 = vadd.f32 %v8115_v51, %v4304_v20  ;;  %v4429_v13 = vpop.f32.mrb[112].mxu0 }
 0x31c   : > { %v4430_v46 = vpop.f32.mrb[113].mxu0 }
 0x31d   : > { %8116 = vst [vmem:[#allocation35_spill] sm:$0xff] %v7151_v31  ;;  %v4305_v12 = vpop.f32.mrb[56].mxu1  ;;  %v7153_v27 = vadd.f32 %v4430_v46, %v4429_v13  ;;  %v4432_v35 = vpop.f32.mrb[114].mxu0 }
 0x31e   : > { %v4306_v57 = vpop.f32.mrb[57].mxu1  ;;  %v4433_v60 = vpop.f32.mrb[115].mxu0 }
 0x31f   : > { %v4307_v45 = vadd.f32 %v4306_v57, %v4305_v12  ;;  %v4308_v40 = vpop.f32.mrb[58].mxu1  ;;  %v7158_v34 = vadd.f32 %v4433_v60, %v4432_v35 }
 0x320   : > { %v4309_v23 = vpop.f32.mrb[59].mxu1 }
 0x321   : > { %v7156_v7 = vadd.f32 %v4307_v45, %v6980_v19  ;;  %v4310_v47 = vadd.f32 %v4309_v23, %v4308_v40 }
 0x323   : > { %8117 = vst [vmem:[#allocation36_spill] sm:$0xff] %v7156_v7  ;;  %v7161_v62 = vadd.f32 %v4310_v47, %v6982_v56  ;;  %v4435_v39 = vpop.f32.mrb[116].mxu0 }
 0x324   : > { %v4436_v20 = vpop.f32.mrb[117].mxu0 }
 0x325   : > { %8118 = vst [vmem:[#allocation37_spill] sm:$0xff] %v7161_v62  ;;  %v4311_v55 = vpop.f32.mrb[60].mxu1  ;;  %v7163_v46 = vadd.f32 %v4436_v20, %v4435_v39  ;;  %v4438_v57 = vpop.f32.mrb[118].mxu0 }
 0x326   : > { %v4312_v51 = vpop.f32.mrb[61].mxu1  ;;  %v4439_v13 = vpop.f32.mrb[119].mxu0 }
 0x327   : > { %v4314_v12 = vpop.f32.mrb[62].mxu1  ;;  %v7165_v2 = vadd.f32 %v4439_v13, %v4438_v57 }
 0x328   : > { %v4315_v31 = vpop.f32.mrb[63].mxu1 }
 0x32b   : > { %v4441_v19 = vpop.f32.mrb[120].mxu0 }
 0x32c   : > { %v4442_v60 = vpop.f32.mrb[121].mxu0 }
 0x32d   : > { %v4727_v45 = vpop.f32.mrb[64].mxu1  ;;  %v7170_v35 = vadd.f32 %v4442_v60, %v4441_v19  ;;  %v4444_v40 = vpop.f32.mrb[122].mxu0 }
 0x32e   : > { %v7168_v23 = vadd.f32 %v4727_v45, %v7004_v30  ;;  %v2671_v56 = vpop.f32.mrb[65].mxu1  ;;  %v4445_v55 = vpop.f32.mrb[123].mxu0 }
 0x32f   : > { %v4728_v47 = vpop.f32.mrb[66].mxu1  ;;  %v7175_v51 = vadd.f32 %v4445_v55, %v4444_v40 }
 0x330   : > { %v7173_v39 = vadd.f32 %v4728_v47, %v7009_v59  ;;  %v2673_v20 = vpop.f32.mrb[67].mxu1 }
 0x333   : > { %v4447_v31 = vpop.f32.mrb[124].mxu0 }
 0x334   : > { %v4448_v12 = vpop.f32.mrb[125].mxu0 }
 0x335   : > { %v4731_v57 = vpop.f32.mrb[68].mxu1  ;;  %v7180_v45 = vadd.f32 %v4448_v12, %v4447_v31  ;;  %v4450_v19 = vpop.f32.mrb[126].mxu0 }
 0x336   : > { %v7178_v13 = vadd.f32 %v4731_v57, %v7032_v3  ;;  %v2685_v30 = vpop.f32.mrb[69].mxu1  ;;  %v4451_v62 = vpop.f32.mrb[127].mxu0 }
 0x337   : > { %v7183_v60 = vadd.f32 %v7018_v36, %v2685_v30  ;;  %v4732_v56 = vpop.f32.mrb[70].mxu1  ;;  %v7188_v47 = vadd.f32 %v4451_v62, %v4450_v19 }
 0x338   : > { %v7186_v59 = vadd.f32 %v4732_v56, %v7037_v22  ;;  %v2688_v40 = vpop.f32.mrb[71].mxu1 }
 0x339   : > { %v7191_v55 = vadd.f32 %v7023_v18, %v2688_v40 }
 0x33b   : > { %v7193_v3 = vpop.f32.mrb[128].mxu0 }
 0x33c   : > { %v7198_v57 = vpop.f32.mrb[129].mxu0 }
 0x33d   : > { %v4735_v20 = vpop.f32.mrb[72].mxu1  ;;  %v7203_v22 = vpop.f32.mrb[130].mxu0 }
 0x33e   : > { %v7196_v31 = vadd.f32 %v4735_v20, %v7060_v10  ;;  %v2701_v36 = vpop.f32.mrb[73].mxu1  ;;  %v7208_v18 = vpop.f32.mrb[131].mxu0 }
 0x33f   : > { %v7201_v12 = vadd.f32 %v7046_v49, %v2701_v36  ;;  %v4736_v30 = vpop.f32.mrb[74].mxu1 }
 0x340   : > { %v7206_v62 = vadd.f32 %v4736_v30, %v7065_v6  ;;  %v2704_v19 = vpop.f32.mrb[75].mxu1 }
 0x341   : > { %v7211_v56 = vadd.f32 %v7051_v37, %v2704_v19 }
 0x343   : > { %v7213_v10 = vpop.f32.mrb[132].mxu0 }
 0x344   : > { %v7218_v49 = vpop.f32.mrb[133].mxu0 }
 0x345   : > { %v4739_v40 = vpop.f32.mrb[76].mxu1  ;;  %v7223_v6 = vpop.f32.mrb[134].mxu0 }
 0x346   : > { %v7216_v20 = vadd.f32 %v4739_v40, %v7088_v41  ;;  %v2717_v36 = vpop.f32.mrb[77].mxu1  ;;  %v7228_v37 = vpop.f32.mrb[135].mxu0 }
 0x347   : > { %v7221_v7 = vadd.f32 %v7074_v0, %v2717_v36  ;;  %v4740_v30 = vpop.f32.mrb[78].mxu1 }
 0x348   : > { %v7226_v63 = vadd.f32 %v4740_v30, %v7093_v28  ;;  %v2720_v19 = vpop.f32.mrb[79].mxu1 }
 0x349   : > { %v7231_v17 = vadd.f32 %v7079_v48, %v2720_v19 }
 0x34b   : > { %v7233_v41 = vpop.f32.mrb[136].mxu0 }
 0x34c   : > { %v7238_v0 = vpop.f32.mrb[137].mxu0 }
 0x34d   : > { %v4743_v40 = vpop.f32.mrb[80].mxu1  ;;  %v7243_v28 = vpop.f32.mrb[138].mxu0 }
 0x34e   : > { %v7236_v52 = vadd.f32 %v4743_v40, %v7116_v38  ;;  %v2733_v36 = vpop.f32.mrb[81].mxu1  ;;  %v7248_v48 = vpop.f32.mrb[139].mxu0 }
 0x34f   : > { %v7241_v29 = vadd.f32 %v7102_v21, %v2733_v36  ;;  %v4744_v30 = vpop.f32.mrb[82].mxu1 }
 0x350   : > { %8119 = vst [vmem:[#allocation39_spill] sm:$0xff] %v7236_v52  ;;  %v7246_v54 = vadd.f32 %v4744_v30, %v7121_v14  ;;  %v2736_v19 = vpop.f32.mrb[83].mxu1 }
 0x351   : > { %8120 = vst [vmem:[#allocation38_spill] sm:$0xff] %v7241_v29  ;;  %v7251_v58 = vadd.f32 %v7107_v44, %v2736_v19 }
 0x352   : > { %8121 = vst [vmem:[#allocation42_spill] sm:$0xff] %v7246_v54 }
 0x353   : > { %8122 = vst [vmem:[#allocation12_spill] sm:$0xff] %v7251_v58  ;;  %v7253_v38 = vpop.f32.mrb[140].mxu0 }
 0x354   : > { %v7258_v21 = vpop.f32.mrb[141].mxu0 }
 0x355   : > { %v4747_v40 = vpop.f32.mrb[84].mxu1  ;;  %v7263_v14 = vpop.f32.mrb[142].mxu0 }
 0x356   : > { %v7256_v52 = vadd.f32 %v4747_v40, %v7143_v53  ;;  %v2749_v36 = vpop.f32.mrb[85].mxu1  ;;  %v7268_v44 = vpop.f32.mrb[143].mxu0 }
 0x357   : > { %v7261_v29 = vadd.f32 %v7130_v11, %v2749_v36  ;;  %v4748_v30 = vpop.f32.mrb[86].mxu1 }
 0x358   : > { %8123 = vst [vmem:[#allocation15_spill] sm:$0xff] %v7256_v52  ;;  %v7266_v54 = vadd.f32 %v4748_v30, %v7148_v5  ;;  %v2752_v19 = vpop.f32.mrb[87].mxu1 }
 0x359   : > { %8124 = vst [vmem:[#allocation43_spill] sm:$0xff] %v7261_v29  ;;  %v7271_v58 = vadd.f32 %v7135_v1, %v2752_v19 }
 0x35a   : > { %8125 = vst [vmem:[#allocation13_spill] sm:$0xff] %v7266_v54 }
 0x35b   : > { %8126 = vst [vmem:[#allocation18_spill] sm:$0xff] %v7271_v58  ;;  %v7273_v53 = vpop.f32.mrb[144].mxu0 }
 0x35c   : > { %v7278_v11 = vpop.f32.mrb[145].mxu0 }
 0x35d   : > { %v4751_v40 = vpop.f32.mrb[88].mxu1  ;;  %v7283_v5 = vpop.f32.mrb[146].mxu0 }
 0x35e   : > { %v7276_v52 = vadd.f32 %v4751_v40, %v7163_v46  ;;  %v2765_v36 = vpop.f32.mrb[89].mxu1  ;;  %v7288_v1 = vpop.f32.mrb[147].mxu0 }
 0x35f   : > { %v7281_v29 = vadd.f32 %v7153_v27, %v2765_v36  ;;  %v4752_v30 = vpop.f32.mrb[90].mxu1 }
 0x360   : > { %8127 = vst [vmem:[#allocation41_spill] sm:$0xff] %v7276_v52  ;;  %v7286_v54 = vadd.f32 %v4752_v30, %v7165_v2  ;;  %v2768_v19 = vpop.f32.mrb[91].mxu1 }
 0x361   : > { %8128 = vst [vmem:[#allocation44_spill] sm:$0xff] %v7281_v29  ;;  %v7291_v58 = vadd.f32 %v7158_v34, %v2768_v19 }
 0x362   : > { %8129 = vst [vmem:[#allocation17_spill] sm:$0xff] %v7286_v54 }
 0x363   : > { %8130 = vst [vmem:[#allocation40_spill] sm:$0xff] %v7291_v58  ;;  %v7293_v46 = vpop.f32.mrb[148].mxu0 }
 0x364   : > { %8131 = vst [vmem:[#allocation19_spill] sm:$0xff] %v7293_v46  ;;  %v7298_v27 = vpop.f32.mrb[149].mxu0 }
 0x365   : > { %v4755_v40 = vpop.f32.mrb[92].mxu1  ;;  %v7303_v2 = vpop.f32.mrb[150].mxu0 }
 0x366   : > { %v7296_v52 = vadd.f32 %v4755_v40, %v7180_v45  ;;  %v2781_v36 = vpop.f32.mrb[93].mxu1  ;;  %8134 = vst [vmem:[#allocation20_spill] sm:$0xff] %v7303_v2  ;;  %v7308_v34 = vpop.f32.mrb[151].mxu0 }
 0x367   : > { %v7301_v29 = vadd.f32 %v7170_v35, %v2781_v36  ;;  %v4756_v30 = vpop.f32.mrb[94].mxu1  ;;  %8136 = vst [vmem:[#allocation21_spill] sm:$0xff] %v7308_v34 }
 0x368   : > { %8132 = vst [vmem:[#allocation14_spill] sm:$0xff] %v7296_v52  ;;  %v7306_v54 = vadd.f32 %v4756_v30, %v7188_v47  ;;  %v2784_v19 = vpop.f32.mrb[95].mxu1 }
 0x369   : > { %8133 = vst [vmem:[#allocation45_spill] sm:$0xff] %v7301_v29  ;;  %v7311_v58 = vadd.f32 %v7175_v51, %v2784_v19  ;;  %v7325_v51 = vld [vmem:[%s7705_s4] ss:$0 sm:$0xff] }
 0x36a   : > { %8135 = vst [vmem:[#allocation16_spill] sm:$0xff] %v7306_v54 }
 0x36b   : > { %8137 = vst [vmem:[#allocation46_spill] sm:$0xff] %v7311_v58  ;;  %v7313_v45 = vpop.f32.mrb[152].mxu0 }
 0x36c   : > { %8138 = vst [vmem:[#allocation47_spill] sm:$0xff] %v7313_v45  ;;  %v7315_v52 = vpop.f32.mrb[153].mxu0 }
 0x36d   : > { %v4493_v40 = vpop.f32.mrb[96].mxu1  ;;  %8139 = vst [vmem:[#allocation48_spill] sm:$0xff] %v7315_v52  ;;  %v7317_v36 = vpop.f32.mrb[154].mxu0 }
 0x36e   : > { %v4494_v46 = vpop.f32.mrb[97].mxu1  ;;  %8140 = vst [vmem:[#allocation49_spill] sm:$0xff] %v7317_v36  ;;  %v7319_v2 = vpop.f32.mrb[155].mxu0 }
 0x36f   : > { %v4495_v35 = vadd.f32 %v4494_v46, %v4493_v40  ;;  %v4496_v29 = vpop.f32.mrb[98].mxu1  ;;  %8141 = vst [vmem:[#allocation50_spill] sm:$0xff] %v7319_v2 }
 0x370   : > { %v4497_v47 = vpop.f32.mrb[99].mxu1 }
 0x371   : > { %v3136_v30 = vadd.f32 %v4495_v35, %v7198_v57  ;;  %v4498_v54 = vadd.f32 %v4497_v47, %v4496_v29 }
 0x373   : > { %v3262_v19 = vadd.f32 %v3136_v30, %v7168_v23  ;;  %v3139_v58 = vadd.f32 %v4498_v54, %v7208_v18  ;;  %v7333_v36 = vpop.f32.mrb[156].mxu0 }
 0x374   : > { %8142 = vst [vmem:[#allocation51_spill] sm:$0xff] %v7333_v36  ;;  %v7335_v2 = vpop.f32.mrb[157].mxu0 }
 0x375   : > { %v7330_v46 = vadd.f32 %v7325_v51, %v3262_v19  ;;  %v3263_v40 = vadd.f32 %v3139_v58, %v7173_v39  ;;  %v4499_v45 = vpop.f32.mrb[100].mxu1  ;;  %8143 = vst [vmem:[#allocation52_spill] sm:$0xff] %v7335_v2  ;;  %v7341_v23 = vpop.f32.mrb[158].mxu0 }
 0x376   : > { %v4500_v29 = vpop.f32.mrb[101].mxu1  ;;  %8144 = vst [vmem:[#allocation53_spill] sm:$0xff] %v7341_v23  ;;  %v7343_v18 = vpop.f32.mrb[159].mxu0 }
 0x377   : > { %v4142_v57 = vmul.f32 -1.442695, %v7330_v46  ;;  %v7339_v35 = vadd.f32 %v7325_v51, %v3263_v40  ;;  %v4501_v47 = vadd.f32 %v4500_v29, %v4499_v45  ;;  %v4502_v54 = vpop.f32.mrb[102].mxu1  ;;  %8145 = vst [vmem:[#allocation54_spill] sm:$0xff] %v7343_v18 }
 0x378   : > { %v4503_v30 = vpop.f32.mrb[103].mxu1 }
 0x379   : > { %5087 = vpow2.f32 %v4142_v57  ;;  %v4143_v58 = vmul.f32 -1.442695, %v7339_v35  ;;  %v2983_v39 = vadd.f32 %v4501_v47, %v6972_v4  ;;  %v4504_v19 = vadd.f32 %v4503_v30, %v4502_v54 }
 0x37b   : > { %5089 = vpow2.f32 %v4143_v58  ;;  %v3144_v36 = vadd.f32 %v7193_v3, %v2983_v39  ;;  %v2986_v2 = vadd.f32 %v4504_v19, %v6977_v24 }
 0x37d   : > { %v3264_v40 = vadd.f32 %v3144_v36, %v7183_v60  ;;  %v3147_v45 = vadd.f32 %v7203_v22, %v2986_v2  ;;  %v4505_v29 = vpop.f32.mrb[104].mxu1 }
 0x37e   : > { %v4506_v23 = vpop.f32.mrb[105].mxu1 }
 0x37f   : > { %v7352_v18 = vadd.f32 %v7325_v51, %v3264_v40  ;;  %v3265_v57 = vadd.f32 %v3147_v45, %v7191_v55  ;;  %v4507_v52 = vadd.f32 %v4506_v23, %v4505_v29  ;;  %v4508_v34 = vpop.f32.mrb[106].mxu1 }
 0x380   : > { %v4509_v4 = vpop.f32.mrb[107].mxu1 }
 0x381   : > { %v4144_v47 = vmul.f32 -1.442695, %v7352_v18  ;;  %v7357_v3 = vadd.f32 %v7325_v51, %v3265_v57  ;;  %v2991_v24 = vadd.f32 %v4507_v52, %v6985_v43  ;;  %v4510_v60 = vadd.f32 %v4509_v4, %v4508_v34 }
 0x383   : > { %v5088_v36 = vpop.eup %5087  ;;  %5091 = vpow2.f32 %v4144_v47  ;;  %v4145_v22 = vmul.f32 -1.442695, %v7357_v3  ;;  %v3152_v2 = vadd.f32 %v7218_v49, %v2991_v24  ;;  %v2994_v54 = vadd.f32 %v4510_v60, %v6991_v15 }
 0x384   : > { %v3429_v55 = vadd.f32 1.0, %v5088_v36 }
 0x385   : > { %v5090_v23 = vpop.eup %5089  ;;  %5093 = vpow2.f32 %v4145_v22  ;;  %v3266_v30 = vadd.f32 %v3152_v2, %v7178_v13  ;;  %v3155_v58 = vadd.f32 %v7228_v37, %v2994_v54  ;;  %v4511_v39 = vpop.f32.mrb[108].mxu1 }
 0x386   : > { %5095 = vrcp.f32 %v3429_v55  ;;  %v3430_v19 = vadd.f32 1.0, %v5090_v23  ;;  %v4512_v43 = vpop.f32.mrb[109].mxu1 }
 0x387   : > { %v7366_v52 = vadd.f32 %v7325_v51, %v3266_v30  ;;  %v3267_v34 = vadd.f32 %v3155_v58, %v7186_v59  ;;  %v4513_v40 = vadd.f32 %v4512_v43, %v4511_v39  ;;  %v4514_v49 = vpop.f32.mrb[110].mxu1 }
 0x388   : > { %5097 = vrcp.f32 %v3430_v19  ;;  %v4515_v15 = vpop.f32.mrb[111].mxu1 }
 0x389   : > { %v4146_v45 = vmul.f32 -1.442695, %v7366_v52  ;;  %v7371_v29 = vadd.f32 %v7325_v51, %v3267_v34  ;;  %v2999_v13 = vadd.f32 %v4513_v40, %v6995_v32  ;;  %v4516_v37 = vadd.f32 %v4515_v15, %v4514_v49  ;;  %v5216_v34 = vld [vmem:[%s5625_s6] sm:$0xff] }
 0x38b   : > { %5099 = vpow2.f32 %v4146_v45  ;;  %v4147_v57 = vmul.f32 -1.442695, %v7371_v29  ;;  %v3160_v4 = vadd.f32 %v7213_v10, %v2999_v13  ;;  %v3002_v47 = vadd.f32 %v4516_v37, %v7001_v26 }
 0x38d   : > { %v5092_v59 = vpop.eup %5091  ;;  %5101 = vpow2.f32 %v4147_v57  ;;  %v3268_v24 = vadd.f32 %v3160_v4, %v7201_v12  ;;  %v3163_v60 = vadd.f32 %v7223_v6, %v3002_v47  ;;  %v4517_v36 = vpop.f32.mrb[112].mxu1 }
 0x38e   : > { %v3431_v22 = vadd.f32 1.0, %v5092_v59  ;;  %v4518_v2 = vpop.f32.mrb[113].mxu1 }
 0x38f   : > { %v5094_v54 = vpop.eup %5093  ;;  %v7380_v32 = vadd.f32 %v7325_v51, %v3268_v24  ;;  %v3269_v55 = vadd.f32 %v3163_v60, %v7211_v56  ;;  %v4519_v23 = vadd.f32 %v4518_v2, %v4517_v36  ;;  %v4520_v10 = vpop.f32.mrb[114].mxu1 }
 0x390   : > { %v5096_v30 = vpop.eup %5095  ;;  %5103 = vrcp.f32 %v3431_v22  ;;  %v3432_v26 = vadd.f32 1.0, %v5094_v54  ;;  %v4521_v58 = vpop.f32.mrb[115].mxu1 }
 0x391   : > { %v3525_v12 = vmul.f32 %v5096_v30, %v7330_v46  ;;  %v4148_v6 = vmul.f32 -1.442695, %v7380_v32  ;;  %v7386_v39 = vadd.f32 %v7325_v51, %v3269_v55  ;;  %v3007_v19 = vadd.f32 %v4519_v23, %v7007_v61  ;;  %v5217_v61 = vld [vmem:[%s5625_s6 + $0x8] sm:$0xff] }
 0x392   : > { %v5098_v43 = vpop.eup %5097  ;;  %5105 = vrcp.f32 %v3432_v26  ;;  %v4522_v56 = vadd.f32 %v4521_v58, %v4520_v10 }
 0x393   : > { %v3557_v40 = vadd.f32 %v5216_v34, %v3525_v12  ;;  %v3526_v49 = vmul.f32 %v5098_v43, %v7339_v35  ;;  %5107 = vpow2.f32 %v4148_v6  ;;  %v4149_v15 = vmul.f32 -1.442695, %v7386_v39  ;;  %v5218_v12 = vld [vmem:[%s5625_s6 + $0x10] sm:$0xff] }
 0x394   : > { %v3168_v46 = vadd.f32 %v7238_v0, %v3007_v19  ;;  %v3010_v45 = vadd.f32 %v4522_v56, %v7015_v50 }
 0x395   : > { %v5100_v13 = vpop.eup %5099  ;;  %3589 = vst [vmem:[%s7396_s11] sm:$0xff] %v3557_v40  ;;  %v3558_v37 = vadd.f32 %v5217_v61, %v3526_v49  ;;  %5109 = vpow2.f32 %v4149_v15  ;;  %v4523_v57 = vpop.f32.mrb[116].mxu1  ;;  %v5219_v40 = vld [vmem:[%s5625_s6 + $0x18] sm:$0xff] }
 0x396   : > { %v3433_v4 = vadd.f32 1.0, %v5100_v13  ;;  %v3270_v35 = vadd.f32 %v3168_v46, %v7196_v31  ;;  %v3171_v47 = vadd.f32 %v7248_v48, %v3010_v45  ;;  %v4524_v59 = vpop.f32.mrb[117].mxu1 }
 0x397   : > { %v5102_v0 = vpop.eup %5101  ;;  %3590 = vst [vmem:[%s7396_s11 + $0x8] sm:$0xff] %v3558_v37  ;;  %v4525_v50 = vadd.f32 %v4524_v59, %v4523_v57  ;;  %v4526_v24 = vpop.f32.mrb[118].mxu1 }
 0x398   : > { %5111 = vrcp.f32 %v3433_v4  ;;  %v3434_v60 = vadd.f32 1.0, %v5102_v0  ;;  %v7404_v36 = vadd.f32 %v7325_v51, %v3270_v35  ;;  %v3271_v22 = vadd.f32 %v3171_v47, %v7206_v62  ;;  %v4527_v2 = vpop.f32.mrb[119].mxu1 }
 0x399   : > { %v3015_v54 = vadd.f32 %v4525_v50, %v7021_v16  ;;  %v4528_v55 = vadd.f32 %v4527_v2, %v4526_v24  ;;  %v5220_v50 = vld [vmem:[%s5625_s6 + $0x20] sm:$0xff] }
 0x39a   : > { %v5104_v31 = vpop.eup %5103  ;;  %5113 = vrcp.f32 %v3434_v60  ;;  %v4150_v48 = vmul.f32 -1.442695, %v7404_v36  ;;  %v7410_v23 = vadd.f32 %v7325_v51, %v3271_v22 }
 0x39b   : > { %v3527_v10 = vmul.f32 %v5104_v31, %v7352_v18  ;;  %v3176_v30 = vadd.f32 %v7233_v41, %v3015_v54  ;;  %v3018_v26 = vadd.f32 %v4528_v55, %v7029_v25  ;;  %v5221_v55 = vld [vmem:[%s5625_s6 + $0x28] sm:$0xff] }
 0x39c   : > { %v5106_v62 = vpop.eup %5105  ;;  %5115 = vpow2.f32 %v4150_v48  ;;  %v4151_v16 = vmul.f32 -1.442695, %v7410_v23 }
 0x39d   : > { %v5108_v58 = vpop.eup %5107  ;;  %v3559_v6 = vadd.f32 %v5218_v12, %v3527_v10  ;;  %v3528_v19 = vmul.f32 %v5106_v62, %v7357_v3  ;;  %v3272_v43 = vadd.f32 %v3176_v30, %v7221_v7  ;;  %v3179_v56 = vadd.f32 %v7243_v28, %v3018_v26  ;;  %v4529_v18 = vpop.f32.mrb[120].mxu1 }
 0x39e   : > { %v3435_v41 = vadd.f32 1.0, %v5108_v58  ;;  %5117 = vpow2.f32 %v4151_v16  ;;  %v4530_v34 = vpop.f32.mrb[121].mxu1 }
 0x39f   : > { %v5110_v25 = vpop.eup %5109  ;;  %3591 = vst [vmem:[%s7396_s11 + $0x10] sm:$0xff] %v3559_v6  ;;  %v3560_v49 = vadd.f32 %v5219_v40, %v3528_v19  ;;  %v7423_v15 = vadd.f32 %v7325_v51, %v3272_v43  ;;  %v3273_v46 = vadd.f32 %v3179_v56, %v7231_v17  ;;  %v4531_v45 = vadd.f32 %v4530_v34, %v4529_v18  ;;  %v4532_v3 = vpop.f32.mrb[122].mxu1 }
 0x3a0   : > { %5119 = vrcp.f32 %v3435_v41  ;;  %v3436_v7 = vadd.f32 1.0, %v5110_v25  ;;  %v4533_v28 = vpop.f32.mrb[123].mxu1  ;;  %v8146_v25 = vld [vmem:[#allocation38_spill] sm:$0xff] }
 0x3a1   : > { %3592 = vst [vmem:[%s7396_s11 + $0x18] sm:$0xff] %v3560_v49  ;;  %v4152_v13 = vmul.f32 -1.442695, %v7423_v15  ;;  %v7429_v61 = vadd.f32 %v7325_v51, %v3273_v46  ;;  %v3023_v37 = vadd.f32 %v4531_v45, %v7035_v42  ;;  %v4534_v57 = vadd.f32 %v4533_v28, %v4532_v3  ;;  %v5223_v3 = vld [vmem:[%s5625_s6 + $0x38] sm:$0xff] }
 0x3a2   : > { %v5112_v4 = vpop.eup %5111  ;;  %5121 = vrcp.f32 %v3436_v7 }
 0x3a3   : > { %v3529_v17 = vmul.f32 %v5112_v4, %v7366_v52  ;;  %5123 = vpow2.f32 %v4152_v13  ;;  %v4153_v35 = vmul.f32 -1.442695, %v7429_v61  ;;  %v3184_v47 = vadd.f32 %v7258_v21, %v3023_v37  ;;  %v8147_v37 = vld [vmem:[#allocation12_spill] sm:$0xff] }
 0x3a4   : > { %v5114_v59 = vpop.eup %5113  ;;  %v3026_v0 = vadd.f32 %v4534_v57, %v7043_v8 }
 0x3a5   : > { %v3561_v24 = vadd.f32 %v5220_v50, %v3529_v17  ;;  %v3530_v60 = vmul.f32 %v5114_v59, %v7371_v29  ;;  %5125 = vpow2.f32 %v4153_v35  ;;  %v3274_v42 = vadd.f32 %v3184_v47, %v7216_v20  ;;  %v4535_v22 = vpop.f32.mrb[124].mxu1  ;;  %v8148_v35 = vld [vmem:[#allocation23_spill] sm:$0xff] }
 0x3a6   : > { %v5116_v2 = vpop.eup %5115  ;;  %v3187_v52 = vadd.f32 %v7268_v44, %v3026_v0  ;;  %v4536_v54 = vpop.f32.mrb[125].mxu1 }
 0x3a7   : > { %3593 = vst [vmem:[%s7396_s11 + $0x20] sm:$0xff] %v3561_v24  ;;  %v3562_v31 = vadd.f32 %v5221_v55, %v3530_v60  ;;  %v3437_v21 = vadd.f32 1.0, %v5116_v2  ;;  %v7443_v48 = vadd.f32 %v7325_v51, %v3274_v42  ;;  %v4537_v8 = vadd.f32 %v4536_v54, %v4535_v22  ;;  %v4538_v10 = vpop.f32.mrb[126].mxu1  ;;  %v8149_v24 = vld [vmem:[#allocation22_spill] sm:$0xff] }
 0x3a8   : > { %v5118_v30 = vpop.eup %5117  ;;  %v3275_v29 = vadd.f32 %v3187_v52, %v7226_v63  ;;  %v4539_v26 = vpop.f32.mrb[127].mxu1  ;;  %v8150_v52 = vld [vmem:[#allocation39_spill] sm:$0xff] }
 0x3a9   : > { %3594 = vst [vmem:[%s7396_s11 + $0x28] sm:$0xff] %v3562_v31  ;;  %5127 = vrcp.f32 %v3437_v21  ;;  %v3438_v20 = vadd.f32 1.0, %v5118_v30  ;;  %v4154_v44 = vmul.f32 -1.442695, %v7443_v48  ;;  %v3031_v62 = vadd.f32 %v4537_v8, %v7049_v33  ;;  %v5222_v33 = vld [vmem:[%s5625_s6 + $0x30] sm:$0xff]  ;;  %v5224_v8 = vld [vmem:[%s5625_s6 + $0x40] sm:$0xff] }
 0x3aa   : > { %v5120_v16 = vpop.eup %5119  ;;  %v7450_v58 = vadd.f32 %v7325_v51, %v3275_v29  ;;  %v4540_v12 = vadd.f32 %v4539_v26, %v4538_v10  ;;  %v8151_v26 = vld [vmem:[#allocation42_spill] sm:$0xff] }
 0x3ab   : > { %v3531_v6 = vmul.f32 %v5120_v16, %v7380_v32  ;;  %5129 = vrcp.f32 %v3438_v20  ;;  %v3192_v19 = vadd.f32 %v7253_v38, %v3031_v62 }
 0x3ac   : > { %v5122_v63 = vpop.eup %5121  ;;  %5131 = vpow2.f32 %v4154_v44  ;;  %v4155_v43 = vmul.f32 -1.442695, %v7450_v58  ;;  %v3034_v56 = vadd.f32 %v4540_v12, %v7057_v9 }
 0x3ad   : > { %v5124_v18 = vpop.eup %5123  ;;  %v3563_v41 = vadd.f32 %v5222_v33, %v3531_v6  ;;  %v3532_v34 = vmul.f32 %v5122_v63, %v7386_v39  ;;  %v3276_v40 = vadd.f32 %v3192_v19, %v8146_v25  ;;  %v4541_v49 = vpop.f32.mrb[128].mxu1 }
 0x3ae   : > { %v3439_v32 = vadd.f32 1.0, %v5124_v18  ;;  %5133 = vpow2.f32 %v4155_v43  ;;  %v3195_v38 = vadd.f32 %v7263_v14, %v3034_v56  ;;  %v4542_v46 = vpop.f32.mrb[129].mxu1  ;;  %v8152_v56 = vld [vmem:[#allocation25_spill] sm:$0xff] }
 0x3af   : > { %v5126_v45 = vpop.eup %5125  ;;  %3595 = vst [vmem:[%s7396_s11 + $0x30] sm:$0xff] %v3563_v41  ;;  %v3564_v7 = vadd.f32 %v5223_v3, %v3532_v34  ;;  %v7463_v9 = vadd.f32 %v7325_v51, %v3276_v40  ;;  %v4543_v28 = vadd.f32 %v4542_v46, %v4541_v49  ;;  %v4544_v13 = vpop.f32.mrb[130].mxu1  ;;  %v8153_v49 = vld [vmem:[#allocation24_spill] sm:$0xff]  ;;  %v5226_v46 = vld [vmem:[%s5625_s6 + $0x50] sm:$0xff] }
 0x3b0   : > { %5135 = vrcp.f32 %v3439_v32  ;;  %v3440_v39 = vadd.f32 1.0, %v5126_v45  ;;  %v3277_v57 = vadd.f32 %v3195_v38, %v8147_v37  ;;  %v4545_v4 = vpop.f32.mrb[131].mxu1 }
 0x3b1   : > { %3596 = vst [vmem:[%s7396_s11 + $0x38] sm:$0xff] %v3564_v7  ;;  %v4156_v17 = vmul.f32 -1.442695, %v7463_v9  ;;  %v3039_v14 = vadd.f32 %v4543_v28, %v8148_v35  ;;  %v4546_v47 = vadd.f32 %v4545_v4, %v4544_v13  ;;  %v8154_v28 = vld [vmem:[#allocation43_spill] sm:$0xff] }
 0x3b2   : > { %5137 = vrcp.f32 %v3440_v39  ;;  %v7470_v59 = vadd.f32 %v7325_v51, %v3277_v57  ;;  %v5227_v57 = vld [vmem:[%s5625_s6 + $0x58] sm:$0xff] }
 0x3b3   : > { %v5128_v0 = vpop.eup %5127  ;;  %5139 = vpow2.f32 %v4156_v17  ;;  %v3200_v50 = vadd.f32 %v7278_v11, %v3039_v14  ;;  %v3042_v60 = vadd.f32 %v4546_v47, %v8149_v24  ;;  %v8156_v24 = vld [vmem:[#allocation27_spill] sm:$0xff] }
 0x3b4   : > { %v3533_v42 = vmul.f32 %v5128_v0, %v7404_v36  ;;  %v4157_v22 = vmul.f32 -1.442695, %v7470_v59 }
 0x3b5   : > { %v5130_v2 = vpop.eup %5129  ;;  %v3278_v54 = vadd.f32 %v3200_v50, %v8150_v52  ;;  %v3203_v55 = vadd.f32 %v7288_v1, %v3042_v60  ;;  %v4547_v31 = vpop.f32.mrb[132].mxu1  ;;  %v5225_v1 = vld [vmem:[%s5625_s6 + $0x48] sm:$0xff] }
 0x3b6   : > { %v5132_v21 = vpop.eup %5131  ;;  %v3565_v10 = vadd.f32 %v5224_v8, %v3533_v42  ;;  %v3534_v30 = vmul.f32 %v5130_v2, %v7410_v23  ;;  %5141 = vpow2.f32 %v4157_v22  ;;  %v4548_v11 = vpop.f32.mrb[133].mxu1 }
 0x3b7   : > { %v3441_v29 = vadd.f32 1.0, %v5132_v21  ;;  %v7481_v36 = vadd.f32 %v7325_v51, %v3278_v54  ;;  %v3279_v20 = vadd.f32 %v3203_v55, %v8151_v26  ;;  %v4549_v44 = vadd.f32 %v4548_v11, %v4547_v31  ;;  %v4550_v62 = vpop.f32.mrb[134].mxu1  ;;  %v8157_v54 = vld [vmem:[#allocation26_spill] sm:$0xff]  ;;  %v8159_v11 = vld [vmem:[#allocation21_spill] sm:$0xff] }
 0x3b8   : > { %v5134_v16 = vpop.eup %5133  ;;  %3597 = vst [vmem:[%s7396_s11 + $0x40] sm:$0xff] %v3565_v10  ;;  %v3566_v12 = vadd.f32 %v5225_v1, %v3534_v30  ;;  %v4551_v6 = vpop.f32.mrb[135].mxu1  ;;  %v8158_v10 = vld [vmem:[#allocation15_spill] sm:$0xff] }
 0x3b9   : > { %5143 = vrcp.f32 %v3441_v29  ;;  %v3442_v19 = vadd.f32 1.0, %v5134_v16  ;;  %v4158_v23 = vmul.f32 -1.442695, %v7481_v36  ;;  %v7488_v63 = vadd.f32 %v7325_v51, %v3279_v20 }
 0x3ba   : > { %v5136_v43 = vpop.eup %5135  ;;  %3598 = vst [vmem:[%s7396_s11 + $0x48] sm:$0xff] %v3566_v12  ;;  %v3047_v18 = vadd.f32 %v4549_v44, %v8152_v56  ;;  %v4552_v33 = vadd.f32 %v4551_v6, %v4550_v62  ;;  %v5228_v44 = vld [vmem:[%s5625_s6 + $0x60] sm:$0xff]  ;;  %v8160_v6 = vld [vmem:[#allocation13_spill] sm:$0xff] }
 0x3bb   : > { %v3535_v41 = vmul.f32 %v5136_v43, %v7423_v15  ;;  %5145 = vrcp.f32 %v3442_v19  ;;  %v4159_v34 = vmul.f32 -1.442695, %v7488_v63  ;;  %v5229_v56 = vld [vmem:[%s5625_s6 + $0x68] sm:$0xff] }
 0x3bc   : > { %v5138_v25 = vpop.eup %5137  ;;  %5147 = vpow2.f32 %v4158_v23  ;;  %v3208_v40 = vadd.f32 %v7273_v53, %v3047_v18  ;;  %v3050_v32 = vadd.f32 %v4552_v33, %v8153_v49 }
 0x3bd   : > { %v5140_v38 = vpop.eup %5139  ;;  %v3567_v45 = vadd.f32 %v5226_v46, %v3535_v41  ;;  %v3536_v3 = vmul.f32 %v5138_v25, %v7429_v61  ;;  %5149 = vpow2.f32 %v4159_v34  ;;  %v4553_v7 = vpop.f32.mrb[136].mxu1  ;;  %v8155_v61 = vld [vmem:[#allocation18_spill] sm:$0xff]  ;;  %v8161_v25 = vld [vmem:[#allocation28_spill] sm:$0xff] }
 0x3be   : > { %v3443_v15 = vadd.f32 1.0, %v5140_v38  ;;  %v3280_v13 = vadd.f32 %v3208_v40, %v8154_v28  ;;  %v3211_v39 = vadd.f32 %v7283_v5, %v3050_v32  ;;  %v4554_v37 = vpop.f32.mrb[137].mxu1 }
 0x3bf   : > { %3599 = vst [vmem:[%s7396_s11 + $0x50] sm:$0xff] %v3567_v45  ;;  %v3568_v4 = vadd.f32 %v5227_v57, %v3536_v3  ;;  %v4555_v53 = vadd.f32 %v4554_v37, %v4553_v7  ;;  %v4556_v17 = vpop.f32.mrb[138].mxu1  ;;  %v8162_v45 = vld [vmem:[#allocation19_spill] sm:$0xff]  ;;  %v8163_v7 = vld [vmem:[#allocation29_spill] sm:$0xff]  ;;  %v8164_v37 = vld [vmem:[#allocation44_spill] sm:$0xff] }
 0x3c0   : > { %v5142_v35 = vpop.eup %5141  ;;  %5151 = vrcp.f32 %v3443_v15  ;;  %v7503_v14 = vadd.f32 %v7325_v51, %v3280_v13  ;;  %v3281_v47 = vadd.f32 %v3211_v39, %v8155_v61  ;;  %v4557_v0 = vpop.f32.mrb[139].mxu1  ;;  %v5230_v13 = vld [vmem:[%s5625_s6 + $0x70] sm:$0xff] }
 0x3c1   : > { %3600 = vst [vmem:[%s7396_s11 + $0x58] sm:$0xff] %v3568_v4  ;;  %v3444_v50 = vadd.f32 1.0, %v5142_v35  ;;  %v3055_v60 = vadd.f32 %v4555_v53, %v8156_v24  ;;  %v4558_v5 = vadd.f32 %v4557_v0, %v4556_v17  ;;  %v8165_v35 = vld [vmem:[#allocation20_spill] sm:$0xff] }
 0x3c2   : > { %v4160_v42 = vmul.f32 -1.442695, %v7503_v14  ;;  %v7510_v22 = vadd.f32 %v7325_v51, %v3281_v47 }
 0x3c3   : > { %v5144_v2 = vpop.eup %5143  ;;  %5153 = vrcp.f32 %v3444_v50  ;;  %v3216_v52 = vadd.f32 %v7298_v27, %v3055_v60  ;;  %v3058_v55 = vadd.f32 %v4558_v5, %v8157_v54  ;;  %v5231_v5 = vld [vmem:[%s5625_s6 + $0x78] sm:$0xff] }
 0x3c4   : > { %v3537_v31 = vmul.f32 %v5144_v2, %v7443_v48  ;;  %5155 = vpow2.f32 %v4160_v42  ;;  %v4161_v21 = vmul.f32 -1.442695, %v7510_v22  ;;  %v8166_v2 = vld [vmem:[#allocation40_spill] sm:$0xff] }
 0x3c5   : > { %v5146_v8 = vpop.eup %5145  ;;  %v3282_v30 = vadd.f32 %v3216_v52, %v8158_v10  ;;  %v3219_v29 = vadd.f32 %v8159_v11, %v3058_v55  ;;  %v4559_v26 = vpop.f32.mrb[140].mxu1  ;;  %v8168_v11 = vld [vmem:[#allocation48_spill] sm:$0xff] }
 0x3c6   : > { %v5148_v20 = vpop.eup %5147  ;;  %v3569_v62 = vadd.f32 %v5228_v44, %v3537_v31  ;;  %v3538_v27 = vmul.f32 %v5146_v8, %v7450_v58  ;;  %5157 = vpow2.f32 %v4161_v21  ;;  %v4560_v16 = vpop.f32.mrb[141].mxu1  ;;  %v8167_v31 = vld [vmem:[#allocation30_spill] sm:$0xff] }
 0x3c7   : > { %v5150_v1 = vpop.eup %5149  ;;  %v3445_v48 = vadd.f32 1.0, %v5148_v20  ;;  %v7521_v12 = vadd.f32 %v7325_v51, %v3282_v30  ;;  %v3283_v19 = vadd.f32 %v3219_v29, %v8160_v6  ;;  %v4561_v23 = vadd.f32 %v4560_v16, %v4559_v26  ;;  %v4562_v43 = vpop.f32.mrb[142].mxu1 }
 0x3c8   : > { %3601 = vst [vmem:[%s7396_s11 + $0x60] sm:$0xff] %v3569_v62  ;;  %v3570_v18 = vadd.f32 %v5229_v56, %v3538_v27  ;;  %v3446_v33 = vadd.f32 1.0, %v5150_v1  ;;  %v4563_v41 = vpop.f32.mrb[143].mxu1  ;;  %v8169_v62 = vld [vmem:[#allocation31_spill] sm:$0xff] }
 0x3c9   : > { %5159 = vrcp.f32 %v3445_v48  ;;  %v4162_v58 = vmul.f32 -1.442695, %v7521_v12  ;;  %v7528_v34 = vadd.f32 %v7325_v51, %v3283_v19  ;;  %v3063_v40 = vadd.f32 %v4561_v23, %v8161_v25  ;;  %v8170_v48 = vld [vmem:[#allocation41_spill] sm:$0xff]  ;;  %v5232_v23 = vld [vmem:[%s5625_s6 + $0x80] sm:$0xff] }
 0x3ca   : > { %v5152_v49 = vpop.eup %5151  ;;  %3602 = vst [vmem:[%s7396_s11 + $0x68] sm:$0xff] %v3570_v18  ;;  %5161 = vrcp.f32 %v3446_v33  ;;  %v4564_v32 = vadd.f32 %v4563_v41, %v4562_v43  ;;  %v8171_v18 = vld [vmem:[#allocation50_spill] sm:$0xff] }
 0x3cb   : > { %v3539_v38 = vmul.f32 %v5152_v49, %v7463_v9  ;;  %5163 = vpow2.f32 %v4162_v58  ;;  %v4163_v46 = vmul.f32 -1.442695, %v7528_v34  ;;  %v3224_v3 = vadd.f32 %v8162_v45, %v3063_v40  ;;  %v5233_v58 = vld [vmem:[%s5625_s6 + $0x88] sm:$0xff] }
 0x3cc   : > { %v3066_v15 = vadd.f32 %v4564_v32, %v8163_v7  ;;  %v8173_v7 = vld [vmem:[#allocation32_spill] sm:$0xff] }
 0x3cd   : > { %v5154_v28 = vpop.eup %5153  ;;  %v3571_v39 = vadd.f32 %v5230_v13, %v3539_v38  ;;  %5165 = vpow2.f32 %v4163_v46  ;;  %v3284_v57 = vadd.f32 %v3224_v3, %v8164_v37  ;;  %v4565_v4 = vpop.f32.mrb[144].mxu1  ;;  %v8172_v38 = vld [vmem:[#allocation17_spill] sm:$0xff]  ;;  %v8174_v37 = vld [vmem:[#allocation47_spill] sm:$0xff] }
 0x3ce   : > { %v5156_v53 = vpop.eup %5155  ;;  %v3540_v17 = vmul.f32 %v5154_v28, %v7470_v59  ;;  %v3227_v9 = vadd.f32 %v8165_v35, %v3066_v15  ;;  %v4566_v61 = vpop.f32.mrb[145].mxu1 }
 0x3cf   : > { %3603 = vst [vmem:[%s7396_s11 + $0x70] sm:$0xff] %v3571_v39  ;;  %v3447_v47 = vadd.f32 1.0, %v5156_v53  ;;  %v7542_v0 = vadd.f32 %v7325_v51, %v3284_v57  ;;  %v4567_v50 = vadd.f32 %v4566_v61, %v4565_v4  ;;  %v4568_v24 = vpop.f32.mrb[146].mxu1  ;;  %v8175_v4 = vld [vmem:[#allocation33_spill] sm:$0xff] }
 0x3d0   : > { %v5158_v60 = vpop.eup %5157  ;;  %v3572_v42 = vadd.f32 %v5231_v5, %v3540_v17  ;;  %v3285_v52 = vadd.f32 %v3227_v9, %v8166_v2  ;;  %v4569_v54 = vpop.f32.mrb[147].mxu1  ;;  %v8176_v61 = vld [vmem:[#allocation45_spill] sm:$0xff] }
 0x3d1   : > { %5167 = vrcp.f32 %v3447_v47  ;;  %v3448_v55 = vadd.f32 1.0, %v5158_v60  ;;  %v4164_v59 = vmul.f32 -1.442695, %v7542_v0  ;;  %v3071_v21 = vadd.f32 %v4567_v50, %v8167_v31  ;;  %v8177_v50 = vld [vmem:[#allocation49_spill] sm:$0xff] }
 0x3d2   : > { %3604 = vst [vmem:[%s7396_s11 + $0x78] sm:$0xff] %v3572_v42  ;;  %v7550_v8 = vadd.f32 %v7325_v51, %v3285_v52  ;;  %v4570_v10 = vadd.f32 %v4569_v54, %v4568_v24  ;;  %v5234_v42 = vld [vmem:[%s5625_s6 + $0x90] sm:$0xff] }
 0x3d3   : > { %v5160_v30 = vpop.eup %5159  ;;  %5169 = vrcp.f32 %v3448_v55  ;;  %v3232_v29 = vadd.f32 %v8168_v11, %v3071_v21  ;;  %v5235_v11 = vld [vmem:[%s5625_s6 + $0x98] sm:$0xff] }
 0x3d4   : > { %v5162_v26 = vpop.eup %5161  ;;  %v3541_v20 = vmul.f32 %v5160_v30, %v7481_v36  ;;  %5171 = vpow2.f32 %v4164_v59  ;;  %v4165_v44 = vmul.f32 -1.442695, %v7550_v8  ;;  %v3074_v27 = vadd.f32 %v4570_v10, %v8169_v62  ;;  %v8178_v59 = vld [vmem:[#allocation46_spill] sm:$0xff] }
 0x3d5   : > { %v5164_v16 = vpop.eup %5163  ;;  %v3542_v1 = vmul.f32 %v5162_v26, %v7488_v63  ;;  %v3286_v6 = vadd.f32 %v3232_v29, %v8170_v48  ;;  %v4571_v19 = vpop.f32.mrb[148].mxu1 }
 0x3d6   : > { %v3573_v43 = vadd.f32 %v5232_v23, %v3541_v20  ;;  %v3449_v56 = vadd.f32 1.0, %v5164_v16  ;;  %5173 = vpow2.f32 %v4165_v44  ;;  %v3235_v33 = vadd.f32 %v8171_v18, %v3074_v27  ;;  %v4572_v36 = vpop.f32.mrb[149].mxu1  ;;  %v8179_v27 = vld [vmem:[#allocation34_spill] sm:$0xff]  ;;  %v8180_v23 = vld [vmem:[#allocation52_spill] sm:$0xff] }
 0x3d7   : > { %v5166_v41 = vpop.eup %5165  ;;  %v3574_v25 = vadd.f32 %v5233_v58, %v3542_v1  ;;  %v7562_v40 = vadd.f32 %v7325_v51, %v3286_v6  ;;  %v4573_v49 = vadd.f32 %v4572_v36, %v4571_v19  ;;  %v4574_v32 = vpop.f32.mrb[150].mxu1  ;;  %v5236_v36 = vld [vmem:[%s5625_s6 + $0xa0] sm:$0xff] }
 0x3d8   : > { %3605 = vst [vmem:[%s7396_s11 + $0x80] sm:$0xff] %v3573_v43  ;;  %5175 = vrcp.f32 %v3449_v56  ;;  %v3450_v63 = vadd.f32 1.0, %v5166_v41  ;;  %v3287_v46 = vadd.f32 %v3235_v33, %v8172_v38  ;;  %v4575_v45 = vpop.f32.mrb[151].mxu1  ;;  %v8181_v56 = vld [vmem:[#allocation35_spill] sm:$0xff] }
 0x3d9   : > { %3606 = vst [vmem:[%s7396_s11 + $0x88] sm:$0xff] %v3574_v25  ;;  %v4166_v3 = vmul.f32 -1.442695, %v7562_v40  ;;  %v3079_v15 = vadd.f32 %v4573_v49, %v8173_v7  ;;  %v4576_v28 = vadd.f32 %v4575_v45, %v4574_v32  ;;  %v8182_v49 = vld [vmem:[#allocation14_spill] sm:$0xff]  ;;  %v5237_v45 = vld [vmem:[%s5625_s6 + $0xa8] sm:$0xff] }
 0x3da   : > { %5177 = vrcp.f32 %v3450_v63  ;;  %v7570_v13 = vadd.f32 %v7325_v51, %v3287_v46  ;;  %v8183_v63 = vld [vmem:[#allocation54_spill] sm:$0xff] }
 0x3db   : > { %v5168_v39 = vpop.eup %5167  ;;  %5179 = vpow2.f32 %v4166_v3  ;;  %v3240_v57 = vadd.f32 %v8174_v37, %v3079_v15  ;;  %v3082_v53 = vadd.f32 %v4576_v28, %v8175_v4 }
 0x3dc   : > { %v3543_v17 = vmul.f32 %v5168_v39, %v7503_v14  ;;  %v4167_v35 = vmul.f32 -1.442695, %v7570_v13 }
 0x3dd   : > { %v5170_v9 = vpop.eup %5169  ;;  %v3288_v47 = vadd.f32 %v3240_v57, %v8176_v61  ;;  %v3243_v24 = vadd.f32 %v8177_v50, %v3082_v53  ;;  %v4577_v60 = vpop.f32.mrb[152].mxu1  ;;  %v8185_v53 = vld [vmem:[#allocation36_spill] sm:$0xff]  ;;  %v8186_v50 = vld [vmem:[#allocation51_spill] sm:$0xff] }
 0x3de   : > { %v5172_v5 = vpop.eup %5171  ;;  %v3575_v2 = vadd.f32 %v5234_v42, %v3543_v17  ;;  %v3544_v52 = vmul.f32 %v5170_v9, %v7510_v22  ;;  %5181 = vpow2.f32 %v4167_v35  ;;  %v4578_v54 = vpop.f32.mrb[153].mxu1 }
 0x3df   : > { %v3451_v55 = vadd.f32 1.0, %v5172_v5  ;;  %v7581_v14 = vadd.f32 %v7325_v51, %v3288_v47  ;;  %v3289_v31 = vadd.f32 %v3243_v24, %v8178_v59  ;;  %v4579_v21 = vadd.f32 %v4578_v54, %v4577_v60  ;;  %v4580_v10 = vpop.f32.mrb[154].mxu1  ;;  %v8187_v60 = vld [vmem:[#allocation37_spill] sm:$0xff] }
 0x3e0   : > { %v5174_v30 = vpop.eup %5173  ;;  %3607 = vst [vmem:[%s7396_s11 + $0x90] sm:$0xff] %v3575_v2  ;;  %v3576_v29 = vadd.f32 %v5235_v11, %v3544_v52  ;;  %v4581_v26 = vpop.f32.mrb[155].mxu1 }
 0x3e1   : > { %5183 = vrcp.f32 %v3451_v55  ;;  %v3452_v20 = vadd.f32 1.0, %v5174_v30  ;;  %v4168_v22 = vmul.f32 -1.442695, %v7581_v14  ;;  %v7588_v44 = vadd.f32 %v7325_v51, %v3289_v31  ;;  %v8188_v55 = vld [vmem:[#allocation53_spill] sm:$0xff] }
 0x3e2   : > { %v5176_v62 = vpop.eup %5175  ;;  %3608 = vst [vmem:[%s7396_s11 + $0x98] sm:$0xff] %v3576_v29  ;;  %v3087_v16 = vadd.f32 %v4579_v21, %v8179_v27  ;;  %v4582_v1 = vadd.f32 %v4581_v26, %v4580_v10  ;;  %v5238_v21 = vld [vmem:[%s5625_s6 + $0xb0] sm:$0xff] }
 0x3e3   : > { %v3545_v48 = vmul.f32 %v5176_v62, %v7521_v12  ;;  %5185 = vrcp.f32 %v3452_v20  ;;  %v4169_v6 = vmul.f32 -1.442695, %v7588_v44  ;;  %v5239_v20 = vld [vmem:[%s5625_s6 + $0xb8] sm:$0xff] }
 0x3e4   : > { %v5178_v19 = vpop.eup %5177  ;;  %5187 = vpow2.f32 %v4168_v22  ;;  %v3248_v43 = vadd.f32 %v8180_v23, %v3087_v16  ;;  %v3090_v18 = vadd.f32 %v4582_v1, %v8181_v56  ;;  %v5241_v56 = vld [vmem:[%s5625_s6 + $0xc8] sm:$0xff] }
 0x3e5   : > { %v5180_v33 = vpop.eup %5179  ;;  %v3577_v41 = vadd.f32 %v5236_v36, %v3545_v48  ;;  %v3546_v58 = vmul.f32 %v5178_v19, %v7528_v34  ;;  %5189 = vpow2.f32 %v4169_v6  ;;  %v4583_v25 = vpop.f32.mrb[156].mxu1  ;;  %v8184_v34 = vld [vmem:[#allocation16_spill] sm:$0xff] }
 0x3e6   : > { %v3453_v12 = vadd.f32 1.0, %v5180_v33  ;;  %v3290_v32 = vadd.f32 %v3248_v43, %v8182_v49  ;;  %v3251_v38 = vadd.f32 %v8183_v63, %v3090_v18  ;;  %v4584_v46 = vpop.f32.mrb[157].mxu1  ;;  %v5240_v48 = vld [vmem:[%s5625_s6 + $0xc0] sm:$0xff]  ;;  %v5243_v63 = vld [vmem:[%s5625_s6 + $0xd8] sm:$0xff] }
 0x3e7   : > { %3609 = vst [vmem:[%s7396_s11 + $0xa0] sm:$0xff] %v3577_v41  ;;  %v3578_v3 = vadd.f32 %v5237_v45, %v3546_v58  ;;  %v4585_v7 = vadd.f32 %v4584_v46, %v4583_v25  ;;  %v4586_v15 = vpop.f32.mrb[158].mxu1 }
 0x3e8   : > { %v5182_v28 = vpop.eup %5181  ;;  %5191 = vrcp.f32 %v3453_v12  ;;  %v7603_v39 = vadd.f32 %v7325_v51, %v3290_v32  ;;  %v3291_v37 = vadd.f32 %v3251_v38, %v8184_v34  ;;  %v4587_v57 = vpop.f32.mrb[159].mxu1  ;;  %v5242_v12 = vld [vmem:[%s5625_s6 + $0xd0] sm:$0xff] }
 0x3e9   : > { %3610 = vst [vmem:[%s7396_s11 + $0xa8] sm:$0xff] %v3578_v3  ;;  %v3454_v4 = vadd.f32 1.0, %v5182_v28  ;;  %v3095_v17 = vadd.f32 %v4585_v7, %v8185_v53  ;;  %v4588_v35 = vadd.f32 %v4587_v57, %v4586_v15  ;;  %v5244_v3 = vld [vmem:[%s5625_s6 + $0xe0] sm:$0xff]  ;;  %v5245_v28 = vld [vmem:[%s5625_s6 + $0xe8] sm:$0xff]  ;;  %v5246_v53 = vld [vmem:[%s5625_s6 + $0xf0] sm:$0xff] }
 0x3ea   : > { %v4170_v9 = vmul.f32 -1.442695, %v7603_v39  ;;  %v7610_v61 = vadd.f32 %v7325_v51, %v3291_v37 }
 0x3eb   : > { %v5184_v47 = vpop.eup %5183  ;;  %5193 = vrcp.f32 %v3454_v4  ;;  %v3256_v24 = vadd.f32 %v8186_v50, %v3095_v17  ;;  %v3098_v5 = vadd.f32 %v4588_v35, %v8187_v60  ;;  %v5247_v35 = vld [vmem:[%s5625_s6 + $0xf8] sm:$0xff] }
 0x3ec   : > { %v3547_v42 = vmul.f32 %v5184_v47, %v7542_v0  ;;  %5195 = vpow2.f32 %v4170_v9  ;;  %v4171_v2 = vmul.f32 -1.442695, %v7610_v61 }
 0x3ed   : > { %v5186_v52 = vpop.eup %5185  ;;  %v7617_v54 = vadd.f32 %v7325_v51, %v3256_v24  ;;  %v3259_v59 = vadd.f32 %v8188_v55, %v3098_v5 }
 0x3ee   : > { %v5188_v31 = vpop.eup %5187  ;;  %v3579_v10 = vadd.f32 %v5238_v21, %v3547_v42  ;;  %v3548_v30 = vmul.f32 %v5186_v52, %v7550_v8  ;;  %5197 = vpow2.f32 %v4171_v2 }
 0x3ef   : > { %v5190_v11 = vpop.eup %5189  ;;  %v3455_v29 = vadd.f32 1.0, %v5188_v31  ;;  %v4172_v0 = vmul.f32 -1.442695, %v7617_v54  ;;  %v3332_v26 = vadd.f32 %v7325_v51, %v3259_v59 }
 0x3f0   : > { %3611 = vst [vmem:[%s7396_s11 + $0xb0] sm:$0xff] %v3579_v10  ;;  %v3580_v22 = vadd.f32 %v5239_v20, %v3548_v30  ;;  %v3456_v62 = vadd.f32 1.0, %v5190_v11 }
 0x3f1   : > { %5199 = vrcp.f32 %v3455_v29  ;;  %v4173_v27 = vmul.f32 -1.442695, %v3332_v26 }
 0x3f2   : > { %v5192_v16 = vpop.eup %5191  ;;  %3612 = vst [vmem:[%s7396_s11 + $0xb8] sm:$0xff] %v3580_v22  ;;  %5201 = vrcp.f32 %v3456_v62 }
 0x3f3   : > { %v3549_v8 = vmul.f32 %v5192_v16, %v7562_v40  ;;  %5203 = vpow2.f32 %v4172_v0 }
 0x3f4   : > { %5205 = vpow2.f32 %v4173_v27 }
 0x3f5   : > { %v5194_v1 = vpop.eup %5193  ;;  %v3581_v6 = vadd.f32 %v5240_v48, %v3549_v8 }
 0x3f6   : > { %v5196_v51 = vpop.eup %5195  ;;  %v3550_v19 = vmul.f32 %v5194_v1, %v7570_v13 }
 0x3f7   : > { %3613 = vst [vmem:[%s7396_s11 + $0xc0] sm:$0xff] %v3581_v6  ;;  %v3457_v23 = vadd.f32 1.0, %v5196_v51 }
 0x3f8   : > { %v5198_v43 = vpop.eup %5197  ;;  %v3582_v18 = vadd.f32 %v5241_v56, %v3550_v19 }
 0x3f9   : > { %5207 = vrcp.f32 %v3457_v23  ;;  %v3458_v33 = vadd.f32 1.0, %v5198_v43 }
 0x3fa   : > { %3614 = vst [vmem:[%s7396_s11 + $0xc8] sm:$0xff] %v3582_v18 }
 0x3fb   : > { %v5200_v40 = vpop.eup %5199  ;;  %5209 = vrcp.f32 %v3458_v33 }
 0x3fc   : > { %v5202_v36 = vpop.eup %5201  ;;  %v3551_v41 = vmul.f32 %v5200_v40, %v7581_v14 }
 0x3fd   : > { %v5204_v58 = vpop.eup %5203  ;;  %v3552_v13 = vmul.f32 %v5202_v36, %v7588_v44 }
 0x3fe   : > { %v5206_v25 = vpop.eup %5205  ;;  %v3583_v49 = vadd.f32 %v5242_v12, %v3551_v41  ;;  %v3459_v32 = vadd.f32 1.0, %v5204_v58 }
 0x3ff   : > { %v3584_v38 = vadd.f32 %v5243_v63, %v3552_v13  ;;  %v3460_v46 = vadd.f32 1.0, %v5206_v25 }
 0x400   : > { %3615 = vst [vmem:[%s7396_s11 + $0xd0] sm:$0xff] %v3583_v49  ;;  %5211 = vrcp.f32 %v3459_v32 }
 0x401   : > { %3616 = vst [vmem:[%s7396_s11 + $0xd8] sm:$0xff] %v3584_v38  ;;  %5213 = vrcp.f32 %v3460_v46 }
 0x403   : > { %v5208_v14 = vpop.eup %5207 }
 0x404   : > { %v3553_v44 = vmul.f32 %v5208_v14, %v7603_v39 }
 0x405   : > { %v5210_v45 = vpop.eup %5209 }
 0x406   : > { %v3585_v7 = vadd.f32 %v5244_v3, %v3553_v44  ;;  %v3554_v15 = vmul.f32 %v5210_v45, %v7610_v61 }
 0x408   : > { %3617 = vst [vmem:[%s7396_s11 + $0xe0] sm:$0xff] %v3585_v7  ;;  %v3586_v34 = vadd.f32 %v5245_v28, %v3554_v15 }
 0x40a   : > { %v5212_v37 = vpop.eup %5211  ;;  %3618 = vst [vmem:[%s7396_s11 + $0xe8] sm:$0xff] %v3586_v34 }
 0x40b   : > { %v5214_v57 = vpop.eup %5213  ;;  %v3555_v39 = vmul.f32 %v5212_v37, %v7617_v54 }
 0x40c   : > { %v3556_v4 = vmul.f32 %v5214_v57, %v3332_v26 }
 0x40d   : > { %v3587_v17 = vadd.f32 %v5246_v53, %v3555_v39 }
 0x40e   : > { %v3588_v9 = vadd.f32 %v5247_v35, %v3556_v4 }
 0x40f   : > { %3619 = vst [vmem:[%s7396_s11 + $0xf0] sm:$0xff] %v3587_v17 }
 0x410   : > { %3620 = vst [vmem:[%s7396_s11 + $0xf8] sm:$0xff] %v3588_v9 }
 0x411   : > { %5347 = shalt.err (!%p5344_p2)
}
 0x412   : > { %s5348_s6 = scalar_lea.hbm %s7652_s9, 4096  ;;  %s5352_s8 = scalar_lea.hbm %s7706_s5, 8192 }
 0x413   : > { %p5349_p13 = scmp.ne.s32.totalorder %s7652_s9, %s5348_s6  ;;  %p5353_p4 = scmp.lt.u32.totalorder %s7652_s9, %s7706_s5 }
 0x414   : > { %p5354_p5 = scmp.lt.u32.totalorder %s5352_s8, %s5348_s6  ;;  %p5356_p11 = scmp.lt.u32.totalorder %s5348_s6, %s7652_s9 }
 0x415   : > { %p5350_p6 = pnand %p5349_p13, %p8189_p0 }
 0x416   : > { %p5355_p8 = por %p5354_p5, %p5353_p4 }
 0x417   : > { %p5351_p10 = pneg %p5350_p6 }
 0x418   : > { %p5357_p1 = por %p5356_p11, %p5355_p8 }
 0x41a   : > { %p5358_p3 = pnand %p5357_p1, %p5351_p10 }
 0x41c   : > { %5361 = shalt.err (!%p5358_p3)
}
 0x41d   : > { %s5415_s28 = smov 128   ;;  %s5416_s15 = smov 8  }
 0x41e   : > { %4815 = dma.vmem_to_hbm [thread:$0]  (%p8189_p0), %s7654_s30, 4096, %s7652_s9, %s3622_s22, %s5415_s28, %s5415_s28, %s5416_s15  }
 0x41f PF: > { %s3650_s16 = sand.u32 1, %s5392_s18   ;;  %p8190_p7 = scmp.ne.s32.totalorder %s7808_s25, 0 }
 0x420   : > { %p8191_p9 = scmp.ge.s32.totalorder %s5404_s21, 2  ;;  %s3651_s12 = scalar_lea.sflag [#allocation4], %s3650_s16 }
 0x422   : > { %p4829_p12 = pnand %p8191_p9, %p8190_p7 }
 0x424   : > { %5387 = dma.done.wait (!%p4829_p12), %s3651_s12, 4096  }
 0x425   : > { %5389 = vsyncadd (!%p4829_p12), %s3651_s12, 4294963200  ;;  %p19_p2 = scmp.ge.s32.totalorder %s5557_s14, 4   ;;  %s8192_s18 = smov %s5396_s19 }
 0x426   : > { %s8193_s19 = smov %s5400_s20  ;;  %s8194_s20 = smov %s5573_s27 }
 0x427   : > { %s8195_s21 = smov %s5557_s14  ;;  %21 = sbr.rel (!%p19_p2) target bundleno = 6 (0x6), region = 95 }
 0x42e   :  { %3656 = vsyncpa [#allocation3], 1 }
 0x42f   :  { %3658 = vsyncpa [#allocation3 + $0x1], 1 }
 0x430   :  { %3659 = vsyncpa [#allocation6], 1 }
 0x431   :  { %3660 = vsyncpa [#allocation4], 1 }
 0x432   :  { %3662 = vsyncpa [#allocation4 + $0x1], 1 }

</bundles_post_ra>
